<compile_context>
chip_gen: v6e
topology: v6e:2x2x1
jax: 0.10.0
libtpu: 0.0.40
codegen_flags: <defaults>
</compile_context>

<pallas_src>
import functools

import jax
import jax.numpy as jnp
from jax.experimental import pallas as pl
from jax.experimental.pallas import tpu as pltpu


def _round_up(a, b):
    return (a + b - 1) // b * b


def _attention_kernel(scale_ref, shift_ref, xq_ref, xkv_ref,
                      wq_ref, wkv_ref, wout_ref, bout_ref,
                      o_ref,
                      q_s, m_s, l_s, acc_s,
                      *, heads, dim_head, n_tokens, kv_tile, sm_scale, mask_needed):
    ki = pl.program_id(2)           # kv-tile index (innermost, "arbitrary")
    n_kv = pl.num_programs(2)
    hidden = heads * dim_head

    gscale = scale_ref[0]           # (1, c) f32  GroupNorm folded scale
    gshift = shift_ref[0]           # (1, c) f32  GroupNorm folded shift

    # Per-(batch, q-tile) init: project Q for ALL heads with one wide matmul,
    # reset the per-head online-softmax state.
    @pl.when(ki == 0)
    def _():
        xq = xq_ref[0].astype(jnp.float32) * gscale + gshift                 # (tq, c) f32
        q = jnp.dot(xq.astype(jnp.bfloat16), wq_ref[...],
                    preferred_element_type=jnp.float32)                      # (tq, hidden)
        q = (q * sm_scale).astype(jnp.bfloat16)
        for h in range(heads):
            q_s[h] = q[:, h * dim_head:(h + 1) * dim_head]
        m_s[...] = jnp.full_like(m_s, -jnp.inf)
        l_s[...] = jnp.zeros_like(l_s)
        acc_s[...] = jnp.zeros_like(acc_s)

    # KV tile: fused GroupNorm affine + K/V projection for ALL heads in one MXU call.
    xkv = xkv_ref[0].astype(jnp.float32) * gscale + gshift                   # (tk, c) f32
    kv = jnp.dot(xkv.astype(jnp.bfloat16), wkv_ref[...],
                 preferred_element_type=jnp.float32).astype(jnp.bfloat16)    # (tk, 2*hidden)

    # Additive mask bias for the padded KV tail: a (1, tk) row, zero on valid columns.
    if mask_needed:
        col = ki * kv_tile + jax.lax.broadcasted_iota(jnp.int32, (1, kv_tile), 1)
        bias = jnp.where(col < n_tokens, 0.0, -1e30).astype(jnp.float32)     # (1, tk)

    # Per-head online softmax (elementwise math in f32; MXU inputs bf16).
    for h in range(heads):
        k_h = kv[:, h * dim_head:(h + 1) * dim_head]                         # (tk, dh)
        v_h = kv[:, hidden + h * dim_head: hidden + (h + 1) * dim_head]      # (tk, dh)
        # Contract last dims directly -> no materialised transpose of k.
        s = jax.lax.dot_general(q_s[h], k_h,
                                dimension_numbers=(((1,), (1,)), ((), ())),
                                preferred_element_type=jnp.float32)          # (tq, tk)
        if mask_needed:
            s = s + bias

        m_prev = m_s[h]                                                      # (tq, 1)
        m_new = jnp.maximum(m_prev, jnp.max(s, axis=-1, keepdims=True))
        alpha = jnp.exp(m_prev - m_new)
        p = jnp.exp(s - m_new)
        l_s[h] = alpha * l_s[h] + jnp.sum(p, axis=-1, keepdims=True)
        acc_s[h] = alpha * acc_s[h] + jnp.dot(p.astype(jnp.bfloat16), v_h,
                                              preferred_element_type=jnp.float32)
        m_s[h] = m_new

    # End of the KV stream: normalize per head (exact division, runs once per q tile),
    # then ONE wide out-projection (tq, hidden) @ (hidden, c) + bias.
    @pl.when(ki == n_kv - 1)
    def _():
        outs = []
        for h in range(heads):
            outs.append((acc_s[h] / l_s[h]).astype(jnp.bfloat16))            # (tq, dh)
        out_all = jnp.concatenate(outs, axis=-1)                             # (tq, hidden)
        y = jnp.dot(out_all, wout_ref[...], preferred_element_type=jnp.float32)
        o_ref[0] = (y + bout_ref[...]).astype(o_ref.dtype)


def attention_forward(x, params, *, heads, dim_head, eps=1e-5):
    """x: (b, c, d, h, w) float32 (NCDHW, PyTorch convention)."""
    b, c, d, hh, w = x.shape
    n = d * hh * w
    hidden = heads * dim_head

    # ---- GroupNorm(num_groups=1) stats: tiny per-batch reduction in XLA (f32, from the
    #      original array), folded into a per-(batch, channel) affine for the kernel. ----
    xf = x.reshape(b, -1).astype(jnp.float32)
    mean = jnp.mean(xf, axis=1)
    var = jnp.mean(jnp.square(xf - mean[:, None]), axis=1)
    rstd = jax.lax.rsqrt(var + eps)
    gamma = params["gn_weight"].astype(jnp.float32)
    beta = params["gn_bias"].astype(jnp.float32)
    gscale_c = rstd[:, None] * gamma[None, :]                   # (b, c)
    gshift_c = beta[None, :] - mean[:, None] * gscale_c         # (b, c)

    # ---- channel padding to a lane-dense multiple of 128 (zeros pass through affine and
    #      projections unchanged; cropped at the end).  No-op when c is already aligned. ----
    c_pad = max(_round_up(c, 128), 128)
    gscale = jnp.pad(gscale_c, ((0, 0), (0, c_pad - c))).reshape(b, 1, c_pad)
    gshift = jnp.pad(gshift_c, ((0, 0), (0, c_pad - c))).reshape(b, 1, c_pad)

    # ---- tokens: NCDHW -> (b, N, c) bf16, row-major over (d, h, w) ----
    x_tok = jnp.transpose(x, (0, 2, 3, 4, 1)).reshape(b, n, c).astype(jnp.bfloat16)

    # ---- tiling: pad N to a tile multiple (tail masked in-kernel) ----
    if n <= 256:
        tile = _round_up(n, 16)        # single-tile case, bf16 sublane aligned
    else:
        tile = 256                     # MXU/pipeline friendly; see header for per-gen tuning
    n_pad = _round_up(n, tile)
    x_tok = jnp.pad(x_tok, ((0, 0), (0, n_pad - n), (0, c_pad - c)))
    n_q = n_pad // tile
    n_kv = n_pad // tile

    # ---- weights: fused layouts, bf16 for the MXU, rows/cols zero-padded to c_pad ----
    # w_qkv: (c, 3*hidden), columns ordered (qkv, head, dim_head)
    wq = jnp.pad(params["w_qkv"][:, :hidden],
                 ((0, c_pad - c), (0, 0))).astype(jnp.bfloat16)              # (c_pad, hidden)
    wkv = jnp.pad(params["w_qkv"][:, hidden:],
                  ((0, c_pad - c), (0, 0))).astype(jnp.bfloat16)             # (c_pad, 2*hidden)
    wout = jnp.pad(params["w_out"],
                   ((0, 0), (0, c_pad - c))).astype(jnp.bfloat16)            # (hidden, c_pad)
    bout = jnp.pad(params["b_out"], (0, c_pad - c)).reshape(1, c_pad).astype(jnp.float32)

    kernel = functools.partial(
        _attention_kernel,
        heads=heads, dim_head=dim_head, n_tokens=n, kv_tile=tile,
        sm_scale=dim_head ** -0.5, mask_needed=(n_pad != n))

    out_tok = pl.pallas_call(
        kernel,
        out_shape=jax.ShapeDtypeStruct((b, n_pad, c_pad), jnp.float32),
        grid_spec=pltpu.PrefetchScalarGridSpec(
            num_scalar_prefetch=0,
            grid=(b, n_q, n_kv),
            in_specs=[
                pl.BlockSpec((1, 1, c_pad), lambda bi, qi, ki: (bi, 0, 0)),       # gn scale
                pl.BlockSpec((1, 1, c_pad), lambda bi, qi, ki: (bi, 0, 0)),       # gn shift
                pl.BlockSpec((1, tile, c_pad), lambda bi, qi, ki: (bi, qi, 0)),   # x (q tile)
                pl.BlockSpec((1, tile, c_pad), lambda bi, qi, ki: (bi, ki, 0)),   # x (kv tile)
                pl.BlockSpec((c_pad, hidden), lambda bi, qi, ki: (0, 0)),         # wq (all heads)
                pl.BlockSpec((c_pad, 2 * hidden), lambda bi, qi, ki: (0, 0)),     # wk|wv fused
                pl.BlockSpec((hidden, c_pad), lambda bi, qi, ki: (0, 0)),         # wout
                pl.BlockSpec((1, c_pad), lambda bi, qi, ki: (0, 0)),              # out bias
            ],
            out_specs=pl.BlockSpec((1, tile, c_pad), lambda bi, qi, ki: (bi, qi, 0)),
            scratch_shapes=[
                pltpu.VMEM((heads, tile, dim_head), jnp.bfloat16),   # scaled Q, per head
                pltpu.VMEM((heads, tile, 1), jnp.float32),           # running max
                pltpu.VMEM((heads, tile, 1), jnp.float32),           # running sum
                pltpu.VMEM((heads, tile, dim_head), jnp.float32),    # PV accumulator
            ]),
        compiler_params=pltpu.CompilerParams(
            dimension_semantics=("parallel", "parallel", "arbitrary"),
            vmem_limit_bytes=48 * 1024 * 1024),
    )(gscale, gshift, x_tok, x_tok, wq, wkv, wout, bout)

    # (b, Npad, Cpad) -> crop padding -> NCDHW
    out_tok = out_tok[:, :n, :c]
    return jnp.transpose(out_tok.reshape(b, d, hh, w, c), (0, 4, 1, 2, 3))


def reference_forward(x, params, *, heads, dim_head):
    """Pure-JAX reference mirroring the PyTorch module semantics."""
    b, c, d, hh, w = x.shape
    n = d * hh * w
    hidden = heads * dim_head
    xf = x.reshape(b, -1)
    mean = xf.mean(axis=1, keepdims=True)
    var = ((xf - mean) ** 2).mean(axis=1, keepdims=True)
    xn = ((xf - mean) / jnp.sqrt(var + 1e-5)).reshape(x.shape)
    xn = xn * params["gn_weight"].reshape(1, c, 1, 1, 1) + params["gn_bias"].reshape(1, c, 1, 1, 1)
    xt = jnp.transpose(xn, (0, 2, 3, 4, 1)).reshape(b, n, c)
    qkv = xt @ params["w_qkv"]
    q, k, v = jnp.split(qkv, 3, axis=-1)

    def split_heads(t):
        return jnp.transpose(t.reshape(b, n, heads, dim_head), (0, 2, 1, 3))

    q, k, v = map(split_heads, (q, k, v))
    sim = jnp.einsum("bhid,bhjd->bhij", q, k) * (dim_head ** -0.5)
    attn = jax.nn.softmax(sim, axis=-1)
    out = jnp.einsum("bhij,bhjd->bhid", attn, v)
    out = jnp.transpose(out, (0, 2, 1, 3)).reshape(b, n, hidden)
    y = out @ params["w_out"] + params["b_out"].reshape(1, 1, c)
    return jnp.transpose(y.reshape(b, d, hh, w, c), (0, 4, 1, 2, 3))


def init_params(key, dim, heads, dim_head):
    hidden = heads * dim_head
    k1, k2, k3 = jax.random.split(key, 3)
    return {
        "gn_weight": jnp.ones((dim,), jnp.float32),
        "gn_bias": jnp.zeros((dim,), jnp.float32),
        # Conv3d(dim, 3*hidden, 1, bias=False): weight -> (dim, 3*hidden)
        "w_qkv": jax.random.normal(k1, (dim, 3 * hidden), jnp.float32) * 0.05,
        # Conv3d(hidden, dim, 1): weight -> (hidden, dim); bias (dim,)
        "w_out": jax.random.normal(k2, (hidden, dim), jnp.float32) * 0.05,
        "b_out": jax.random.normal(k3, (dim,), jnp.float32) * 0.01,
    }


if __name__ == "__main__":
    key = jax.random.PRNGKey(0)

    configs = [
        # (batch, dim, heads, dim_head, (d, h, w))
        (2, 8, 4, 32, (4, 4, 4)),      # N=64: single tile, channel-padded path
        (1, 8, 2, 32, (3, 5, 5)),      # N=75: padded + masked KV tail
        (1, 8, 2, 32, (8, 8, 8)),      # N=512: multi q/KV tile online-softmax path
        (1, 128, 4, 32, (4, 4, 4)),    # c=128: lane-dense path without channel padding
    ]

    for (b, dim, heads, dim_head, (d, h, w)) in configs:
        key, kx, kp = jax.random.split(key, 3)
        x = jax.random.normal(kx, (b, dim, d, h, w), jnp.float32)
        params = init_params(kp, dim, heads, dim_head)

        fwd = jax.jit(functools.partial(attention_forward, heads=heads, dim_head=dim_head))
        out = jax.block_until_ready(fwd(x, params))
        ref = reference_forward(x, params, heads=heads, dim_head=dim_head)

        assert out.shape == (b, dim, d, h, w)
        err = float(jnp.max(jnp.abs(out - ref)))
        # bf16 x stream + bf16 MXU inputs -> looser tolerance than pure-f32
        assert jnp.allclose(out, ref, atol=3e-2, rtol=3e-2), \
            f"mismatch vs reference (max abs err {err})"

    print("KERNEL_OK")
</pallas_src>

<mosaic_0001>
module attributes {stable_mosaic.version = 11 : i64} {
  func.func @_attention_kernel(%arg0: i32, %arg1: i32, %arg2: i32, %arg3: memref<1x1x128xf32, #tpu.memory_space<vmem>>, %arg4: memref<1x1x128xf32, #tpu.memory_space<vmem>>, %arg5: memref<1x64x128xbf16, #tpu.memory_space<vmem>>, %arg6: memref<1x64x128xbf16, #tpu.memory_space<vmem>>, %arg7: memref<128x128xbf16, #tpu.memory_space<vmem>>, %arg8: memref<128x256xbf16, #tpu.memory_space<vmem>>, %arg9: memref<128x128xbf16, #tpu.memory_space<vmem>>, %arg10: memref<1x128xf32, #tpu.memory_space<vmem>>, %arg11: memref<1x64x128xf32, #tpu.memory_space<vmem>>, %arg12: memref<4x64x32xbf16, #tpu.memory_space<vmem>>, %arg13: memref<4x64x1xf32, #tpu.memory_space<vmem>>, %arg14: memref<4x64x1xf32, #tpu.memory_space<vmem>>, %arg15: memref<4x64x32xf32, #tpu.memory_space<vmem>>) attributes {dimension_semantics = [#tpu.dimension_semantics<parallel>, #tpu.dimension_semantics<parallel>, #tpu.dimension_semantics<arbitrary>], iteration_bounds = array<i64: 2, 1, 1>, scalar_prefetch = 0 : i64, scratch_operands = 4 : i64, tpu.core_type = #tpu.core_type<tc>, window_params = [{transform_indices = @transform_0, window_bounds = array<i64: 1, 1, 128>}, {transform_indices = @transform_1, window_bounds = array<i64: 1, 1, 128>}, {transform_indices = @transform_2, window_bounds = array<i64: 1, 64, 128>}, {transform_indices = @transform_3, window_bounds = array<i64: 1, 64, 128>}, {pipeline_mode = #tpu.pipeline_mode<synchronous>, transform_indices = @transform_4, window_bounds = array<i64: 128, 128>}, {pipeline_mode = #tpu.pipeline_mode<synchronous>, transform_indices = @transform_5, window_bounds = array<i64: 128, 256>}, {pipeline_mode = #tpu.pipeline_mode<synchronous>, transform_indices = @transform_6, window_bounds = array<i64: 128, 128>}, {pipeline_mode = #tpu.pipeline_mode<synchronous>, transform_indices = @transform_7, window_bounds = array<i64: 1, 128>}, {transform_indices = @transform_8, window_bounds = array<i64: 1, 64, 128>}]} {
    %c0 = arith.constant 0 : index
    %c0_0 = arith.constant 0 : index
    %c0_1 = arith.constant 0 : index
    %0 = vector.load %arg3[%c0, %c0_0, %c0_1] : memref<1x1x128xf32, #tpu.memory_space<vmem>>, vector<1x1x128xf32>
    %1 = vector.shape_cast %0 : vector<1x1x128xf32> to vector<1x128xf32>
    %c0_2 = arith.constant 0 : index
    %c0_3 = arith.constant 0 : index
    %c0_4 = arith.constant 0 : index
    %2 = vector.load %arg4[%c0_2, %c0_3, %c0_4] : memref<1x1x128xf32, #tpu.memory_space<vmem>>, vector<1x1x128xf32>
    %3 = vector.shape_cast %2 : vector<1x1x128xf32> to vector<1x128xf32>
    %c0_i32 = arith.constant 0 : i32
    %4 = arith.cmpi eq, %arg2, %c0_i32 : i32
    %5 = arith.extui %4 : i1 to i32
    %c0_i32_5 = arith.constant 0 : i32
    %6 = arith.cmpi ne, %5, %c0_i32_5 : i32
    scf.if %6 {
      %c0_110 = arith.constant 0 : index
      %c0_111 = arith.constant 0 : index
      %c0_112 = arith.constant 0 : index
      %169 = vector.load %arg5[%c0_110, %c0_111, %c0_112] : memref<1x64x128xbf16, #tpu.memory_space<vmem>>, vector<1x64x128xbf16>
      %170 = vector.shape_cast %169 : vector<1x64x128xbf16> to vector<64x128xbf16>
      %171 = arith.extf %170 : vector<64x128xbf16> to vector<64x128xf32>
      %172 = vector.broadcast %1 : vector<1x128xf32> to vector<64x128xf32>
      %173 = arith.mulf %171, %172 : vector<64x128xf32>
      %174 = vector.broadcast %3 : vector<1x128xf32> to vector<64x128xf32>
      %175 = arith.addf %173, %174 : vector<64x128xf32>
      %176 = arith.truncf %175 : vector<64x128xf32> to vector<64x128xbf16>
      %c0_113 = arith.constant 0 : index
      %c0_114 = arith.constant 0 : index
      %177 = vector.load %arg7[%c0_113, %c0_114] : memref<128x128xbf16, #tpu.memory_space<vmem>>, vector<128x128xbf16>
      %cst_115 = arith.constant dense<0.000000e+00> : vector<64x128xf32>
      %178 = tpu.matmul %176, %177, %cst_115 {dimension_numbers = #tpu.dot_dimension_numbers<[1], [0], [0], [1], [0, 0, 1, 1], [], []>} : vector<64x128xbf16>, vector<128x128xbf16>, vector<64x128xf32> -> vector<64x128xf32>
      %cst_116 = arith.constant 0.176776692 : f32
      %179 = vector.broadcast %cst_116 : f32 to vector<64x128xf32>
      %180 = arith.mulf %178, %179 : vector<64x128xf32>
      %181 = arith.truncf %180 : vector<64x128xf32> to vector<64x128xbf16>
      %182 = vector.extract_strided_slice %181 {offsets = [0, 0], sizes = [64, 32], strides = [1, 1]} : vector<64x128xbf16> to vector<64x32xbf16>
      %c0_117 = arith.constant 0 : index
      %c0_118 = arith.constant 0 : index
      %c0_119 = arith.constant 0 : index
      %183 = vector.load %arg12[%c0_117, %c0_118, %c0_119] : memref<4x64x32xbf16, #tpu.memory_space<vmem>>, vector<1x64x32xbf16>
      %184 = vector.shape_cast %183 : vector<1x64x32xbf16> to vector<64x32xbf16>
      %185 = vector.shape_cast %182 : vector<64x32xbf16> to vector<1x64x32xbf16>
      tpu.vector_store %arg12[%c0_117, %c0_118, %c0_119], %185 {strides = array<i32>} : memref<4x64x32xbf16, #tpu.memory_space<vmem>>, vector<1x64x32xbf16>,
      %186 = vector.extract_strided_slice %181 {offsets = [0, 32], sizes = [64, 32], strides = [1, 1]} : vector<64x128xbf16> to vector<64x32xbf16>
      %c1_120 = arith.constant 1 : index
      %c0_121 = arith.constant 0 : index
      %c0_122 = arith.constant 0 : index
      %187 = vector.load %arg12[%c1_120, %c0_121, %c0_122] : memref<4x64x32xbf16, #tpu.memory_space<vmem>>, vector<1x64x32xbf16>
      %188 = vector.shape_cast %187 : vector<1x64x32xbf16> to vector<64x32xbf16>
      %189 = vector.shape_cast %186 : vector<64x32xbf16> to vector<1x64x32xbf16>
      tpu.vector_store %arg12[%c1_120, %c0_121, %c0_122], %189 {strides = array<i32>} : memref<4x64x32xbf16, #tpu.memory_space<vmem>>, vector<1x64x32xbf16>,
      %190 = vector.extract_strided_slice %181 {offsets = [0, 64], sizes = [64, 32], strides = [1, 1]} : vector<64x128xbf16> to vector<64x32xbf16>
      %c2_123 = arith.constant 2 : index
      %c0_124 = arith.constant 0 : index
      %c0_125 = arith.constant 0 : index
      %191 = vector.load %arg12[%c2_123, %c0_124, %c0_125] : memref<4x64x32xbf16, #tpu.memory_space<vmem>>, vector<1x64x32xbf16>
      %192 = vector.shape_cast %191 : vector<1x64x32xbf16> to vector<64x32xbf16>
      %193 = vector.shape_cast %190 : vector<64x32xbf16> to vector<1x64x32xbf16>
      tpu.vector_store %arg12[%c2_123, %c0_124, %c0_125], %193 {strides = array<i32>} : memref<4x64x32xbf16, #tpu.memory_space<vmem>>, vector<1x64x32xbf16>,
      %194 = vector.extract_strided_slice %181 {offsets = [0, 96], sizes = [64, 32], strides = [1, 1]} : vector<64x128xbf16> to vector<64x32xbf16>
      %c3_126 = arith.constant 3 : index
      %c0_127 = arith.constant 0 : index
      %c0_128 = arith.constant 0 : index
      %195 = vector.load %arg12[%c3_126, %c0_127, %c0_128] : memref<4x64x32xbf16, #tpu.memory_space<vmem>>, vector<1x64x32xbf16>
      %196 = vector.shape_cast %195 : vector<1x64x32xbf16> to vector<64x32xbf16>
      %197 = vector.shape_cast %194 : vector<64x32xbf16> to vector<1x64x32xbf16>
      tpu.vector_store %arg12[%c3_126, %c0_127, %c0_128], %197 {strides = array<i32>} : memref<4x64x32xbf16, #tpu.memory_space<vmem>>, vector<1x64x32xbf16>,
      %cst_129 = arith.constant 0xFF800000 : f32
      %198 = vector.broadcast %cst_129 : f32 to vector<4x64x1xf32>
      %c0_130 = arith.constant 0 : index
      %c0_131 = arith.constant 0 : index
      %c0_132 = arith.constant 0 : index
      %199 = vector.load %arg13[%c0_130, %c0_131, %c0_132] : memref<4x64x1xf32, #tpu.memory_space<vmem>>, vector<4x64x1xf32>
      tpu.vector_store %arg13[%c0_130, %c0_131, %c0_132], %198 {strides = array<i32>} : memref<4x64x1xf32, #tpu.memory_space<vmem>>, vector<4x64x1xf32>,
      %cst_133 = arith.constant 0.000000e+00 : f32
      %200 = vector.broadcast %cst_133 : f32 to vector<4x64x1xf32>
      %c0_134 = arith.constant 0 : index
      %c0_135 = arith.constant 0 : index
      %c0_136 = arith.constant 0 : index
      %201 = vector.load %arg14[%c0_134, %c0_135, %c0_136] : memref<4x64x1xf32, #tpu.memory_space<vmem>>, vector<4x64x1xf32>
      tpu.vector_store %arg14[%c0_134, %c0_135, %c0_136], %200 {strides = array<i32>} : memref<4x64x1xf32, #tpu.memory_space<vmem>>, vector<4x64x1xf32>,
      %cst_137 = arith.constant 0.000000e+00 : f32
      %202 = vector.broadcast %cst_137 : f32 to vector<4x64x32xf32>
      %c0_138 = arith.constant 0 : index
      %c0_139 = arith.constant 0 : index
      %c0_140 = arith.constant 0 : index
      %203 = vector.load %arg15[%c0_138, %c0_139, %c0_140] : memref<4x64x32xf32, #tpu.memory_space<vmem>>, vector<4x64x32xf32>
      tpu.vector_store %arg15[%c0_138, %c0_139, %c0_140], %202 {strides = array<i32>} : memref<4x64x32xf32, #tpu.memory_space<vmem>>, vector<4x64x32xf32>,
    } else {
    }
    %c0_6 = arith.constant 0 : index
    %c0_7 = arith.constant 0 : index
    %c0_8 = arith.constant 0 : index
    %7 = vector.load %arg6[%c0_6, %c0_7, %c0_8] : memref<1x64x128xbf16, #tpu.memory_space<vmem>>, vector<1x64x128xbf16>
    %8 = vector.shape_cast %7 : vector<1x64x128xbf16> to vector<64x128xbf16>
    %9 = arith.extf %8 : vector<64x128xbf16> to vector<64x128xf32>
    %10 = vector.broadcast %1 : vector<1x128xf32> to vector<64x128xf32>
    %11 = arith.mulf %9, %10 : vector<64x128xf32>
    %12 = vector.broadcast %3 : vector<1x128xf32> to vector<64x128xf32>
    %13 = arith.addf %11, %12 : vector<64x128xf32>
    %14 = arith.truncf %13 : vector<64x128xf32> to vector<64x128xbf16>
    %c0_9 = arith.constant 0 : index
    %c0_10 = arith.constant 0 : index
    %15 = vector.load %arg8[%c0_9, %c0_10] : memref<128x256xbf16, #tpu.memory_space<vmem>>, vector<128x256xbf16>
    %cst = arith.constant dense<0.000000e+00> : vector<64x256xf32>
    %16 = tpu.matmul %14, %15, %cst {dimension_numbers = #tpu.dot_dimension_numbers<[1], [0], [0], [1], [0, 0, 1, 1], [], []>} : vector<64x128xbf16>, vector<128x256xbf16>, vector<64x256xf32> -> vector<64x256xf32>
    %17 = arith.truncf %16 : vector<64x256xf32> to vector<64x256xbf16>
    %18 = vector.extract_strided_slice %17 {offsets = [0, 0], sizes = [64, 32], strides = [1, 1]} : vector<64x256xbf16> to vector<64x32xbf16>
    %19 = vector.extract_strided_slice %17 {offsets = [0, 128], sizes = [64, 32], strides = [1, 1]} : vector<64x256xbf16> to vector<64x32xbf16>
    %c0_11 = arith.constant 0 : index
    %c0_12 = arith.constant 0 : index
    %c0_13 = arith.constant 0 : index
    %20 = vector.load %arg12[%c0_11, %c0_12, %c0_13] : memref<4x64x32xbf16, #tpu.memory_space<vmem>>, vector<1x64x32xbf16>
    %21 = vector.shape_cast %20 : vector<1x64x32xbf16> to vector<64x32xbf16>
    %cst_14 = arith.constant dense<0.000000e+00> : vector<64x64xf32>
    %22 = tpu.matmul %21, %18, %cst_14 {dimension_numbers = #tpu.dot_dimension_numbers<[1], [1], [0], [0], [0, 0, 1, 0], [], []>} : vector<64x32xbf16>, vector<64x32xbf16>, vector<64x64xf32> -> vector<64x64xf32>
    %c0_15 = arith.constant 0 : index
    %c0_16 = arith.constant 0 : index
    %c0_17 = arith.constant 0 : index
    %23 = vector.load %arg13[%c0_15, %c0_16, %c0_17] : memref<4x64x1xf32, #tpu.memory_space<vmem>>, vector<1x64x1xf32>
    %24 = vector.shape_cast %23 : vector<1x64x1xf32> to vector<64x1xf32>
    %cst_18 = arith.constant dense<0xFF800000> : vector<64xf32>
    %25 = vector.multi_reduction <maximumf>, %22, %cst_18 [1] : vector<64x64xf32> to vector<64xf32>
    %26 = vector.shape_cast %25 : vector<64xf32> to vector<64x1xf32>
    %27 = arith.maximumf %24, %26 : vector<64x1xf32>
    %28 = arith.subf %24, %27 : vector<64x1xf32>
    %29 = math.exp %28 : vector<64x1xf32>
    %30 = vector.broadcast %27 : vector<64x1xf32> to vector<64x64xf32>
    %31 = arith.subf %22, %30 : vector<64x64xf32>
    %32 = math.exp %31 : vector<64x64xf32>
    %c0_19 = arith.constant 0 : index
    %c0_20 = arith.constant 0 : index
    %c0_21 = arith.constant 0 : index
    %33 = vector.load %arg14[%c0_19, %c0_20, %c0_21] : memref<4x64x1xf32, #tpu.memory_space<vmem>>, vector<1x64x1xf32>
    %34 = vector.shape_cast %33 : vector<1x64x1xf32> to vector<64x1xf32>
    %35 = arith.mulf %29, %34 : vector<64x1xf32>
    %cst_22 = arith.constant dense<0.000000e+00> : vector<64xf32>
    %36 = vector.multi_reduction <add>, %32, %cst_22 [1] : vector<64x64xf32> to vector<64xf32>
    %37 = vector.shape_cast %36 : vector<64xf32> to vector<64x1xf32>
    %38 = arith.addf %35, %37 : vector<64x1xf32>
    %c0_23 = arith.constant 0 : index
    %c0_24 = arith.constant 0 : index
    %c0_25 = arith.constant 0 : index
    %39 = vector.load %arg14[%c0_23, %c0_24, %c0_25] : memref<4x64x1xf32, #tpu.memory_space<vmem>>, vector<1x64x1xf32>
    %40 = vector.shape_cast %39 : vector<1x64x1xf32> to vector<64x1xf32>
    %41 = vector.shape_cast %38 : vector<64x1xf32> to vector<1x64x1xf32>
    tpu.vector_store %arg14[%c0_23, %c0_24, %c0_25], %41 {strides = array<i32>} : memref<4x64x1xf32, #tpu.memory_space<vmem>>, vector<1x64x1xf32>,
    %c0_26 = arith.constant 0 : index
    %c0_27 = arith.constant 0 : index
    %c0_28 = arith.constant 0 : index
    %42 = vector.load %arg15[%c0_26, %c0_27, %c0_28] : memref<4x64x32xf32, #tpu.memory_space<vmem>>, vector<1x64x32xf32>
    %43 = vector.shape_cast %42 : vector<1x64x32xf32> to vector<64x32xf32>
    %44 = vector.broadcast %29 : vector<64x1xf32> to vector<64x32xf32>
    %45 = arith.mulf %44, %43 : vector<64x32xf32>
    %46 = arith.truncf %32 : vector<64x64xf32> to vector<64x64xbf16>
    %cst_29 = arith.constant dense<0.000000e+00> : vector<64x32xf32>
    %47 = tpu.matmul %46, %19, %cst_29 {dimension_numbers = #tpu.dot_dimension_numbers<[1], [0], [0], [1], [0, 0, 1, 1], [], []>} : vector<64x64xbf16>, vector<64x32xbf16>, vector<64x32xf32> -> vector<64x32xf32>
    %48 = arith.addf %45, %47 : vector<64x32xf32>
    %c0_30 = arith.constant 0 : index
    %c0_31 = arith.constant 0 : index
    %c0_32 = arith.constant 0 : index
    %49 = vector.load %arg15[%c0_30, %c0_31, %c0_32] : memref<4x64x32xf32, #tpu.memory_space<vmem>>, vector<1x64x32xf32>
    %50 = vector.shape_cast %49 : vector<1x64x32xf32> to vector<64x32xf32>
    %51 = vector.shape_cast %48 : vector<64x32xf32> to vector<1x64x32xf32>
    tpu.vector_store %arg15[%c0_30, %c0_31, %c0_32], %51 {strides = array<i32>} : memref<4x64x32xf32, #tpu.memory_space<vmem>>, vector<1x64x32xf32>,
    %c0_33 = arith.constant 0 : index
    %c0_34 = arith.constant 0 : index
    %c0_35 = arith.constant 0 : index
    %52 = vector.load %arg13[%c0_33, %c0_34, %c0_35] : memref<4x64x1xf32, #tpu.memory_space<vmem>>, vector<1x64x1xf32>
    %53 = vector.shape_cast %52 : vector<1x64x1xf32> to vector<64x1xf32>
    %54 = vector.shape_cast %27 : vector<64x1xf32> to vector<1x64x1xf32>
    tpu.vector_store %arg13[%c0_33, %c0_34, %c0_35], %54 {strides = array<i32>} : memref<4x64x1xf32, #tpu.memory_space<vmem>>, vector<1x64x1xf32>,
    %55 = vector.extract_strided_slice %17 {offsets = [0, 32], sizes = [64, 32], strides = [1, 1]} : vector<64x256xbf16> to vector<64x32xbf16>
    %56 = vector.extract_strided_slice %17 {offsets = [0, 160], sizes = [64, 32], strides = [1, 1]} : vector<64x256xbf16> to vector<64x32xbf16>
    %c1 = arith.constant 1 : index
    %c0_36 = arith.constant 0 : index
    %c0_37 = arith.constant 0 : index
    %57 = vector.load %arg12[%c1, %c0_36, %c0_37] : memref<4x64x32xbf16, #tpu.memory_space<vmem>>, vector<1x64x32xbf16>
    %58 = vector.shape_cast %57 : vector<1x64x32xbf16> to vector<64x32xbf16>
    %cst_38 = arith.constant dense<0.000000e+00> : vector<64x64xf32>
    %59 = tpu.matmul %58, %55, %cst_38 {dimension_numbers = #tpu.dot_dimension_numbers<[1], [1], [0], [0], [0, 0, 1, 0], [], []>} : vector<64x32xbf16>, vector<64x32xbf16>, vector<64x64xf32> -> vector<64x64xf32>
    %c1_39 = arith.constant 1 : index
    %c0_40 = arith.constant 0 : index
    %c0_41 = arith.constant 0 : index
    %60 = vector.load %arg13[%c1_39, %c0_40, %c0_41] : memref<4x64x1xf32, #tpu.memory_space<vmem>>, vector<1x64x1xf32>
    %61 = vector.shape_cast %60 : vector<1x64x1xf32> to vector<64x1xf32>
    %cst_42 = arith.constant dense<0xFF800000> : vector<64xf32>
    %62 = vector.multi_reduction <maximumf>, %59, %cst_42 [1] : vector<64x64xf32> to vector<64xf32>
    %63 = vector.shape_cast %62 : vector<64xf32> to vector<64x1xf32>
    %64 = arith.maximumf %61, %63 : vector<64x1xf32>
    %65 = arith.subf %61, %64 : vector<64x1xf32>
    %66 = math.exp %65 : vector<64x1xf32>
    %67 = vector.broadcast %64 : vector<64x1xf32> to vector<64x64xf32>
    %68 = arith.subf %59, %67 : vector<64x64xf32>
    %69 = math.exp %68 : vector<64x64xf32>
    %c1_43 = arith.constant 1 : index
    %c0_44 = arith.constant 0 : index
    %c0_45 = arith.constant 0 : index
    %70 = vector.load %arg14[%c1_43, %c0_44, %c0_45] : memref<4x64x1xf32, #tpu.memory_space<vmem>>, vector<1x64x1xf32>
    %71 = vector.shape_cast %70 : vector<1x64x1xf32> to vector<64x1xf32>
    %72 = arith.mulf %66, %71 : vector<64x1xf32>
    %cst_46 = arith.constant dense<0.000000e+00> : vector<64xf32>
    %73 = vector.multi_reduction <add>, %69, %cst_46 [1] : vector<64x64xf32> to vector<64xf32>
    %74 = vector.shape_cast %73 : vector<64xf32> to vector<64x1xf32>
    %75 = arith.addf %72, %74 : vector<64x1xf32>
    %c1_47 = arith.constant 1 : index
    %c0_48 = arith.constant 0 : index
    %c0_49 = arith.constant 0 : index
    %76 = vector.load %arg14[%c1_47, %c0_48, %c0_49] : memref<4x64x1xf32, #tpu.memory_space<vmem>>, vector<1x64x1xf32>
    %77 = vector.shape_cast %76 : vector<1x64x1xf32> to vector<64x1xf32>
    %78 = vector.shape_cast %75 : vector<64x1xf32> to vector<1x64x1xf32>
    tpu.vector_store %arg14[%c1_47, %c0_48, %c0_49], %78 {strides = array<i32>} : memref<4x64x1xf32, #tpu.memory_space<vmem>>, vector<1x64x1xf32>,
    %c1_50 = arith.constant 1 : index
    %c0_51 = arith.constant 0 : index
    %c0_52 = arith.constant 0 : index
    %79 = vector.load %arg15[%c1_50, %c0_51, %c0_52] : memref<4x64x32xf32, #tpu.memory_space<vmem>>, vector<1x64x32xf32>
    %80 = vector.shape_cast %79 : vector<1x64x32xf32> to vector<64x32xf32>
    %81 = vector.broadcast %66 : vector<64x1xf32> to vector<64x32xf32>
    %82 = arith.mulf %81, %80 : vector<64x32xf32>
    %83 = arith.truncf %69 : vector<64x64xf32> to vector<64x64xbf16>
    %cst_53 = arith.constant dense<0.000000e+00> : vector<64x32xf32>
    %84 = tpu.matmul %83, %56, %cst_53 {dimension_numbers = #tpu.dot_dimension_numbers<[1], [0], [0], [1], [0, 0, 1, 1], [], []>} : vector<64x64xbf16>, vector<64x32xbf16>, vector<64x32xf32> -> vector<64x32xf32>
    %85 = arith.addf %82, %84 : vector<64x32xf32>
    %c1_54 = arith.constant 1 : index
    %c0_55 = arith.constant 0 : index
    %c0_56 = arith.constant 0 : index
    %86 = vector.load %arg15[%c1_54, %c0_55, %c0_56] : memref<4x64x32xf32, #tpu.memory_space<vmem>>, vector<1x64x32xf32>
    %87 = vector.shape_cast %86 : vector<1x64x32xf32> to vector<64x32xf32>
    %88 = vector.shape_cast %85 : vector<64x32xf32> to vector<1x64x32xf32>
    tpu.vector_store %arg15[%c1_54, %c0_55, %c0_56], %88 {strides = array<i32>} : memref<4x64x32xf32, #tpu.memory_space<vmem>>, vector<1x64x32xf32>,
    %c1_57 = arith.constant 1 : index
    %c0_58 = arith.constant 0 : index
    %c0_59 = arith.constant 0 : index
    %89 = vector.load %arg13[%c1_57, %c0_58, %c0_59] : memref<4x64x1xf32, #tpu.memory_space<vmem>>, vector<1x64x1xf32>
    %90 = vector.shape_cast %89 : vector<1x64x1xf32> to vector<64x1xf32>
    %91 = vector.shape_cast %64 : vector<64x1xf32> to vector<1x64x1xf32>
    tpu.vector_store %arg13[%c1_57, %c0_58, %c0_59], %91 {strides = array<i32>} : memref<4x64x1xf32, #tpu.memory_space<vmem>>, vector<1x64x1xf32>,
    %92 = vector.extract_strided_slice %17 {offsets = [0, 64], sizes = [64, 32], strides = [1, 1]} : vector<64x256xbf16> to vector<64x32xbf16>
    %93 = vector.extract_strided_slice %17 {offsets = [0, 192], sizes = [64, 32], strides = [1, 1]} : vector<64x256xbf16> to vector<64x32xbf16>
    %c2 = arith.constant 2 : index
    %c0_60 = arith.constant 0 : index
    %c0_61 = arith.constant 0 : index
    %94 = vector.load %arg12[%c2, %c0_60, %c0_61] : memref<4x64x32xbf16, #tpu.memory_space<vmem>>, vector<1x64x32xbf16>
    %95 = vector.shape_cast %94 : vector<1x64x32xbf16> to vector<64x32xbf16>
    %cst_62 = arith.constant dense<0.000000e+00> : vector<64x64xf32>
    %96 = tpu.matmul %95, %92, %cst_62 {dimension_numbers = #tpu.dot_dimension_numbers<[1], [1], [0], [0], [0, 0, 1, 0], [], []>} : vector<64x32xbf16>, vector<64x32xbf16>, vector<64x64xf32> -> vector<64x64xf32>
    %c2_63 = arith.constant 2 : index
    %c0_64 = arith.constant 0 : index
    %c0_65 = arith.constant 0 : index
    %97 = vector.load %arg13[%c2_63, %c0_64, %c0_65] : memref<4x64x1xf32, #tpu.memory_space<vmem>>, vector<1x64x1xf32>
    %98 = vector.shape_cast %97 : vector<1x64x1xf32> to vector<64x1xf32>
    %cst_66 = arith.constant dense<0xFF800000> : vector<64xf32>
    %99 = vector.multi_reduction <maximumf>, %96, %cst_66 [1] : vector<64x64xf32> to vector<64xf32>
    %100 = vector.shape_cast %99 : vector<64xf32> to vector<64x1xf32>
    %101 = arith.maximumf %98, %100 : vector<64x1xf32>
    %102 = arith.subf %98, %101 : vector<64x1xf32>
    %103 = math.exp %102 : vector<64x1xf32>
    %104 = vector.broadcast %101 : vector<64x1xf32> to vector<64x64xf32>
    %105 = arith.subf %96, %104 : vector<64x64xf32>
    %106 = math.exp %105 : vector<64x64xf32>
    %c2_67 = arith.constant 2 : index
    %c0_68 = arith.constant 0 : index
    %c0_69 = arith.constant 0 : index
    %107 = vector.load %arg14[%c2_67, %c0_68, %c0_69] : memref<4x64x1xf32, #tpu.memory_space<vmem>>, vector<1x64x1xf32>
    %108 = vector.shape_cast %107 : vector<1x64x1xf32> to vector<64x1xf32>
    %109 = arith.mulf %103, %108 : vector<64x1xf32>
    %cst_70 = arith.constant dense<0.000000e+00> : vector<64xf32>
    %110 = vector.multi_reduction <add>, %106, %cst_70 [1] : vector<64x64xf32> to vector<64xf32>
    %111 = vector.shape_cast %110 : vector<64xf32> to vector<64x1xf32>
    %112 = arith.addf %109, %111 : vector<64x1xf32>
    %c2_71 = arith.constant 2 : index
    %c0_72 = arith.constant 0 : index
    %c0_73 = arith.constant 0 : index
    %113 = vector.load %arg14[%c2_71, %c0_72, %c0_73] : memref<4x64x1xf32, #tpu.memory_space<vmem>>, vector<1x64x1xf32>
    %114 = vector.shape_cast %113 : vector<1x64x1xf32> to vector<64x1xf32>
    %115 = vector.shape_cast %112 : vector<64x1xf32> to vector<1x64x1xf32>
    tpu.vector_store %arg14[%c2_71, %c0_72, %c0_73], %115 {strides = array<i32>} : memref<4x64x1xf32, #tpu.memory_space<vmem>>, vector<1x64x1xf32>,
    %c2_74 = arith.constant 2 : index
    %c0_75 = arith.constant 0 : index
    %c0_76 = arith.constant 0 : index
    %116 = vector.load %arg15[%c2_74, %c0_75, %c0_76] : memref<4x64x32xf32, #tpu.memory_space<vmem>>, vector<1x64x32xf32>
    %117 = vector.shape_cast %116 : vector<1x64x32xf32> to vector<64x32xf32>
    %118 = vector.broadcast %103 : vector<64x1xf32> to vector<64x32xf32>
    %119 = arith.mulf %118, %117 : vector<64x32xf32>
    %120 = arith.truncf %106 : vector<64x64xf32> to vector<64x64xbf16>
    %cst_77 = arith.constant dense<0.000000e+00> : vector<64x32xf32>
    %121 = tpu.matmul %120, %93, %cst_77 {dimension_numbers = #tpu.dot_dimension_numbers<[1], [0], [0], [1], [0, 0, 1, 1], [], []>} : vector<64x64xbf16>, vector<64x32xbf16>, vector<64x32xf32> -> vector<64x32xf32>
    %122 = arith.addf %119, %121 : vector<64x32xf32>
    %c2_78 = arith.constant 2 : index
    %c0_79 = arith.constant 0 : index
    %c0_80 = arith.constant 0 : index
    %123 = vector.load %arg15[%c2_78, %c0_79, %c0_80] : memref<4x64x32xf32, #tpu.memory_space<vmem>>, vector<1x64x32xf32>
    %124 = vector.shape_cast %123 : vector<1x64x32xf32> to vector<64x32xf32>
    %125 = vector.shape_cast %122 : vector<64x32xf32> to vector<1x64x32xf32>
    tpu.vector_store %arg15[%c2_78, %c0_79, %c0_80], %125 {strides = array<i32>} : memref<4x64x32xf32, #tpu.memory_space<vmem>>, vector<1x64x32xf32>,
    %c2_81 = arith.constant 2 : index
    %c0_82 = arith.constant 0 : index
    %c0_83 = arith.constant 0 : index
    %126 = vector.load %arg13[%c2_81, %c0_82, %c0_83] : memref<4x64x1xf32, #tpu.memory_space<vmem>>, vector<1x64x1xf32>
    %127 = vector.shape_cast %126 : vector<1x64x1xf32> to vector<64x1xf32>
    %128 = vector.shape_cast %101 : vector<64x1xf32> to vector<1x64x1xf32>
    tpu.vector_store %arg13[%c2_81, %c0_82, %c0_83], %128 {strides = array<i32>} : memref<4x64x1xf32, #tpu.memory_space<vmem>>, vector<1x64x1xf32>,
    %129 = vector.extract_strided_slice %17 {offsets = [0, 96], sizes = [64, 32], strides = [1, 1]} : vector<64x256xbf16> to vector<64x32xbf16>
    %130 = vector.extract_strided_slice %17 {offsets = [0, 224], sizes = [64, 32], strides = [1, 1]} : vector<64x256xbf16> to vector<64x32xbf16>
    %c3 = arith.constant 3 : index
    %c0_84 = arith.constant 0 : index
    %c0_85 = arith.constant 0 : index
    %131 = vector.load %arg12[%c3, %c0_84, %c0_85] : memref<4x64x32xbf16, #tpu.memory_space<vmem>>, vector<1x64x32xbf16>
    %132 = vector.shape_cast %131 : vector<1x64x32xbf16> to vector<64x32xbf16>
    %cst_86 = arith.constant dense<0.000000e+00> : vector<64x64xf32>
    %133 = tpu.matmul %132, %129, %cst_86 {dimension_numbers = #tpu.dot_dimension_numbers<[1], [1], [0], [0], [0, 0, 1, 0], [], []>} : vector<64x32xbf16>, vector<64x32xbf16>, vector<64x64xf32> -> vector<64x64xf32>
    %c3_87 = arith.constant 3 : index
    %c0_88 = arith.constant 0 : index
    %c0_89 = arith.constant 0 : index
    %134 = vector.load %arg13[%c3_87, %c0_88, %c0_89] : memref<4x64x1xf32, #tpu.memory_space<vmem>>, vector<1x64x1xf32>
    %135 = vector.shape_cast %134 : vector<1x64x1xf32> to vector<64x1xf32>
    %cst_90 = arith.constant dense<0xFF800000> : vector<64xf32>
    %136 = vector.multi_reduction <maximumf>, %133, %cst_90 [1] : vector<64x64xf32> to vector<64xf32>
    %137 = vector.shape_cast %136 : vector<64xf32> to vector<64x1xf32>
    %138 = arith.maximumf %135, %137 : vector<64x1xf32>
    %139 = arith.subf %135, %138 : vector<64x1xf32>
    %140 = math.exp %139 : vector<64x1xf32>
    %141 = vector.broadcast %138 : vector<64x1xf32> to vector<64x64xf32>
    %142 = arith.subf %133, %141 : vector<64x64xf32>
    %143 = math.exp %142 : vector<64x64xf32>
    %c3_91 = arith.constant 3 : index
    %c0_92 = arith.constant 0 : index
    %c0_93 = arith.constant 0 : index
    %144 = vector.load %arg14[%c3_91, %c0_92, %c0_93] : memref<4x64x1xf32, #tpu.memory_space<vmem>>, vector<1x64x1xf32>
    %145 = vector.shape_cast %144 : vector<1x64x1xf32> to vector<64x1xf32>
    %146 = arith.mulf %140, %145 : vector<64x1xf32>
    %cst_94 = arith.constant dense<0.000000e+00> : vector<64xf32>
    %147 = vector.multi_reduction <add>, %143, %cst_94 [1] : vector<64x64xf32> to vector<64xf32>
    %148 = vector.shape_cast %147 : vector<64xf32> to vector<64x1xf32>
    %149 = arith.addf %146, %148 : vector<64x1xf32>
    %c3_95 = arith.constant 3 : index
    %c0_96 = arith.constant 0 : index
    %c0_97 = arith.constant 0 : index
    %150 = vector.load %arg14[%c3_95, %c0_96, %c0_97] : memref<4x64x1xf32, #tpu.memory_space<vmem>>, vector<1x64x1xf32>
    %151 = vector.shape_cast %150 : vector<1x64x1xf32> to vector<64x1xf32>
    %152 = vector.shape_cast %149 : vector<64x1xf32> to vector<1x64x1xf32>
    tpu.vector_store %arg14[%c3_95, %c0_96, %c0_97], %152 {strides = array<i32>} : memref<4x64x1xf32, #tpu.memory_space<vmem>>, vector<1x64x1xf32>,
    %c3_98 = arith.constant 3 : index
    %c0_99 = arith.constant 0 : index
    %c0_100 = arith.constant 0 : index
    %153 = vector.load %arg15[%c3_98, %c0_99, %c0_100] : memref<4x64x32xf32, #tpu.memory_space<vmem>>, vector<1x64x32xf32>
    %154 = vector.shape_cast %153 : vector<1x64x32xf32> to vector<64x32xf32>
    %155 = vector.broadcast %140 : vector<64x1xf32> to vector<64x32xf32>
    %156 = arith.mulf %155, %154 : vector<64x32xf32>
    %157 = arith.truncf %143 : vector<64x64xf32> to vector<64x64xbf16>
    %cst_101 = arith.constant dense<0.000000e+00> : vector<64x32xf32>
    %158 = tpu.matmul %157, %130, %cst_101 {dimension_numbers = #tpu.dot_dimension_numbers<[1], [0], [0], [1], [0, 0, 1, 1], [], []>} : vector<64x64xbf16>, vector<64x32xbf16>, vector<64x32xf32> -> vector<64x32xf32>
    %159 = arith.addf %156, %158 : vector<64x32xf32>
    %c3_102 = arith.constant 3 : index
    %c0_103 = arith.constant 0 : index
    %c0_104 = arith.constant 0 : index
    %160 = vector.load %arg15[%c3_102, %c0_103, %c0_104] : memref<4x64x32xf32, #tpu.memory_space<vmem>>, vector<1x64x32xf32>
    %161 = vector.shape_cast %160 : vector<1x64x32xf32> to vector<64x32xf32>
    %162 = vector.shape_cast %159 : vector<64x32xf32> to vector<1x64x32xf32>
    tpu.vector_store %arg15[%c3_102, %c0_103, %c0_104], %162 {strides = array<i32>} : memref<4x64x32xf32, #tpu.memory_space<vmem>>, vector<1x64x32xf32>,
    %c3_105 = arith.constant 3 : index
    %c0_106 = arith.constant 0 : index
    %c0_107 = arith.constant 0 : index
    %163 = vector.load %arg13[%c3_105, %c0_106, %c0_107] : memref<4x64x1xf32, #tpu.memory_space<vmem>>, vector<1x64x1xf32>
    %164 = vector.shape_cast %163 : vector<1x64x1xf32> to vector<64x1xf32>
    %165 = vector.shape_cast %138 : vector<64x1xf32> to vector<1x64x1xf32>
    tpu.vector_store %arg13[%c3_105, %c0_106, %c0_107], %165 {strides = array<i32>} : memref<4x64x1xf32, #tpu.memory_space<vmem>>, vector<1x64x1xf32>,
    %c0_i32_108 = arith.constant 0 : i32
    %166 = arith.cmpi eq, %arg2, %c0_i32_108 : i32
    %167 = arith.extui %166 : i1 to i32
    %c0_i32_109 = arith.constant 0 : i32
    %168 = arith.cmpi ne, %167, %c0_i32_109 : i32
    scf.if %168 {
      %c0_110 = arith.constant 0 : index
      %c0_111 = arith.constant 0 : index
      %c0_112 = arith.constant 0 : index
      %169 = vector.load %arg15[%c0_110, %c0_111, %c0_112] : memref<4x64x32xf32, #tpu.memory_space<vmem>>, vector<1x64x32xf32>
      %170 = vector.shape_cast %169 : vector<1x64x32xf32> to vector<64x32xf32>
      %c0_113 = arith.constant 0 : index
      %c0_114 = arith.constant 0 : index
      %c0_115 = arith.constant 0 : index
      %171 = vector.load %arg14[%c0_113, %c0_114, %c0_115] : memref<4x64x1xf32, #tpu.memory_space<vmem>>, vector<1x64x1xf32>
      %172 = vector.shape_cast %171 : vector<1x64x1xf32> to vector<64x1xf32>
      %173 = vector.broadcast %172 : vector<64x1xf32> to vector<64x32xf32>
      %174 = arith.divf %170, %173 : vector<64x32xf32>
      %175 = arith.truncf %174 : vector<64x32xf32> to vector<64x32xbf16>
      %c1_116 = arith.constant 1 : index
      %c0_117 = arith.constant 0 : index
      %c0_118 = arith.constant 0 : index
      %176 = vector.load %arg15[%c1_116, %c0_117, %c0_118] : memref<4x64x32xf32, #tpu.memory_space<vmem>>, vector<1x64x32xf32>
      %177 = vector.shape_cast %176 : vector<1x64x32xf32> to vector<64x32xf32>
      %c1_119 = arith.constant 1 : index
      %c0_120 = arith.constant 0 : index
      %c0_121 = arith.constant 0 : index
      %178 = vector.load %arg14[%c1_119, %c0_120, %c0_121] : memref<4x64x1xf32, #tpu.memory_space<vmem>>, vector<1x64x1xf32>
      %179 = vector.shape_cast %178 : vector<1x64x1xf32> to vector<64x1xf32>
      %180 = vector.broadcast %179 : vector<64x1xf32> to vector<64x32xf32>
      %181 = arith.divf %177, %180 : vector<64x32xf32>
      %182 = arith.truncf %181 : vector<64x32xf32> to vector<64x32xbf16>
      %c2_122 = arith.constant 2 : index
      %c0_123 = arith.constant 0 : index
      %c0_124 = arith.constant 0 : index
      %183 = vector.load %arg15[%c2_122, %c0_123, %c0_124] : memref<4x64x32xf32, #tpu.memory_space<vmem>>, vector<1x64x32xf32>
      %184 = vector.shape_cast %183 : vector<1x64x32xf32> to vector<64x32xf32>
      %c2_125 = arith.constant 2 : index
      %c0_126 = arith.constant 0 : index
      %c0_127 = arith.constant 0 : index
      %185 = vector.load %arg14[%c2_125, %c0_126, %c0_127] : memref<4x64x1xf32, #tpu.memory_space<vmem>>, vector<1x64x1xf32>
      %186 = vector.shape_cast %185 : vector<1x64x1xf32> to vector<64x1xf32>
      %187 = vector.broadcast %186 : vector<64x1xf32> to vector<64x32xf32>
      %188 = arith.divf %184, %187 : vector<64x32xf32>
      %189 = arith.truncf %188 : vector<64x32xf32> to vector<64x32xbf16>
      %c3_128 = arith.constant 3 : index
      %c0_129 = arith.constant 0 : index
      %c0_130 = arith.constant 0 : index
      %190 = vector.load %arg15[%c3_128, %c0_129, %c0_130] : memref<4x64x32xf32, #tpu.memory_space<vmem>>, vector<1x64x32xf32>
      %191 = vector.shape_cast %190 : vector<1x64x32xf32> to vector<64x32xf32>
      %c3_131 = arith.constant 3 : index
      %c0_132 = arith.constant 0 : index
      %c0_133 = arith.constant 0 : index
      %192 = vector.load %arg14[%c3_131, %c0_132, %c0_133] : memref<4x64x1xf32, #tpu.memory_space<vmem>>, vector<1x64x1xf32>
      %193 = vector.shape_cast %192 : vector<1x64x1xf32> to vector<64x1xf32>
      %194 = vector.broadcast %193 : vector<64x1xf32> to vector<64x32xf32>
      %195 = arith.divf %191, %194 : vector<64x32xf32>
      %196 = arith.truncf %195 : vector<64x32xf32> to vector<64x32xbf16>
      %197 = tpu.concatenate %175, %182, %189, %196 in 1 : vector<64x32xbf16>, vector<64x32xbf16>, vector<64x32xbf16>, vector<64x32xbf16> -> vector<64x128xbf16>
      %c0_134 = arith.constant 0 : index
      %c0_135 = arith.constant 0 : index
      %198 = vector.load %arg9[%c0_134, %c0_135] : memref<128x128xbf16, #tpu.memory_space<vmem>>, vector<128x128xbf16>
      %cst_136 = arith.constant dense<0.000000e+00> : vector<64x128xf32>
      %199 = tpu.matmul %197, %198, %cst_136 {dimension_numbers = #tpu.dot_dimension_numbers<[1], [0], [0], [1], [0, 0, 1, 1], [], []>} : vector<64x128xbf16>, vector<128x128xbf16>, vector<64x128xf32> -> vector<64x128xf32>
      %c0_137 = arith.constant 0 : index
      %c0_138 = arith.constant 0 : index
      %200 = vector.load %arg10[%c0_137, %c0_138] : memref<1x128xf32, #tpu.memory_space<vmem>>, vector<1x128xf32>
      %201 = vector.broadcast %200 : vector<1x128xf32> to vector<64x128xf32>
      %202 = arith.addf %199, %201 : vector<64x128xf32>
      %c0_139 = arith.constant 0 : index
      %c0_140 = arith.constant 0 : index
      %c0_141 = arith.constant 0 : index
      %203 = vector.load %arg11[%c0_139, %c0_140, %c0_141] : memref<1x64x128xf32, #tpu.memory_space<vmem>>, vector<1x64x128xf32>
      %204 = vector.shape_cast %203 : vector<1x64x128xf32> to vector<64x128xf32>
      %205 = vector.shape_cast %202 : vector<64x128xf32> to vector<1x64x128xf32>
      tpu.vector_store %arg11[%c0_139, %c0_140, %c0_141], %205 {strides = array<i32>} : memref<1x64x128xf32, #tpu.memory_space<vmem>>, vector<1x64x128xf32>,
    } else {
    }
    return
  }
  func.func @transform_0(%arg0: i32, %arg1: i32, %arg2: i32) -> (i32, i32, i32) {
    %c0_i32 = arith.constant 0 : i32
    %c0_i32_0 = arith.constant 0 : i32
    %c0_i32_1 = arith.constant 0 : i32
    return %arg0, %c0_i32, %c0_i32_0 : i32, i32, i32
  }
  func.func @transform_1(%arg0: i32, %arg1: i32, %arg2: i32) -> (i32, i32, i32) {
    %c0_i32 = arith.constant 0 : i32
    %c0_i32_0 = arith.constant 0 : i32
    %c0_i32_1 = arith.constant 0 : i32
    return %arg0, %c0_i32, %c0_i32_0 : i32, i32, i32
  }
  func.func @transform_2(%arg0: i32, %arg1: i32, %arg2: i32) -> (i32, i32, i32) {
    %c0_i32 = arith.constant 0 : i32
    %c0_i32_0 = arith.constant 0 : i32
    return %arg0, %arg1, %c0_i32 : i32, i32, i32
  }
  func.func @transform_3(%arg0: i32, %arg1: i32, %arg2: i32) -> (i32, i32, i32) {
    %c0_i32 = arith.constant 0 : i32
    %c0_i32_0 = arith.constant 0 : i32
    return %arg0, %arg2, %c0_i32 : i32, i32, i32
  }
  func.func @transform_4(%arg0: i32, %arg1: i32, %arg2: i32) -> (i32, i32) {
    %c0_i32 = arith.constant 0 : i32
    %c0_i32_0 = arith.constant 0 : i32
    %c0_i32_1 = arith.constant 0 : i32
    return %c0_i32, %c0_i32_0 : i32, i32
  }
  func.func @transform_5(%arg0: i32, %arg1: i32, %arg2: i32) -> (i32, i32) {
    %c0_i32 = arith.constant 0 : i32
    %c0_i32_0 = arith.constant 0 : i32
    %c0_i32_1 = arith.constant 0 : i32
    return %c0_i32, %c0_i32_0 : i32, i32
  }
  func.func @transform_6(%arg0: i32, %arg1: i32, %arg2: i32) -> (i32, i32) {
    %c0_i32 = arith.constant 0 : i32
    %c0_i32_0 = arith.constant 0 : i32
    %c0_i32_1 = arith.constant 0 : i32
    return %c0_i32, %c0_i32_0 : i32, i32
  }
  func.func @transform_7(%arg0: i32, %arg1: i32, %arg2: i32) -> (i32, i32) {
    %c0_i32 = arith.constant 0 : i32
    %c0_i32_0 = arith.constant 0 : i32
    %c0_i32_1 = arith.constant 0 : i32
    return %c0_i32, %c0_i32_0 : i32, i32
  }
  func.func @transform_8(%arg0: i32, %arg1: i32, %arg2: i32) -> (i32, i32, i32) {
    %c0_i32 = arith.constant 0 : i32
    %c0_i32_0 = arith.constant 0 : i32
    return %arg0, %arg1, %c0_i32 : i32, i32, i32
  }
}

</mosaic_0001>

<bundles_post_ra>
// kernel: attention_forward.1
= control target key start
LH: loop header
LB: loop body
LE: loop exit
PB: predicated region body
PF: predicated region fallthrough
CT: control target
= control target key end

     0   :  { %13 = vsyncpa [#allocation7], 0  ;;  %s6280_s0 = inlined_call_operand.vmem [shape: f32[2,1,128], index: 0, kind: input, shape index: {}]   ;;  %s6281_s1 = inlined_call_operand.vmem [shape: f32[2,1,128], index: 1, kind: input, shape index: {}]   ;;  %s6282_s2 = inlined_call_operand.vmem [shape: bf16[2,64,128], index: 2, kind: input, shape index: {}, may-alias: {2,3}]   ;;  %s6283_s3 = inlined_call_operand.vmem [shape: bf16[2,64,128], index: 3, kind: input, shape index: {}, may-alias: {2,3}]   ;;  %s6284_s4 = inlined_call_operand.vmem [shape: bf16[128,128], index: 4, kind: input, shape index: {}]   ;;  %s6285_s5 = inlined_call_operand.vmem [shape: bf16[128,256], index: 5, kind: input, shape index: {}]   ;;  %s6286_s6 = inlined_call_operand.vmem [shape: bf16[128,128], index: 6, kind: input, shape index: {}]   ;;  %s6287_s7 = inlined_call_operand.vmem [shape: f32[1,128], index: 7, kind: input, shape index: {}]   ;;  %s6288_s8 = inlined_call_operand.hbm [shape: f32[2,64,128], index: 8, kind: output, shape index: {}]  }
   0x1   :  { %15 = vsyncpa [#allocation7 + $0x1], 0  ;;  %s4526_s27 = smov 0   ;;  %s4528_s28 = smov 0  }
   0x2   :  { %s4530_s29 = smov 0   ;;  %s4532_s30 = smov 0  }
   0x3   :  { %s4534_s9 = smov 0   ;;  %s4536_s10 = smov 0  }
   0x4 LB: > { %s3646_s11 = sadd.s32 4294967295, %s4470_s10   ;;  %s3647_s12 = sadd.s32 4294967294, %s4470_s10   ;;  %s4470_s10 = sphi %s4536_s10, %s21_s10   ;;  %s4466_s9 = sphi %s4534_s9, %s6472_s9   ;;  %s4462_s30 = sphi %s4532_s30, %s6471_s30   ;;  %s4458_s29 = sphi %s4530_s29, %s6470_s29   ;;  %s4454_s28 = sphi %s4528_s28, %s6469_s28   ;;  %s4450_s27 = sphi %s4526_s27, %s6468_s27  }
   0x5   : > { %s40_s13 = sadd.s32 1, %s4466_s9  ;;  %s241_s14 = sadd.s32 1, %s4458_s29 }
   0x6   : > { %p42_p0 = scmp.ge.s32.totalorder %s40_s13, 2  ;;  %p251_p1 = scmp.ne.s32.totalorder %s4458_s29, %s4454_s28 }
   0x7   : > { %p252_p2 = scmp.eq.s32.totalorder %s3646_s11, 1  ;;  %p257_p3 = scmp.ne.s32.totalorder %s4454_s28, %s4450_s27 }
   0x8   : > { %s6474_s13 = smov (%p42_p0, %s40_s13), 0  ;;  %p258_p5 = scmp.eq.s32.totalorder %s3647_s12, 1 }
   0x9   : > { %6322 = sst [smem:[#allocation9_spill]] %s6474_s13  ;;  %p4566_p4 = por %p252_p2, %p251_p1 }
   0xa   : > { %s236_s16 = ssub.s32 %s4466_s9, %s6474_s13  ;;  %p3650_p6 = scmp.ge.s32.totalorder %s4470_s10, 1 }
   0xb   : > { %p239_p7 = scmp.eq.s32.totalorder %s236_s16, 0  ;;  %p4573_p8 = por %p258_p5, %p257_p3 }
   0xc   : > { %p326_p9 = scmp.lt.s32.totalorder %s4470_s10, 3 }
   0xd   : > { %s4579_s18 = scalar_select %p239_p7, %s4458_s29, %s241_s14  }
   0xe   : > { %p327_p10 = pnand %p3650_p6, %p326_p9 }
  0x10   : > { %330 = sbr.rel (%p327_p10) target bundleno = 2605 (0xa2d), region = 52 }
  0x15   : > { %v4146_v0 = vld [vmem:[%s6285_s5 + $0x74] ss:$8 sps:$4 sm:$0xff]   ;;  %v4148_v1 = vld [vmem:[%s6285_s5 + $0x70] ss:$8 sps:$4 sm:$0xff]   ;;  %v4472_v2 = vmov 0   ;;  %p379_p11 = scmp.lt.s32.totalorder %s4462_s30, 1 }
  0x16   : > { %1012 = vmatprep.mubr.bf16.mxu1 %v4472_v2  ;;  %4144 = vset.pattern.permute.xlu1 %v4472_v2  ;;  %v4149_v3 = vld [vmem:[%s6285_s5 + $0x64] ss:$8 sps:$4 sm:$0xff]   ;;  %v4151_v4 = vld [vmem:[%s6285_s5 + $0x60] ss:$8 sps:$4 sm:$0xff]   ;;  %v4152_v5 = vld [vmem:[%s6285_s5 + $0x54] ss:$8 sps:$4 sm:$0xff]  }
  0x17   : > { %980 = vmatprep.subr.bf16.mxu1 %v4146_v0  ;;  %4145 = vset.pattern.permute.xlu0 %v4472_v2  ;;  %v4155_v6 = vld [vmem:[%s6284_s4 + $0x38] sm:$0xff]   ;;  %s4604_s19 = scalar_select %p379_p11, %s4462_s30, 1  ;;  %v4159_v8 = vld [vmem:[%s6284_s4 + $0x30] sm:$0xff]   ;;  %v4156_v9 = vld [vmem:[%s6285_s5 + $0x44] ss:$8 sps:$4 sm:$0xff]   ;;  %vm630_vm0 = vcmask 257024  }
  0x18   : > { %981 = vmatpush1.bf16.msra.mxu1 %v4148_v1  ;;  %v4154_v7 = vld [vmem:[%s6285_s5 + $0x50] ss:$8 sps:$4 sm:$0xff]   ;;  %3889 = vmatprep.subr.bf16.mxu0 %v4155_v6  ;;  %v4163_v10 = vld [vmem:[%s6284_s4 + $0x28] sm:$0xff]   ;;  %v4160_v12 = vld [vmem:[%s6285_s5 + $0x34] ss:$8 sps:$4 sm:$0xff]   ;;  %vm803_vm1 = vcmask 261120  }
  0x19   : > { %982 = vmatprep.subr.bf16.mxu1 %v4149_v3  ;;  %3890 = vmatpush3.bf16.msra.mxu0 %v4155_v6  ;;  %v4158_v11 = vld [vmem:[%s6285_s5 + $0x40] ss:$8 sps:$4 sm:$0xff]   ;;  %s3750_s16 = sshll.u32 %s4604_s19, 5  ;;  %s381_s26 = scalar_lea.vmem %s6280_s0, %s4604_s19  ;;  %v4162_v14 = vld [vmem:[%s6285_s5 + $0x30] ss:$8 sps:$4 sm:$0xff]   ;;  %vm1187_vm2 = vcmask 523264  }
  0x1a   : > { %3891 = vmatprep.subr.bf16.mxu0 %v4159_v8  ;;  %v4167_v13 = vld [vmem:[%s6284_s4 + $0x20] sm:$0xff]   ;;  %s4635_s14 = scalar_lea.vmem %s6283_s3, %s3750_s16  ;;  %v4171_v16 = vld [vmem:[%s6284_s4 + $0x18] sm:$0xff]   ;;  %s4652_s12 = scalar_lea.vmem %s6282_s2, %s3750_s16  ;;  %v4175_v23 = vld [vmem:[%s6284_s4 + $0x10] sm:$0xff]   ;;  %vm738_vm3 = vcmask 7168   ;;  %vm3355_vm4 = vcmask 785408  }
  0x1b   : > { %v4164_v15 = vld [vmem:[%s6285_s5 + $0x24] ss:$8 sps:$4 sm:$0xff]   ;;  %v4646_v17 = vld [vmem:[%s381_s26] ss:$0 sm:$0xff]  ;;  %s384_s13 = scalar_lea.vmem %s6281_s1, %s4604_s19  ;;  %v4168_v22 = vld [vmem:[%s6285_s5 + $0x14] ss:$8 sps:$4 sm:$0xff]  }
  0x1c   : > { %983 = vmatpush1.bf16.msra.mxu1 %v4151_v4  ;;  %v3778_v18 = vld [vmem:[%s4635_s14] sm:$0xff]   ;;  %v3793_v26 = vld [vmem:[%s4652_s12 + $0x8] sm:$0xff]   ;;  %v4170_v27 = vld [vmem:[%s6285_s5 + $0x10] ss:$8 sps:$4 sm:$0xff]   ;;  %s4477_s25 = smov 32   ;;  %s3760_s24 = sshll.u32 %s4462_s30, 10 }
  0x1d   : > { %984 = vmatprep.subr.bf16.mxu1 %v4152_v5  ;;  %3892 = vmatpush3.bf16.msra.mxu0 %v4159_v8  ;;  %v3779_v19 = vunpack.c.l.bf16 %v3778_v18  ;;  %v3780_v20 = vunpack.c.h.bf16 %v3778_v18  ;;  %v4166_v21 = vld [vmem:[%s6285_s5 + $0x20] ss:$8 sps:$4 sm:$0xff]   ;;  %v3767_v33 = vunpack.c.l.bf16 %v3793_v26  ;;  %v4172_v34 = vld [vmem:[%s6285_s5 + $0x4] ss:$8 sps:$4 sm:$0xff]   ;;  %v3768_v36 = vunpack.c.h.bf16 %v3793_v26  ;;  %v3794_v37 = vld [vmem:[%s4652_s12 + $0x10] sm:$0xff]   ;;  %s6229_s11 = scalar_lea.hbm %s6288_s8, %s3760_s24  ;;  %s4478_s21 = smov [#allocation6]  }
  0x1e   : > { %3893 = vmatprep.subr.bf16.mxu0 %v4163_v10  ;;  %v3762_v25 = vld [vmem:[%s4652_s12] sm:$0xff]   ;;  %v3796_v30 = vld [vmem:[%s4635_s14 + $0x8] sm:$0xff]   ;;  %v3771_v50 = vunpack.c.l.bf16 %v3794_v37  ;;  %v3795_v51 = vld [vmem:[%s4652_s12 + $0x18] sm:$0xff]   ;;  %v3772_v54 = vunpack.c.h.bf16 %v3794_v37  ;;  %s4476_s12 = smov 64   ;;  %s4398_s22 = sshll.u32 %s4478_s21, 4  ;;  %s4399_s22 = int_to_ptr.vmem [resolvable:$false] %s4398_s22 }
  0x1f   : > { %v858_v24 = vmul.f32 %v4646_v17, %v3779_v19  ;;  %v4673_v28 = vld [vmem:[%s384_s13] ss:$0 sm:$0xff]  ;;  %v859_v29 = vmul.f32 %v4646_v17, %v3780_v20  ;;  %v3763_v31 = vunpack.c.l.bf16 %v3762_v25  ;;  %v3764_v32 = vunpack.c.h.bf16 %v3762_v25  ;;  %v4176_v35 = vld [vmem:[%s6284_s4 + $0x8] sm:$0xff]   ;;  %v3797_v60 = vld [vmem:[%s4635_s14 + $0x10] sm:$0xff]  }
  0x20   : > { %985 = vmatpush1.bf16.msra.mxu1 %v4154_v7  ;;  %v3783_v41 = vunpack.c.l.bf16 %v3796_v30  ;;  %v3784_v42 = vunpack.c.h.bf16 %v3796_v30  ;;  %v437_v46 = vmul.f32 %v4646_v17, %v3767_v33  ;;  %v438_v47 = vmul.f32 %v4646_v17, %v3768_v36  ;;  %v4174_v48 = vld [vmem:[%s6285_s5] ss:$8 sps:$4 sm:$0xff]  }
  0x21   : > { %986 = vmatprep.subr.bf16.mxu1 %v4156_v9  ;;  %3894 = vmatpush3.bf16.msra.mxu0 %v4163_v10  ;;  %v435_v38 = vmul.f32 %v4646_v17, %v3763_v31  ;;  %v436_v39 = vmul.f32 %v4646_v17, %v3764_v32  ;;  %v872_v40 = vadd.f32 %v4673_v28, %v858_v24  ;;  %v4177_v52 = vld [vmem:[%s6284_s4] sm:$0xff]   ;;  %v3775_v62 = vunpack.c.l.bf16 %v3795_v51 }
  0x22   : > { %3895 = vmatprep.subr.bf16.mxu0 %v4167_v13  ;;  %v873_v43 = vadd.f32 %v4673_v28, %v859_v29  ;;  %v860_v53 = vmul.f32 %v4646_v17, %v3783_v41  ;;  %v861_v56 = vmul.f32 %v4646_v17, %v3784_v42  ;;  %v451_v57 = vadd.f32 %v4673_v28, %v437_v46 }
  0x23   : > { %v449_v44 = vadd.f32 %v4673_v28, %v435_v38  ;;  %v450_v45 = vadd.f32 %v4673_v28, %v436_v39  ;;  %v439_v58 = vmul.f32 %v4646_v17, %v3771_v50  ;;  %v452_v59 = vadd.f32 %v4673_v28, %v438_v47 }
  0x24   : > { %987 = vmatpush1.bf16.msra.mxu1 %v4158_v11  ;;  %v880_v55 = vpack.c.bf16 %v873_v43, %v872_v40  ;;  %v440_v61 = vmul.f32 %v4646_v17, %v3772_v54  ;;  %v3776_v63 = vunpack.c.h.bf16 %v3795_v51  ;;  %v874_v3 = vadd.f32 %v4673_v28, %v860_v53 }
  0x25   : > { %988 = vmatprep.subr.bf16.mxu1 %v4160_v12  ;;  %3896 = vmatpush3.bf16.msra.mxu0 %v4167_v13  ;;  %v457_v49 = vpack.c.bf16 %v450_v45, %v449_v44  ;;  %v453_v0 = vadd.f32 %v4673_v28, %v439_v58  ;;  %v875_v4 = vadd.f32 %v4673_v28, %v861_v56  ;;  %v3787_v5 = vunpack.c.l.bf16 %v3797_v60 }
  0x26   : > { %3897 = vmatprep.subr.bf16.mxu0 %v4171_v16  ;;  %v454_v1 = vadd.f32 %v4673_v28, %v440_v61  ;;  %v458_v6 = vpack.c.bf16 %v452_v59, %v451_v57  ;;  %v3788_v7 = vunpack.c.h.bf16 %v3797_v60  ;;  %v441_v8 = vmul.f32 %v4646_v17, %v3775_v62 }
  0x27   : > { %3905 = vmatprep.mubr.bf16.mxu0 %v457_v49  ;;  %v442_v9 = vmul.f32 %v4646_v17, %v3776_v63  ;;  %v881_v11 = vpack.c.bf16 %v875_v4, %v874_v3  ;;  %v862_v12 = vmul.f32 %v4646_v17, %v3787_v5 }
  0x28   : > { %989 = vmatpush1.bf16.msra.mxu1 %v4162_v14  ;;  %v459_v10 = vpack.c.bf16 %v454_v1, %v453_v0  ;;  %v863_v13 = vmul.f32 %v4646_v17, %v3788_v7  ;;  %v3798_v14 = vld [vmem:[%s4635_s14 + $0x18] sm:$0xff]   ;;  %s4473_s14 = smov 96  }
  0x29   : > { %990 = vmatprep.subr.bf16.mxu1 %v4164_v15  ;;  %3898 = vmatpush3.bf16.msra.mxu0 %v4171_v16  ;;  %v455_v15 = vadd.f32 %v4673_v28, %v441_v8  ;;  %v456_v16 = vadd.f32 %v4673_v28, %v442_v9  ;;  %v3791_v18 = vunpack.c.l.bf16 %v3798_v14  ;;  %v876_v19 = vadd.f32 %v4673_v28, %v862_v12 }
  0x2a   : > { %3899 = vmatprep.subr.bf16.mxu0 %v4175_v23  ;;  %v877_v20 = vadd.f32 %v4673_v28, %v863_v13 }
  0x2b   : > { %v864_v24 = vmul.f32 %v4646_v17, %v3791_v18 }
  0x2c   : > { %991 = vmatpush1.bf16.msra.mxu1 %v4166_v21  ;;  %v3792_v21 = vunpack.c.h.bf16 %v3798_v14 }
  0x2d   : > { %992 = vmatprep.subr.bf16.mxu1 %v4168_v22  ;;  %3900 = vmatpush3.bf16.msra.mxu0 %v4175_v23  ;;  %v460_v22 = vpack.c.bf16 %v456_v16, %v455_v15  ;;  %v882_v23 = vpack.c.bf16 %v877_v20, %v876_v19  ;;  %v878_v26 = vadd.f32 %v4673_v28, %v864_v24 }
  0x2e   : > { %3901 = vmatprep.subr.bf16.mxu0 %v4176_v35  ;;  %v865_v25 = vmul.f32 %v4646_v17, %v3792_v21 }
  0x30   : > { %993 = vmatpush1.bf16.msra.mxu1 %v4170_v27  ;;  %v879_v27 = vadd.f32 %v4673_v28, %v865_v25 }
  0x31   : > { %994 = vmatprep.subr.bf16.mxu1 %v4172_v34  ;;  %3902 = vmatpush3.bf16.msra.mxu0 %v4176_v35 }
  0x32   : > { %3903 = vmatprep.subr.bf16.mxu0 %v4177_v52  ;;  %v883_v29 = vpack.c.bf16 %v879_v27, %v878_v26 }
  0x34   : > { %995 = vmatpush1.bf16.msra.mxu1 %v4174_v48 }
  0x35   : > { %3904 = vmatpush3.bf16.msra.mxu0 %v4177_v52 }
  0x37   : > { %1013 = vmatmul.mubr.bf16.vlgmr.msra.gmra.mxu1 %v880_v55 }
  0x38   : > { %1022 = vmatprep.mubr.bf16.mxu1 %v4472_v2  ;;  %3906 = vmatmul.mubr.bf16.vlgmr.msra.gmra.mxu0 %v458_v6 }
  0x39   : > { %3909 = vmatprep.mubr.bf16.mxu0 %v459_v10 }
  0x3f   : > { %1023 = vmatmul.mubr.bf16.gmra.mxu1 %v881_v11 }
  0x40   : > { %1032 = vmatprep.mubr.bf16.mxu1 %v4472_v2  ;;  %3910 = vmatmul.mubr.bf16.gmra.mxu0 %v460_v22 }
  0x47   : > { %1033 = vmatmul.mubr.bf16.gmra.mxu1 %v882_v23 }
  0x48   : > { %1042 = vmatprep.mubr.bf16.mxu1 %v4472_v2 }
  0x4f   : > { %1043 = vmatmul.mubr.bf16.gmra.mxu1 %v883_v29 }
  0xf7   : > { %v1014_v30 = vpop.f32.mrf.mxu1 }
  0xf8   : > { %v3907_v33 = vpop.f32.mrf.mxu0 }
  0xf9   : > { %v4726_v31 = vpop.f32.mrf.mxu1  ;;  %v592_v34 = vmul.f32 0.17677669, %v3907_v33 }
  0xfa   : > { %v559_v17 = vpop.f32.mrf.mxu0 }
  0xfb   : > { %v1018_v32 = vpop.f32.mrf.mxu1  ;;  %v4730_v36 = vpack.c.bf16 %v592_v34, %v592_v34  ;;  %v590_v37 = vmul.f32 0.17677669, %v559_v17 }
  0xfc   : > { %v3908_v39 = vpop.f32.mrf.mxu0  ;;  %v4771_v3 = vpack.c.bf16 %v1018_v32, %v1014_v30 }
  0xfd   : > { %v4728_v35 = vpop.f32.mrf.mxu1  ;;  %633 = vst.msk [vmem:[#allocation2 + $0x8] sm:$0xf] %vm630_vm0, %v4730_v36  ;;  %v4734_v2 = vpack.c.bf16 %v590_v37, %v590_v37  ;;  %v593_v28 = vmul.f32 0.17677669, %v3908_v39 }
  0xfe   : > { %v562_v41 = vpop.f32.mrf.mxu0  ;;  %v4810_v14 = vpack.c.bf16 %v4728_v35, %v4726_v31  ;;  %v1103_v16 = vsel %vm803_vm1, %v4771_v3, 0 }
  0xff   : > { %v1024_v38 = vpop.f32.mrf.mxu1  ;;  %631 = vst.msk [vmem:[#allocation2] sm:$0xf] %vm630_vm0, %v4734_v2  ;;  %v4738_v42 = vpack.c.bf16 %v593_v28, %v593_v28  ;;  %v591_v43 = vmul.f32 0.17677669, %v562_v41 }
 0x100   : > { %v3911_v45 = vpop.f32.mrf.mxu0 }
 0x101   : > { %v1026_v40 = vpop.f32.mrf.mxu1  ;;  %634 = vst.msk [vmem:[#allocation2 + $0xc] sm:$0xf] %vm630_vm0, %v4738_v42  ;;  %v4744_v47 = vpack.c.bf16 %v591_v43, %v591_v43  ;;  %v596_v48 = vmul.f32 0.17677669, %v3911_v45 }
 0x102   : > { %v575_v50 = vpop.f32.mrf.mxu0 }
 0x103   : > { %v1028_v44 = vpop.f32.mrf.mxu1  ;;  %632 = vst.msk [vmem:[#allocation2 + $0x4] sm:$0xf] %vm630_vm0, %v4744_v47  ;;  %v4750_v51 = vpack.c.bf16 %v596_v48, %v596_v48  ;;  %v594_v52 = vmul.f32 0.17677669, %v575_v50  ;;  %v4474_v48 = vmov -inf  }
 0x104   : > { %v4740_v46 = vpack.c.bf16 %v1028_v44, %v1024_v38  ;;  %v3912_v54 = vpop.f32.mrf.mxu0  ;;  %741 = vst.msk [vmem:[#allocation3 + $0x10] sm:$0xff] %vm738_vm3, %v4474_v48  ;;  %739 = vst.msk [vmem:[#allocation3] sm:$0xff] %vm738_vm3, %v4474_v48 }
 0x105   : > { %v1030_v49 = vpop.f32.mrf.mxu1  ;;  %637 = vst.msk [vmem:[#allocation2 + $0x18] sm:$0xf] %vm630_vm0, %v4750_v51  ;;  %v4754_v55 = vpack.c.bf16 %v594_v52, %v594_v52  ;;  %v597_v56 = vmul.f32 0.17677669, %v3912_v54 }
 0x106   : > { %1561 = vrot.lane.b32.xlu1 %v4740_v46, %s4473_s14  ;;  %v578_v58 = vpop.f32.mrf.mxu0  ;;  %v4800_v12 = vpack.c.bf16 %v1030_v49, %v1026_v40  ;;  %v1106_v15 = vsel %vm803_vm1, %v4740_v46, 0  ;;  %740 = vst.msk [vmem:[#allocation3 + $0x8] sm:$0xff] %vm738_vm3, %v4474_v48  ;;  %742 = vst.msk [vmem:[#allocation3 + $0x18] sm:$0xff] %vm738_vm3, %v4474_v48 }
 0x107   : > { %v1034_v53 = vpop.f32.mrf.mxu1  ;;  %635 = vst.msk [vmem:[#allocation2 + $0x10] sm:$0xf] %vm630_vm0, %v4754_v55  ;;  %v4760_v59 = vpack.c.bf16 %v597_v56, %v597_v56  ;;  %v595_v60 = vmul.f32 0.17677669, %v578_v58 }
 0x108   : > { %v4179_v19 = vld [vmem:[#allocation2 + $0x8] sm:$0xff]   ;;  %743 = vst.msk [vmem:[#allocation3 + $0x20] sm:$0xff] %vm738_vm3, %v4474_v48  ;;  %744 = vst.msk [vmem:[#allocation3 + $0x28] sm:$0xff] %vm738_vm3, %v4474_v48 }
 0x109   : > { %v1036_v57 = vpop.f32.mrf.mxu1  ;;  %638 = vst.msk [vmem:[#allocation2 + $0x1c] sm:$0xf] %vm630_vm0, %v4760_v59  ;;  %v4764_v62 = vpack.c.bf16 %v595_v60, %v595_v60 }
 0x10a   : > { %639 = vrot.lane.b32.xlu1 %v4734_v2, %s4473_s14  ;;  %v4178_v0 = vld [vmem:[#allocation2] sm:$0xff]   ;;  %745 = vst.msk [vmem:[#allocation3 + $0x30] sm:$0xff] %vm738_vm3, %v4474_v48  ;;  %746 = vst.msk [vmem:[#allocation3 + $0x38] sm:$0xff] %vm738_vm3, %v4474_v48 }
 0x10b   : > { %v1038_v61 = vpop.f32.mrf.mxu1  ;;  %636 = vst.msk [vmem:[#allocation2 + $0x14] sm:$0xf] %vm630_vm0, %v4764_v62  ;;  %3921 = vmatprep.mubr.msk.bf16.mxu0 %vm803_vm1, %v4178_v0 }
 0x10c   : > { %v4777_v8 = vpack.c.bf16 %v1038_v61, %v1034_v53  ;;  %747 = vst.msk [vmem:[#allocation3 + $0x40] sm:$0xff] %vm738_vm3, %v4474_v48  ;;  %748 = vst.msk [vmem:[#allocation3 + $0x48] sm:$0xff] %vm738_vm3, %v4474_v48 }
 0x10d   : > { %v1040_v63 = vpop.f32.mrf.mxu1  ;;  %749 = vst.msk [vmem:[#allocation3 + $0x50] sm:$0xff] %vm738_vm3, %v4474_v48  ;;  %750 = vst.msk [vmem:[#allocation3 + $0x58] sm:$0xff] %vm738_vm3, %v4474_v48 }
 0x10e   : > { %643 = vrot.lane.b32.xlu1 %v4730_v36, %s4473_s14  ;;  %v4789_v11 = vpack.c.bf16 %v1040_v63, %v1036_v57  ;;  %v1109_v13 = vsel %vm803_vm1, %v4777_v8, 0  ;;  %751 = vst.msk [vmem:[#allocation3 + $0x60] sm:$0xff] %vm738_vm3, %v4474_v48  ;;  %752 = vst.msk [vmem:[#allocation3 + $0x68] sm:$0xff] %vm738_vm3, %v4474_v48 }
 0x10f   : > { %v1044_v1 = vpop.f32.mrf.mxu1  ;;  %753 = vst.msk [vmem:[#allocation3 + $0x70] sm:$0xff] %vm738_vm3, %v4474_v48  ;;  %754 = vst.msk [vmem:[#allocation3 + $0x78] sm:$0xff] %vm738_vm3, %v4474_v48 }
 0x110   : > { %v4181_v20 = vld [vmem:[#allocation2 + $0x18] sm:$0xff]   ;;  %755 = vst.msk [vmem:[#allocation3 + $0x80] sm:$0xff] %vm738_vm3, %v4474_v48  ;;  %756 = vst.msk [vmem:[#allocation3 + $0x88] sm:$0xff] %vm738_vm3, %v4474_v48 }
 0x111   : > { %v1046_v4 = vpop.f32.mrf.mxu1  ;;  %757 = vst.msk [vmem:[#allocation3 + $0x90] sm:$0xff] %vm738_vm3, %v4474_v48  ;;  %758 = vst.msk [vmem:[#allocation3 + $0x98] sm:$0xff] %vm738_vm3, %v4474_v48 }
 0x112   : > { %1559 = vrot.lane.b32.xlu1 %v4771_v3, %s4473_s14  ;;  %v4180_v18 = vld [vmem:[#allocation2 + $0x10] sm:$0xff]   ;;  %759 = vst.msk [vmem:[#allocation3 + $0xa0] sm:$0xff] %vm738_vm3, %v4474_v48  ;;  %760 = vst.msk [vmem:[#allocation3 + $0xa8] sm:$0xff] %vm738_vm3, %v4474_v48 }
 0x113   : > { %v1048_v5 = vpop.f32.mrf.mxu1  ;;  %761 = vst.msk [vmem:[#allocation3 + $0xb0] sm:$0xff] %vm738_vm3, %v4474_v48  ;;  %762 = vst.msk [vmem:[#allocation3 + $0xb8] sm:$0xff] %vm738_vm3, %v4474_v48 }
 0x114   : > { %v4775_v6 = vpack.c.bf16 %v1048_v5, %v1044_v1  ;;  %763 = vst.msk [vmem:[#allocation3 + $0xc0] sm:$0xff] %vm738_vm3, %v4474_v48  ;;  %764 = vst.msk [vmem:[#allocation3 + $0xc8] sm:$0xff] %vm738_vm3, %v4474_v48  ;;  %v4475_v1 = vmov 0.0  }
 0x115   : > { %v1050_v7 = vpop.f32.mrf.mxu1  ;;  %765 = vst.msk [vmem:[#allocation3 + $0xd0] sm:$0xff] %vm738_vm3, %v4474_v48  ;;  %766 = vst.msk [vmem:[#allocation3 + $0xd8] sm:$0xff] %vm738_vm3, %v4474_v48 }
 0x116   : > { %v4779_v9 = vpack.c.bf16 %v1050_v7, %v1046_v4  ;;  %1565 = vrot.lane.b32.xlu0 %v4775_v6, %s4473_s14  ;;  %4065 = vmatprep.subr.msk.bf16.mxu0 %vm803_vm1, %v4775_v6  ;;  %v1112_v10 = vsel %vm803_vm1, %v4775_v6, 0  ;;  %767 = vst.msk [vmem:[#allocation3 + $0xe0] sm:$0xff] %vm738_vm3, %v4474_v48  ;;  %768 = vst.msk [vmem:[#allocation3 + $0xe8] sm:$0xff] %vm738_vm3, %v4474_v48 }
 0x117   : > { %3914 = vmatpush3.bf16.xpose.msra.mxu0 %v1112_v10  ;;  %649 = vrot.lane.b32.xlu1 %v4764_v62, %s4473_s14  ;;  %769 = vst.msk [vmem:[#allocation3 + $0xf0] sm:$0xff] %vm738_vm3, %v4474_v48  ;;  %770 = vst.msk [vmem:[#allocation3 + $0xf8] sm:$0xff] %vm738_vm3, %v4474_v48 }
 0x118   : > { %4066 = vmatprep.subr.msk.bf16.mxu0 %vm803_vm1, %v4777_v8  ;;  %3929 = vmatprep.subr.bf16.mxu1 %v4779_v9  ;;  %771 = vst.msk [vmem:[#allocation4] sm:$0xff] %vm738_vm3, %v4475_v1  ;;  %772 = vst.msk [vmem:[#allocation4 + $0x8] sm:$0xff] %vm738_vm3, %v4475_v1 }
 0x119   : > { %3930 = vmatpush3.bf16.msra.mxu1 %v4779_v9  ;;  %773 = vst.msk [vmem:[#allocation4 + $0x10] sm:$0xff] %vm738_vm3, %v4475_v1  ;;  %774 = vst.msk [vmem:[#allocation4 + $0x18] sm:$0xff] %vm738_vm3, %v4475_v1 }
 0x11a   : > { %1563 = vrot.lane.b32.xlu0 %v4777_v8, %s4473_s14  ;;  %3931 = vmatprep.subr.bf16.mxu1 %v4789_v11  ;;  %775 = vst.msk [vmem:[#allocation4 + $0x20] sm:$0xff] %vm738_vm3, %v4475_v1  ;;  %776 = vst.msk [vmem:[#allocation4 + $0x28] sm:$0xff] %vm738_vm3, %v4475_v1 }
 0x11b   : > { %653 = vrot.lane.b32.xlu1 %v4760_v59, %s4473_s14  ;;  %777 = vst.msk [vmem:[#allocation4 + $0x30] sm:$0xff] %vm738_vm3, %v4475_v1  ;;  %778 = vst.msk [vmem:[#allocation4 + $0x38] sm:$0xff] %vm738_vm3, %v4475_v1 }
 0x11c   : > { %779 = vst.msk [vmem:[#allocation4 + $0x40] sm:$0xff] %vm738_vm3, %v4475_v1  ;;  %780 = vst.msk [vmem:[#allocation4 + $0x48] sm:$0xff] %vm738_vm3, %v4475_v1 }
 0x11d   : > { %3932 = vmatpush3.bf16.msra.mxu1 %v4789_v11  ;;  %781 = vst.msk [vmem:[#allocation4 + $0x50] sm:$0xff] %vm738_vm3, %v4475_v1  ;;  %782 = vst.msk [vmem:[#allocation4 + $0x58] sm:$0xff] %vm738_vm3, %v4475_v1 }
 0x11e   : > { %3933 = vmatprep.subr.bf16.mxu1 %v4800_v12  ;;  %641 = vrot.lane.b32.xlu0 %v4744_v47, %s4473_s14  ;;  %783 = vst.msk [vmem:[#allocation4 + $0x60] sm:$0xff] %vm738_vm3, %v4475_v1  ;;  %784 = vst.msk [vmem:[#allocation4 + $0x68] sm:$0xff] %vm738_vm3, %v4475_v1 }
 0x11f   : > { %3916 = vmatpush3.bf16.xpose.msra.mxu0 %v1109_v13  ;;  %785 = vst.msk [vmem:[#allocation4 + $0x70] sm:$0xff] %vm738_vm3, %v4475_v1  ;;  %786 = vst.msk [vmem:[#allocation4 + $0x78] sm:$0xff] %vm738_vm3, %v4475_v1 }
 0x120   : > { %4067 = vmatprep.subr.msk.bf16.mxu0 %vm803_vm1, %v4740_v46  ;;  %787 = vst.msk [vmem:[#allocation4 + $0x80] sm:$0xff] %vm738_vm3, %v4475_v1  ;;  %788 = vst.msk [vmem:[#allocation4 + $0x88] sm:$0xff] %vm738_vm3, %v4475_v1 }
 0x121   : > { %3934 = vmatpush3.bf16.msra.mxu1 %v4800_v12  ;;  %789 = vst.msk [vmem:[#allocation4 + $0x90] sm:$0xff] %vm738_vm3, %v4475_v1  ;;  %790 = vst.msk [vmem:[#allocation4 + $0x98] sm:$0xff] %vm738_vm3, %v4475_v1 }
 0x122   : > { %3935 = vmatprep.subr.bf16.mxu1 %v4810_v14  ;;  %645 = vrot.lane.b32.xlu0 %v4738_v42, %s4473_s14  ;;  %791 = vst.msk [vmem:[#allocation4 + $0xa0] sm:$0xff] %vm738_vm3, %v4475_v1  ;;  %792 = vst.msk [vmem:[#allocation4 + $0xa8] sm:$0xff] %vm738_vm3, %v4475_v1 }
 0x123   : > { %793 = vst.msk [vmem:[#allocation4 + $0xb0] sm:$0xff] %vm738_vm3, %v4475_v1  ;;  %794 = vst.msk [vmem:[#allocation4 + $0xb8] sm:$0xff] %vm738_vm3, %v4475_v1 }
 0x124   : > { %795 = vst.msk [vmem:[#allocation4 + $0xc0] sm:$0xff] %vm738_vm3, %v4475_v1  ;;  %796 = vst.msk [vmem:[#allocation4 + $0xc8] sm:$0xff] %vm738_vm3, %v4475_v1 }
 0x125   : > { %3936 = vmatpush3.bf16.msra.mxu1 %v4810_v14  ;;  %797 = vst.msk [vmem:[#allocation4 + $0xd0] sm:$0xff] %vm738_vm3, %v4475_v1  ;;  %798 = vst.msk [vmem:[#allocation4 + $0xd8] sm:$0xff] %vm738_vm3, %v4475_v1 }
 0x126   : > { %647 = vrot.lane.b32.xlu0 %v4754_v55, %s4473_s14  ;;  %799 = vst.msk [vmem:[#allocation4 + $0xe0] sm:$0xff] %vm738_vm3, %v4475_v1  ;;  %800 = vst.msk [vmem:[#allocation4 + $0xe8] sm:$0xff] %vm738_vm3, %v4475_v1 }
 0x127   : > { %3918 = vmatpush3.bf16.xpose.msra.mxu0 %v1106_v15  ;;  %801 = vst.msk [vmem:[#allocation4 + $0xf0] sm:$0xff] %vm738_vm3, %v4475_v1  ;;  %802 = vst.msk [vmem:[#allocation4 + $0xf8] sm:$0xff] %vm738_vm3, %v4475_v1 }
 0x128   : > { %4068 = vmatprep.subr.msk.bf16.mxu0 %vm803_vm1, %v4771_v3  ;;  %804 = vst.msk [vmem:[#allocation5] sm:$0xff] %vm803_vm1, %v4475_v1  ;;  %805 = vst.msk [vmem:[#allocation5 + $0x8] sm:$0xff] %vm803_vm1, %v4475_v1 }
 0x129   : > { %806 = vst.msk [vmem:[#allocation5 + $0x10] sm:$0xff] %vm803_vm1, %v4475_v1  ;;  %807 = vst.msk [vmem:[#allocation5 + $0x18] sm:$0xff] %vm803_vm1, %v4475_v1 }
 0x12a   : > { %651 = vrot.lane.b32.xlu0 %v4750_v51, %s4473_s14  ;;  %808 = vst.msk [vmem:[#allocation5 + $0x20] sm:$0xff] %vm803_vm1, %v4475_v1  ;;  %809 = vst.msk [vmem:[#allocation5 + $0x28] sm:$0xff] %vm803_vm1, %v4475_v1 }
 0x12b   : > { %810 = vst.msk [vmem:[#allocation5 + $0x30] sm:$0xff] %vm803_vm1, %v4475_v1  ;;  %811 = vst.msk [vmem:[#allocation5 + $0x38] sm:$0xff] %vm803_vm1, %v4475_v1 }
 0x12c   : > { %812 = vst.msk [vmem:[#allocation5 + $0x40] sm:$0xff] %vm803_vm1, %v4475_v1  ;;  %813 = vst.msk [vmem:[#allocation5 + $0x48] sm:$0xff] %vm803_vm1, %v4475_v1 }
 0x12d   : > { %814 = vst.msk [vmem:[#allocation5 + $0x50] sm:$0xff] %vm803_vm1, %v4475_v1  ;;  %815 = vst.msk [vmem:[#allocation5 + $0x58] sm:$0xff] %vm803_vm1, %v4475_v1 }
 0x12e   : > { %816 = vst.msk [vmem:[#allocation5 + $0x60] sm:$0xff] %vm803_vm1, %v4475_v1  ;;  %817 = vst.msk [vmem:[#allocation5 + $0x68] sm:$0xff] %vm803_vm1, %v4475_v1 }
 0x12f   : > { %3920 = vmatpush3.bf16.xpose.msra.mxu0 %v1103_v16  ;;  %818 = vst.msk [vmem:[#allocation5 + $0x70] sm:$0xff] %vm803_vm1, %v4475_v1  ;;  %819 = vst.msk [vmem:[#allocation5 + $0x78] sm:$0xff] %vm803_vm1, %v4475_v1 }
 0x130   : > { %820 = vst.msk [vmem:[#allocation5 + $0x80] sm:$0xff] %vm803_vm1, %v4475_v1  ;;  %821 = vst.msk [vmem:[#allocation5 + $0x88] sm:$0xff] %vm803_vm1, %v4475_v1 }
 0x131   : > { %822 = vst.msk [vmem:[#allocation5 + $0x90] sm:$0xff] %vm803_vm1, %v4475_v1  ;;  %823 = vst.msk [vmem:[#allocation5 + $0x98] sm:$0xff] %vm803_vm1, %v4475_v1 }
 0x132   : > { %824 = vst.msk [vmem:[#allocation5 + $0xa0] sm:$0xff] %vm803_vm1, %v4475_v1  ;;  %825 = vst.msk [vmem:[#allocation5 + $0xa8] sm:$0xff] %vm803_vm1, %v4475_v1 }
 0x133   : > { %826 = vst.msk [vmem:[#allocation5 + $0xb0] sm:$0xff] %vm803_vm1, %v4475_v1  ;;  %827 = vst.msk [vmem:[#allocation5 + $0xb8] sm:$0xff] %vm803_vm1, %v4475_v1 }
 0x134   : > { %828 = vst.msk [vmem:[#allocation5 + $0xc0] sm:$0xff] %vm803_vm1, %v4475_v1  ;;  %829 = vst.msk [vmem:[#allocation5 + $0xc8] sm:$0xff] %vm803_vm1, %v4475_v1 }
 0x135   : > { %830 = vst.msk [vmem:[#allocation5 + $0xd0] sm:$0xff] %vm803_vm1, %v4475_v1  ;;  %831 = vst.msk [vmem:[#allocation5 + $0xd8] sm:$0xff] %vm803_vm1, %v4475_v1 }
 0x136   : > { %3922 = vmatmul.mubr.msk.bf16.vlgmr.msra.gmra.mxu0 %vm803_vm1, %v4179_v19  ;;  %832 = vst.msk [vmem:[#allocation5 + $0xe0] sm:$0xff] %vm803_vm1, %v4475_v1  ;;  %833 = vst.msk [vmem:[#allocation5 + $0xe8] sm:$0xff] %vm803_vm1, %v4475_v1 }
 0x137   : > { %3925 = vmatprep.mubr.msk.bf16.mxu0 %vm803_vm1, %v4180_v18  ;;  %834 = vst.msk [vmem:[#allocation5 + $0xf0] sm:$0xff] %vm803_vm1, %v4475_v1  ;;  %835 = vst.msk [vmem:[#allocation5 + $0xf8] sm:$0xff] %vm803_vm1, %v4475_v1 }
 0x13e   : > { %3926 = vmatmul.mubr.msk.bf16.gmra.mxu0 %vm803_vm1, %v4181_v20 }
 0x178   : > { %v1562_v21 = vpop.permute.xlu1 %1561 }
 0x179   : > { %v1583_v17 = vsel %vm803_vm1, %v1562_v21, 0 }
 0x17c   : > { %v640_v22 = vpop.permute.xlu1 %639 }
 0x17d   : > { %664 = vst.msk [vmem:[#allocation2 + $0x20] sm:$0xf] %vm630_vm0, %v640_v22 }
 0x180   : > { %v644_v23 = vpop.permute.xlu1 %643 }
 0x181   : > { %666 = vst.msk [vmem:[#allocation2 + $0x28] sm:$0xf] %vm630_vm0, %v644_v23 }
 0x184   : > { %v1560_v24 = vpop.permute.xlu1 %1559 }
 0x185   : > { %v1580_v38 = vsel %vm803_vm1, %v1560_v24, 0 }
 0x188   : > { %v1566_v25 = vpop.permute.xlu0 %1565 }
 0x189   : > { %4069 = vmatprep.subr.msk.bf16.mxu0 %vm803_vm1, %v1566_v25  ;;  %v1589_v26 = vsel %vm803_vm1, %v1566_v25, 0  ;;  %v650_v27 = vpop.permute.xlu1 %649 }
 0x18a   : > { %3946 = vmatpush3.bf16.xpose.msra.mxu0 %v1589_v26  ;;  %669 = vst.msk [vmem:[#allocation2 + $0x34] sm:$0xf] %vm630_vm0, %v650_v27  ;;  %v5076_v27 = vld [vmem:[#allocation3 + $0x10] sm:$0xff] }
 0x18c   : > { %v1564_v29 = vpop.permute.xlu0 %1563 }
 0x18d   : > { %4070 = vmatprep.subr.msk.bf16.mxu0 %vm803_vm1, %v1564_v29  ;;  %v654_v30 = vpop.permute.xlu1 %653  ;;  %v1586_v32 = vsel %vm803_vm1, %v1564_v29, 0 }
 0x18e   : > { %671 = vst.msk [vmem:[#allocation2 + $0x3c] sm:$0xf] %vm630_vm0, %v654_v30 }
 0x190   : > { %v642_v31 = vpop.permute.xlu0 %641 }
 0x191   : > { %665 = vst.msk [vmem:[#allocation2 + $0x24] sm:$0xf] %vm630_vm0, %v642_v31  ;;  %v5081_v31 = vld [vmem:[#allocation3] sm:$0xff] }
 0x192   : > { %3948 = vmatpush3.bf16.xpose.msra.mxu0 %v1586_v32 }
 0x193   : > { %4071 = vmatprep.subr.msk.bf16.mxu0 %vm803_vm1, %v1562_v21 }
 0x194   : > { %v646_v33 = vpop.permute.xlu0 %645 }
 0x195   : > { %667 = vst.msk [vmem:[#allocation2 + $0x2c] sm:$0xf] %vm630_vm0, %v646_v33 }
 0x198   : > { %v4182_v34 = vld [vmem:[#allocation2 + $0x20] sm:$0xff]   ;;  %v648_v35 = vpop.permute.xlu0 %647 }
 0x199   : > { %668 = vst.msk [vmem:[#allocation2 + $0x30] sm:$0xf] %vm630_vm0, %v648_v35  ;;  %3953 = vmatprep.mubr.msk.bf16.mxu0 %vm803_vm1, %v4182_v34  ;;  %v5087_v34 = vld [vmem:[#allocation3 + $0x8] sm:$0xff] }
 0x19a   : > { %3950 = vmatpush3.bf16.xpose.msra.mxu0 %v1583_v17 }
 0x19b   : > { %4072 = vmatprep.subr.msk.bf16.mxu0 %vm803_vm1, %v1560_v24 }
 0x19c   : > { %v652_v37 = vpop.permute.xlu0 %651  ;;  %v4183_v28 = vld [vmem:[#allocation2 + $0x28] sm:$0xff]  }
 0x19d   : > { %670 = vst.msk [vmem:[#allocation2 + $0x38] sm:$0xf] %vm630_vm0, %v652_v37  ;;  %v5092_v37 = vld [vmem:[#allocation3 + $0x18] sm:$0xff] }
 0x1a0   : > { %v4184_v39 = vld [vmem:[#allocation2 + $0x30] sm:$0xff]  }
 0x1a2   : > { %3952 = vmatpush3.bf16.xpose.msra.mxu0 %v1580_v38 }
 0x1a4   : > { %v4185_v40 = vld [vmem:[#allocation2 + $0x38] sm:$0xff]  }
 0x1a9   : > { %3954 = vmatmul.mubr.msk.bf16.vlgmr.msra.gmra.mxu0 %vm803_vm1, %v4183_v28 }
 0x1aa   : > { %3957 = vmatprep.mubr.msk.bf16.mxu0 %vm803_vm1, %v4184_v39 }
 0x1b1   : > { %3958 = vmatmul.mubr.msk.bf16.gmra.mxu0 %vm803_vm1, %v4185_v40  ;;  %v5102_v40 = vld [vmem:[#allocation3 + $0x30] sm:$0xff] }
 0x1f6   : > { %v4852_v41 = vpop.f32.mrf.mxu0 }
 0x1f7   : > { %v1194_v43 = vsel %vm1187_vm2, %v4852_v41, -inf }
 0x1f8   : > { %1195 = vmax.xlane.f32.xlu0 %v1194_v43  ;;  %v4856_v44 = vpop.f32.mrf.mxu0 }
 0x1f9   : > { %v1188_v49 = vsel %vm1187_vm2, %v4856_v44, -inf }
 0x1fa   : > { %v4858_v45 = vpop.f32.mrf.mxu0 }
 0x1fb   : > { %v1197_v54 = vsel %vm1187_vm2, %v4858_v45, -inf }
 0x1fc   : > { %1189 = vmax.xlane.f32.xlu0 %v1188_v49  ;;  %v4894_v50 = vpop.f32.mrf.mxu0 }
 0x1fd   : > { %v1191_v52 = vsel %vm1187_vm2, %v4894_v50, -inf }
 0x1fe   : > { %1192 = vmax.xlane.f32.xlu1 %v1191_v52  ;;  %v4898_v53 = vpop.f32.mrf.mxu0 }
 0x1ff   : > { %v1206_v56 = vsel %vm1187_vm2, %v4898_v53, -inf }
 0x200   : > { %1198 = vmax.xlane.f32.xlu0 %v1197_v54  ;;  %v4904_v57 = vpop.f32.mrf.mxu0 }
 0x201   : > { %v1200_v60 = vsel %vm1187_vm2, %v4904_v57, -inf }
 0x202   : > { %1207 = vmax.xlane.f32.xlu1 %v1206_v56  ;;  %v4906_v58 = vpop.f32.mrf.mxu0  ;;  %v5119_v56 = vld [vmem:[#allocation3 + $0x20] sm:$0xff] }
 0x203   : > { %v1209_v0 = vsel %vm1187_vm2, %v4906_v58, -inf }
 0x204   : > { %v4910_v61 = vpop.f32.mrf.mxu0 }
 0x205   : > { %v1203_v63 = vsel %vm1187_vm2, %v4910_v61, -inf }
 0x206   : > { %1201 = vmax.xlane.f32.xlu1 %v1200_v60  ;;  %1204 = vmax.xlane.f32.xlu0 %v1203_v63  ;;  %v5121_v60 = vld [vmem:[#allocation3 + $0x28] sm:$0xff] }
 0x20a   : > { %1210 = vmax.xlane.f32.xlu0 %v1209_v0 }
 0x269   : > { %v5044_v4 = vpop.f32.mrf.mxu0 }
 0x26a   : > { %v1671_v5 = vsel %vm1187_vm2, %v5044_v4, -inf }
 0x26b   : > { %1672 = vmax.xlane.f32.xlu1 %v1671_v5  ;;  %v5048_v7 = vpop.f32.mrf.mxu0 }
 0x26c   : > { %v1665_v13 = vsel %vm1187_vm2, %v5048_v7, -inf }
 0x26d   : > { %v5050_v10 = vpop.f32.mrf.mxu0 }
 0x26e   : > { %v1674_v21 = vsel %vm1187_vm2, %v5050_v10, -inf }
 0x26f   : > { %1666 = vmax.xlane.f32.xlu1 %v1665_v13  ;;  %v5054_v15 = vpop.f32.mrf.mxu0 }
 0x270   : > { %v1668_v16 = vsel %vm1187_vm2, %v5054_v15, -inf }
 0x271   : > { %v5058_v18 = vpop.f32.mrf.mxu0  ;;  %1669 = vmax.xlane.f32.xlu0 %v1668_v16  ;;  %v5134_v16 = vld [vmem:[#allocation3 + $0x38] sm:$0xff] }
 0x272   : > { %v1683_v19 = vsel %vm1187_vm2, %v5058_v18, -inf  ;;  %6326 = vst [vmem:[#allocation11_spill] sm:$0xff] %v5134_v16 }
 0x273   : > { %1684 = vmax.xlane.f32.xlu1 %v1683_v19  ;;  %v5062_v20 = vpop.f32.mrf.mxu0 }
 0x274   : > { %v1677_v22 = vsel %vm1187_vm2, %v5062_v20, -inf }
 0x275   : > { %v5068_v23 = vpop.f32.mrf.mxu0  ;;  %1675 = vmax.xlane.f32.xlu0 %v1674_v21  ;;  %v5173_v21 = vld [vmem:[#allocation3 + $0x70] sm:$0xff] }
 0x276   : > { %v1686_v26 = vsel %vm1187_vm2, %v5068_v23, -inf  ;;  %6333 = vst [vmem:[#allocation18_spill] sm:$0xff] %v5173_v21 }
 0x277   : > { %1678 = vmax.xlane.f32.xlu1 %v1677_v22  ;;  %v5070_v24 = vpop.f32.mrf.mxu0 }
 0x278   : > { %v1680_v25 = vsel %vm1187_vm2, %v5070_v24, -inf }
 0x279   : > { %1681 = vmax.xlane.f32.xlu0 %v1680_v25 }
 0x27d   : > { %1687 = vmax.xlane.f32.xlu0 %v1686_v26 }
 0x281   : > { %v1196_v29 = vpop.xlane.xlu0 %1195 }
 0x282   : > { %v5079_v30 = vmax.f32 %v5076_v27, %v1196_v29  ;;  %v5156_v29 = vld [vmem:[#allocation3 + $0x50] sm:$0xff] }
 0x283   : > { %6328 = vst [vmem:[#allocation13_spill] sm:$0xff] %v5156_v29 }
 0x284   : > { %1520 = vst.msk [vmem:[#allocation3 + $0x10] sm:$0xff] %vm738_vm3, %v5079_v30 }
 0x285   : > { %v1190_v33 = vpop.xlane.xlu0 %1189 }
 0x286   : > { %v5090_v35 = vmax.f32 %v5081_v31, %v1190_v33 }
 0x287   : > { %v1193_v17 = vpop.xlane.xlu1 %1192 }
 0x288   : > { %1518 = vst.msk [vmem:[#allocation3] sm:$0xff] %vm738_vm3, %v5090_v35  ;;  %v5099_v39 = vmax.f32 %v5087_v34, %v1193_v17  ;;  %1246 = vperm.xlu1 %4144, %v5090_v35  }
 0x289   : > { %v1199_v28 = vpop.xlane.xlu0 %1198 }
 0x28a   : > { %1519 = vst.msk [vmem:[#allocation3 + $0x8] sm:$0xff] %vm738_vm3, %v5099_v39  ;;  %v5109_v48 = vmax.f32 %v5092_v37, %v1199_v28  ;;  %v5161_v28 = vld [vmem:[#allocation3 + $0x40] sm:$0xff] }
 0x28b   : > { %v1208_v49 = vpop.xlane.xlu1 %1207  ;;  %6330 = vst [vmem:[#allocation15_spill] sm:$0xff] %v5161_v28 }
 0x28c   : > { %1521 = vst.msk [vmem:[#allocation3 + $0x18] sm:$0xff] %vm738_vm3, %v5109_v48  ;;  %v5116_v54 = vmax.f32 %v5102_v40, %v1208_v49  ;;  %1256 = vperm.xlu1 %4144, %v5079_v30  }
 0x28e   : > { %1524 = vst.msk [vmem:[#allocation3 + $0x30] sm:$0xff] %vm738_vm3, %v5116_v54 }
 0x28f   : > { %v1202_v0 = vpop.xlane.xlu1 %1201  ;;  %v1205_v1 = vpop.xlane.xlu0 %1204 }
 0x290   : > { %v5128_v5 = vmax.f32 %v5119_v56, %v1202_v0  ;;  %v5131_v13 = vmax.f32 %v5121_v60, %v1205_v1  ;;  %1261 = vperm.xlu1 %4144, %v5109_v48   ;;  %v5168_v1 = vld [vmem:[#allocation3 + $0x48] sm:$0xff] }
 0x291   : > { %6331 = vst [vmem:[#allocation16_spill] sm:$0xff] %v5168_v1 }
 0x292   : > { %6325 = vst [vmem:[#allocation10_spill] sm:$0xff] %v5131_v13  ;;  %1522 = vst.msk [vmem:[#allocation3 + $0x20] sm:$0xff] %vm738_vm3, %v5128_v5 }
 0x293   : > { %1523 = vst.msk [vmem:[#allocation3 + $0x28] sm:$0xff] %vm738_vm3, %v5131_v13  ;;  %1251 = vperm.xlu0 %4145, %v5099_v39   ;;  %v1211_v22 = vpop.xlane.xlu0 %1210 }
 0x294   : > { %v5146_v25 = vmax.f32 %v5134_v16, %v1211_v22  ;;  %1276 = vperm.xlu1 %4144, %v5116_v54  }
 0x296   : > { %6327 = vst [vmem:[#allocation12_spill] sm:$0xff] %v5146_v25  ;;  %1525 = vst.msk [vmem:[#allocation3 + $0x38] sm:$0xff] %vm738_vm3, %v5146_v25 }
 0x298   : > { %1266 = vperm.xlu1 %4144, %v5128_v5  }
 0x29c   : > { %1281 = vperm.xlu1 %4144, %v5146_v25  }
 0x2a0   : > { %1271 = vperm.xlu1 %4144, %v5131_v13   ;;  %v5466_v13 = vld [vmem:[#allocation3 + $0xa8] sm:$0xff] }
 0x2f4   : > { %v1673_v33 = vpop.xlane.xlu1 %1672 }
 0x2f5   : > { %v5159_v17 = vmax.f32 %v5156_v29, %v1673_v33 }
 0x2f7   : > { %6329 = vst [vmem:[#allocation14_spill] sm:$0xff] %v5159_v17  ;;  %2014 = vst.msk [vmem:[#allocation3 + $0x50] sm:$0xff] %vm738_vm3, %v5159_v17  ;;  %1733 = vperm.xlu0 %4145, %v5159_v17  }
 0x2f8   : > { %v1667_v0 = vpop.xlane.xlu1 %1666 }
 0x2f9   : > { %v5171_v22 = vmax.f32 %v5161_v28, %v1667_v0  ;;  %v5185_v0 = vld [vmem:[#allocation3 + $0x58] sm:$0xff] }
 0x2fa   : > { %v1670_v26 = vpop.xlane.xlu0 %1669  ;;  %6335 = vst [vmem:[#allocation20_spill] sm:$0xff] %v5185_v0 }
 0x2fb   : > { %6332 = vst [vmem:[#allocation17_spill] sm:$0xff] %v5171_v22  ;;  %2012 = vst.msk [vmem:[#allocation3 + $0x40] sm:$0xff] %vm738_vm3, %v5171_v22  ;;  %v5180_v49 = vmax.f32 %v5168_v1, %v1670_v26  ;;  %1913 = vrot.lane.b32.xlu0 %v4779_v9, %s4473_s14  ;;  %1723 = vperm.xlu1 %4144, %v5171_v22   ;;  %v5194_v26 = vld [vmem:[#allocation3 + $0x60] sm:$0xff]  ;;  %v5446_v1 = vld [vmem:[#allocation3 + $0x98] sm:$0xff] }
 0x2fc   : > { %v1685_v63 = vpop.xlane.xlu1 %1684  ;;  %6337 = vst [vmem:[#allocation22_spill] sm:$0xff] %v5194_v26  ;;  %6367 = vst [vmem:[#allocation52_spill] sm:$0xff] %v5446_v1 }
 0x2fd   : > { %6334 = vst [vmem:[#allocation19_spill] sm:$0xff] %v5180_v49  ;;  %2013 = vst.msk [vmem:[#allocation3 + $0x48] sm:$0xff] %vm738_vm3, %v5180_v49  ;;  %v5192_v33 = vmax.f32 %v5173_v21, %v1685_v63  ;;  %v5206_v63 = vld [vmem:[#allocation3 + $0x68] sm:$0xff] }
 0x2fe   : > { %v1676_v43 = vpop.xlane.xlu0 %1675  ;;  %6339 = vst [vmem:[#allocation24_spill] sm:$0xff] %v5206_v63 }
 0x2ff   : > { %6336 = vst [vmem:[#allocation21_spill] sm:$0xff] %v5192_v33  ;;  %2018 = vst.msk [vmem:[#allocation3 + $0x70] sm:$0xff] %vm738_vm3, %v5192_v33  ;;  %v5201_v32 = vmax.f32 %v5185_v0, %v1676_v43  ;;  %1909 = vrot.lane.b32.xlu0 %v4800_v12, %s4473_s14  ;;  %1728 = vperm.xlu1 %4144, %v5180_v49   ;;  %v5224_v0 = vld [vmem:[#allocation3 + $0x78] sm:$0xff]  ;;  %v5444_v49 = vld [vmem:[#allocation3 + $0xa0] sm:$0xff] }
 0x300   : > { %v1679_v19 = vpop.xlane.xlu1 %1678  ;;  %6342 = vst [vmem:[#allocation27_spill] sm:$0xff] %v5224_v0  ;;  %6366 = vst [vmem:[#allocation51_spill] sm:$0xff] %v5444_v49 }
 0x301   : > { %6338 = vst [vmem:[#allocation23_spill] sm:$0xff] %v5201_v32  ;;  %2015 = vst.msk [vmem:[#allocation3 + $0x58] sm:$0xff] %vm738_vm3, %v5201_v32  ;;  %v5213_v52 = vmax.f32 %v5194_v26, %v1679_v19 }
 0x302   : > { %v1682_v21 = vpop.xlane.xlu0 %1681 }
 0x303   : > { %6340 = vst [vmem:[#allocation25_spill] sm:$0xff] %v5213_v52  ;;  %2016 = vst.msk [vmem:[#allocation3 + $0x60] sm:$0xff] %vm738_vm3, %v5213_v52  ;;  %v5220_v17 = vmax.f32 %v5206_v63, %v1682_v21  ;;  %1753 = vperm.xlu0 %4145, %v5192_v33   ;;  %1738 = vperm.xlu1 %4144, %v5201_v32  }
 0x304   : > { %v1247_v38 = vpop.permute.xlu1 %1246 }
 0x305   : > { %6341 = vst [vmem:[#allocation26_spill] sm:$0xff] %v5220_v17  ;;  %2017 = vst.msk [vmem:[#allocation3 + $0x68] sm:$0xff] %vm738_vm3, %v5220_v17  ;;  %v1284_v33 = vsub.f32 %v4856_v44, %v1247_v38 }
 0x306   : > { %v1688_v43 = vpop.xlane.xlu0 %1687 }
 0x307   : > { %v5231_v26 = vmax.f32 %v5224_v0, %v1688_v43  ;;  %1743 = vperm.xlu0 %4145, %v5213_v52   ;;  %1911 = vrot.lane.b32.xlu1 %v4789_v11, %s4473_s14  ;;  %v1292_v63 = vmul.f32 1.442695, %v1284_v33 }
 0x308   : > { %v1257_v21 = vpop.permute.xlu1 %1256 }
 0x309   : > { %6343 = vst [vmem:[#allocation28_spill] sm:$0xff] %v5231_v26  ;;  %2019 = vst.msk [vmem:[#allocation3 + $0x78] sm:$0xff] %vm738_vm3, %v5231_v26  ;;  %v1286_v43 = vsub.f32 %v4852_v41, %v1257_v21  ;;  %4202 = vpow2.f32 %v1292_v63 }
 0x30b   : > { %2055 = vrot.lane.b32.xlu0 %v4775_v6, %s4476_s12  ;;  %1907 = vrot.lane.b32.xlu1 %v4810_v14, %s4473_s14  ;;  %v1296_v0 = vmul.f32 1.442695, %v1286_v43 }
 0x30c   : > { %v1262_v19 = vpop.permute.xlu1 %1261 }
 0x30d   : > { %v1287_v52 = vsub.f32 %v4858_v45, %v1262_v19 }
 0x30e   : > { %v1252_v44 = vpop.permute.xlu0 %1251 }
 0x30f   : > { %v1298_v38 = vmul.f32 1.442695, %v1287_v52  ;;  %v1285_v32 = vsub.f32 %v4894_v50, %v1252_v44  ;;  %2051 = vrot.lane.b32.xlu0 %v4740_v46, %s4476_s12  ;;  %1748 = vperm.xlu1 %4144, %v5220_v17  }
 0x310   : > { %v1277_v29 = vpop.permute.xlu1 %1276 }
 0x311   : > { %v1294_v22 = vmul.f32 1.442695, %v1285_v32  ;;  %4204 = vpow2.f32 %v1298_v38  ;;  %v1290_v52 = vsub.f32 %v4898_v53, %v1277_v29 }
 0x313   : > { %4206 = vpow2.f32 %v1294_v22  ;;  %674 = vrot.lane.b32.xlu0 %v4744_v47, %s4476_s12  ;;  %1758 = vperm.xlu1 %4144, %v5231_v26   ;;  %v1304_v19 = vmul.f32 1.442695, %v1290_v52 }
 0x314   : > { %4208 = vpow2.f32 %v1296_v0  ;;  %v1267_v41 = vpop.permute.xlu1 %1266 }
 0x315   : > { %v1288_v45 = vsub.f32 %v4904_v57, %v1267_v41 }
 0x316   : > { %v5266_v63 = vpop.eup %4202 }
 0x317   : > { %678 = vrot.lane.b32.xlu0 %v4738_v42, %s4476_s12  ;;  %2053 = vrot.lane.b32.xlu1 %v4777_v8, %s4476_s12  ;;  %v1300_v22 = vmul.f32 1.442695, %v1288_v45 }
 0x318   : > { %v1282_v50 = vpop.permute.xlu1 %1281 }
 0x319   : > { %v1291_v32 = vsub.f32 %v4906_v58, %v1282_v50  ;;  %4210 = vpow2.f32 %v1300_v22 }
 0x31b   : > { %680 = vrot.lane.b32.xlu0 %v4754_v55, %s4476_s12  ;;  %672 = vrot.lane.b32.xlu1 %v4734_v2, %s4476_s12  ;;  %v1306_v33 = vmul.f32 1.442695, %v1291_v32 }
 0x31c   : > { %v1272_v57 = vpop.permute.xlu1 %1271 }
 0x31d   : > { %v1289_v0 = vsub.f32 %v4910_v61, %v1272_v57  ;;  %4212 = vpow2.f32 %v1306_v33 }
 0x31e   : > { %v5268_v21 = vpop.eup %4204 }
 0x31f   : > { %v1302_v58 = vmul.f32 1.442695, %v1289_v0  ;;  %684 = vrot.lane.b32.xlu0 %v4750_v51, %s4476_s12  ;;  %676 = vrot.lane.b32.xlu1 %v4730_v36, %s4476_s12 }
 0x320   : > { %v5274_v53 = vpop.eup %4206 }
 0x321   : > { %v5276_v29 = vpop.eup %4208  ;;  %4214 = vpow2.f32 %v1302_v58  ;;  %v1421_v61 = vpack.c.bf16 %v5274_v53, %v5266_v63 }
 0x322   : > { %v1422_v43 = vpack.c.bf16 %v5268_v21, %v5276_v29  ;;  %4216 = vpow2.f32 %v1304_v19 }
 0x323   : > { %2049 = vrot.lane.b32.xlu1 %v4771_v3, %s4476_s12  ;;  %3937 = vmatprep.mubr.msk.bf16.mxu1 %vm1187_vm2, %v1421_v61 }
 0x324   : > { %3938 = vmatmul.mubr.msk.bf16.vlgmr.msra.gmra.mxu1 %vm1187_vm2, %v1422_v43 }
 0x326   : > { %v5290_v44 = vpop.eup %4210 }
 0x327   : > { %682 = vrot.lane.b32.xlu1 %v4764_v62, %s4476_s12 }
 0x32a   : > { %v5292_v38 = vpop.eup %4212 }
 0x32b   : > { %686 = vrot.lane.b32.xlu1 %v4760_v59, %s4476_s12 }
 0x32e   : > { %v5294_v41 = vpop.eup %4214 }
 0x32f   : > { %v5296_v45 = vpop.eup %4216  ;;  %v1423_v50 = vpack.c.bf16 %v5294_v41, %v5290_v44 }
 0x330   : > { %v1424_v32 = vpack.c.bf16 %v5292_v38, %v5296_v45 }
 0x331   : > { %3941 = vmatprep.mubr.msk.bf16.mxu1 %vm1187_vm2, %v1423_v50 }
 0x332   : > { %3942 = vmatmul.mubr.msk.bf16.gmra.mxu1 %vm1187_vm2, %v1424_v32 }
 0x372   : > { %v1734_v52 = vpop.permute.xlu0 %1733 }
 0x373   : > { %v1763_v0 = vsub.f32 %v5044_v4, %v1734_v52 }
 0x375   : > { %v1773_v17 = vmul.f32 1.442695, %v1763_v0 }
 0x376   : > { %v1724_v22 = vpop.permute.xlu1 %1723  ;;  %v1914_v33 = vpop.permute.xlu0 %1913 }
 0x377   : > { %v1761_v57 = vsub.f32 %v5048_v7, %v1724_v22  ;;  %3961 = vmatprep.subr.bf16.mxu1 %v1914_v33 }
 0x378   : > { %3962 = vmatpush3.bf16.msra.mxu1 %v1914_v33 }
 0x379   : > { %v1769_v19 = vmul.f32 1.442695, %v1761_v57 }
 0x37a   : > { %v1729_v58 = vpop.permute.xlu1 %1728  ;;  %v1910_v61 = vpop.permute.xlu0 %1909 }
 0x37b   : > { %v1762_v43 = vsub.f32 %v5054_v15, %v1729_v58  ;;  %4218 = vpow2.f32 %v1769_v19 }
 0x37d   : > { %v1771_v26 = vmul.f32 1.442695, %v1762_v43 }
 0x37e   : > { %v1739_v50 = vpop.permute.xlu1 %1738  ;;  %v1754_v28 = vpop.permute.xlu0 %1753 }
 0x37f   : > { %4220 = vpow2.f32 %v1771_v26  ;;  %v1764_v32 = vsub.f32 %v5050_v10, %v1739_v50  ;;  %v1767_v33 = vsub.f32 %v5058_v18, %v1754_v28 }
 0x380   : > { %4222 = vpow2.f32 %v1773_v17 }
 0x381   : > { %v1775_v25 = vmul.f32 1.442695, %v1764_v32  ;;  %v1781_v58 = vmul.f32 1.442695, %v1767_v33 }
 0x382   : > { %v1912_v7 = vpop.permute.xlu1 %1911  ;;  %v1744_v22 = vpop.permute.xlu0 %1743 }
 0x383   : > { %4224 = vpow2.f32 %v1775_v25  ;;  %3963 = vmatprep.subr.bf16.mxu1 %v1912_v7  ;;  %v1765_v4 = vsub.f32 %v5062_v20, %v1744_v22 }
 0x384   : > { %3964 = vmatpush3.bf16.msra.mxu1 %v1912_v7 }
 0x385   : > { %3965 = vmatprep.subr.bf16.mxu1 %v1910_v61  ;;  %v1777_v57 = vmul.f32 1.442695, %v1765_v4 }
 0x386   : > { %v1908_v52 = vpop.permute.xlu1 %1907  ;;  %v2056_v15 = vpop.permute.xlu0 %2055 }
 0x387   : > { %4226 = vpow2.f32 %v1777_v57 }
 0x388   : > { %3966 = vmatpush3.bf16.msra.mxu1 %v1910_v61  ;;  %v5310_v10 = vpop.eup %4218 }
 0x389   : > { %3967 = vmatprep.subr.bf16.mxu1 %v1908_v52 }
 0x38a   : > { %v1749_v26 = vpop.permute.xlu1 %1748  ;;  %v2052_v0 = vpop.permute.xlu0 %2051 }
 0x38b   : > { %v1766_v17 = vsub.f32 %v5070_v24, %v1749_v26 }
 0x38c   : > { %v5313_v19 = vpop.eup %4220  ;;  %3968 = vmatpush3.bf16.msra.mxu1 %v1908_v52 }
 0x38d   : > { %v1779_v25 = vmul.f32 1.442695, %v1766_v17  ;;  %4073 = vmatprep.subr.msk.bf16.mxu1 %vm803_vm1, %v2056_v15  ;;  %v1899_v20 = vpack.c.bf16 %v5313_v19, %v5310_v10  ;;  %v5318_v28 = vpop.eup %4222 }
 0x38e   : > { %v1759_v61 = vpop.permute.xlu1 %1758  ;;  %v675_v18 = vpop.permute.xlu0 %674 }
 0x38f   : > { %4228 = vpow2.f32 %v1779_v25  ;;  %v1768_v43 = vsub.f32 %v5068_v23, %v1759_v61  ;;  %698 = vst.msk [vmem:[#allocation2 + $0x44] sm:$0xf] %vm630_vm0, %v675_v18  ;;  %3969 = vmatprep.mubr.msk.bf16.mxu1 %vm1187_vm2, %v1899_v20  ;;  %v2079_v23 = vsel %vm803_vm1, %v2056_v15, 0 }
 0x390   : > { %v5323_v24 = vpop.eup %4224  ;;  %4230 = vpow2.f32 %v1781_v58 }
 0x391   : > { %v1900_v50 = vpack.c.bf16 %v5323_v24, %v5318_v28  ;;  %v1783_v32 = vmul.f32 1.442695, %v1768_v43 }
 0x392   : > { %v2054_v7 = vpop.permute.xlu1 %2053  ;;  %v679_v22 = vpop.permute.xlu0 %678 }
 0x393   : > { %4232 = vpow2.f32 %v1783_v32  ;;  %700 = vst.msk [vmem:[#allocation2 + $0x4c] sm:$0xf] %vm630_vm0, %v679_v22  ;;  %3970 = vmatmul.mubr.msk.bf16.vlgmr.msra.gmra.mxu1 %vm1187_vm2, %v1900_v50  ;;  %v2076_v17 = vsel %vm803_vm1, %v2054_v7, 0  ;;  %v2073_v32 = vsel %vm803_vm1, %v2052_v0, 0 }
 0x394   : > { %3978 = vmatpush3.bf16.xpose.msra.mxu1 %v2079_v23  ;;  %v5333_v26 = vpop.eup %4226 }
 0x395   : > { %4074 = vmatprep.subr.msk.bf16.mxu1 %vm803_vm1, %v2054_v7 }
 0x396   : > { %v673_v4 = vpop.permute.xlu1 %672  ;;  %v681_v52 = vpop.permute.xlu0 %680 }
 0x397   : > { %697 = vst.msk [vmem:[#allocation2 + $0x40] sm:$0xf] %vm630_vm0, %v673_v4  ;;  %701 = vst.msk [vmem:[#allocation2 + $0x50] sm:$0xf] %vm630_vm0, %v681_v52 }
 0x39a   : > { %v677_v33 = vpop.permute.xlu1 %676  ;;  %v685_v57 = vpop.permute.xlu0 %684 }
 0x39b   : > { %699 = vst.msk [vmem:[#allocation2 + $0x48] sm:$0xf] %vm630_vm0, %v677_v33  ;;  %703 = vst.msk [vmem:[#allocation2 + $0x58] sm:$0xf] %vm630_vm0, %v685_v57 }
 0x39c   : > { %v5338_v15 = vpop.eup %4228  ;;  %3980 = vmatpush3.bf16.xpose.msra.mxu1 %v2076_v17 }
 0x39d   : > { %4075 = vmatprep.subr.msk.bf16.mxu1 %vm803_vm1, %v2052_v0  ;;  %v1901_v25 = vpack.c.bf16 %v5338_v15, %v5333_v26  ;;  %v5343_v58 = vpop.eup %4230 }
 0x39e   : > { %v2050_v20 = vpop.permute.xlu1 %2049  ;;  %v4186_v50 = vld [vmem:[#allocation2 + $0x40] sm:$0xff]  }
 0x39f   : > { %3973 = vmatprep.mubr.msk.bf16.mxu1 %vm1187_vm2, %v1901_v25  ;;  %v2070_v22 = vsel %vm803_vm1, %v2050_v20, 0 }
 0x3a0   : > { %v5346_v61 = vpop.eup %4232 }
 0x3a1   : > { %6344 = vst [vmem:[#allocation29_spill] sm:$0xff] %v5346_v61  ;;  %v1902_v18 = vpack.c.bf16 %v5346_v61, %v5343_v58  ;;  %v5431_v61 = vld [vmem:[#allocation3 + $0x90] sm:$0xff] }
 0x3a2   : > { %v683_v43 = vpop.permute.xlu1 %682  ;;  %v4187_v23 = vld [vmem:[#allocation2 + $0x48] sm:$0xff]  }
 0x3a3   : > { %702 = vst.msk [vmem:[#allocation2 + $0x54] sm:$0xf] %vm630_vm0, %v683_v43  ;;  %3974 = vmatmul.mubr.msk.bf16.gmra.mxu1 %vm1187_vm2, %v1902_v18 }
 0x3a4   : > { %3982 = vmatpush3.bf16.xpose.msra.mxu1 %v2073_v32  ;;  %3985 = vmatprep.mubr.msk.bf16.mxu1 %vm803_vm1, %v4186_v50 }
 0x3a5   : > { %4076 = vmatprep.subr.msk.bf16.mxu1 %vm803_vm1, %v2050_v20 }
 0x3a6   : > { %v687_v7 = vpop.permute.xlu1 %686 }
 0x3a7   : > { %704 = vst.msk [vmem:[#allocation2 + $0x5c] sm:$0xf] %vm630_vm0, %v687_v7 }
 0x3aa   : > { %v4188_v4 = vld [vmem:[#allocation2 + $0x50] sm:$0xff]  }
 0x3ac   : > { %3984 = vmatpush3.bf16.xpose.msra.mxu1 %v2070_v22 }
 0x3ae   : > { %v4189_v52 = vld [vmem:[#allocation2 + $0x58] sm:$0xff]  }
 0x3b3   : > { %3986 = vmatmul.mubr.msk.bf16.vlgmr.msra.gmra.mxu1 %vm803_vm1, %v4187_v23 }
 0x3b4   : > { %3989 = vmatprep.mubr.msk.bf16.mxu1 %vm803_vm1, %v4188_v4 }
 0x3bb   : > { %3990 = vmatmul.mubr.msk.bf16.gmra.mxu1 %vm803_vm1, %v4189_v52 }
 0x3e4   : > { %v5360_v0 = vpop.f32.mrf.mxu1 }
 0x3e5   : > { %6345 = vst [vmem:[#allocation30_spill] sm:$0xff] %v5360_v0 }
 0x3e6   : > { %v5362_v33 = vpop.f32.mrf.mxu1 }
 0x3e7   : > { %6346 = vst [vmem:[#allocation31_spill] sm:$0xff] %v5362_v33  ;;  %v5429_v33 = vld [vmem:[#allocation3 + $0x88] sm:$0xff] }
 0x3e8   : > { %v5364_v57 = vpop.f32.mrf.mxu1  ;;  %6363 = vst [vmem:[#allocation48_spill] sm:$0xff] %v5429_v33 }
 0x3e9   : > { %6347 = vst [vmem:[#allocation32_spill] sm:$0xff] %v5364_v57 }
 0x3ea   : > { %v5366_v17 = vpop.f32.mrf.mxu1 }
 0x3eb   : > { %6348 = vst [vmem:[#allocation33_spill] sm:$0xff] %v5366_v17  ;;  %v5424_v17 = vld [vmem:[#allocation3 + $0x80] sm:$0xff] }
 0x3ec   : > { %6361 = vst [vmem:[#allocation46_spill] sm:$0xff] %v5424_v17 }
 0x3f2   : > { %v5368_v25 = vpop.f32.mrf.mxu1 }
 0x3f3   : > { %6349 = vst [vmem:[#allocation34_spill] sm:$0xff] %v5368_v25 }
 0x3f4   : > { %v5370_v20 = vpop.f32.mrf.mxu1 }
 0x3f5   : > { %6350 = vst [vmem:[#allocation35_spill] sm:$0xff] %v5370_v20 }
 0x3f6   : > { %v5372_v18 = vpop.f32.mrf.mxu1 }
 0x3f7   : > { %6351 = vst [vmem:[#allocation36_spill] sm:$0xff] %v5372_v18 }
 0x3f8   : > { %v5374_v43 = vpop.f32.mrf.mxu1 }
 0x3f9   : > { %6352 = vst [vmem:[#allocation37_spill] sm:$0xff] %v5374_v43 }
 0x453   : > { %v5376_v50 = vpop.f32.mrf.mxu1 }
 0x454   : > { %6353 = vst [vmem:[#allocation38_spill] sm:$0xff] %v5376_v50 }
 0x455   : > { %v5378_v32 = vpop.f32.mrf.mxu1 }
 0x456   : > { %6354 = vst [vmem:[#allocation39_spill] sm:$0xff] %v5378_v32 }
 0x457   : > { %v5380_v7 = vpop.f32.mrf.mxu1 }
 0x458   : > { %6355 = vst [vmem:[#allocation40_spill] sm:$0xff] %v5380_v7 }
 0x459   : > { %v5382_v22 = vpop.f32.mrf.mxu1 }
 0x45a   : > { %6356 = vst [vmem:[#allocation41_spill] sm:$0xff] %v5382_v22 }
 0x463   : > { %v5384_v23 = vpop.f32.mrf.mxu1 }
 0x464   : > { %6357 = vst [vmem:[#allocation42_spill] sm:$0xff] %v5384_v23 }
 0x465   : > { %v5386_v4 = vpop.f32.mrf.mxu1 }
 0x466   : > { %6358 = vst [vmem:[#allocation43_spill] sm:$0xff] %v5386_v4 }
 0x467   : > { %v5388_v52 = vpop.f32.mrf.mxu1 }
 0x468   : > { %6359 = vst [vmem:[#allocation44_spill] sm:$0xff] %v5388_v52 }
 0x469   : > { %v5390_v25 = vpop.f32.mrf.mxu1 }
 0x46a   : > { %6360 = vst [vmem:[#allocation45_spill] sm:$0xff] %v5390_v25 }
 0x473   : > { %v5392_v57 = vpop.f32.mrf.mxu1 }
 0x474   : > { %v2161_v23 = vsel %vm1187_vm2, %v5392_v57, -inf }
 0x475   : > { %v5394_v18 = vpop.f32.mrf.mxu1 }
 0x476   : > { %v2155_v50 = vsel %vm1187_vm2, %v5394_v18, -inf }
 0x477   : > { %2156 = vmax.xlane.f32.xlu0 %v2155_v50  ;;  %v5398_v32 = vpop.f32.mrf.mxu1 }
 0x478   : > { %v2164_v22 = vsel %vm1187_vm2, %v5398_v32, -inf }
 0x479   : > { %v5400_v7 = vpop.f32.mrf.mxu1 }
 0x47a   : > { %v2158_v52 = vsel %vm1187_vm2, %v5400_v7, -inf }
 0x47b   : > { %2162 = vmax.xlane.f32.xlu0 %v2161_v23  ;;  %2159 = vmax.xlane.f32.xlu1 %v2158_v52  ;;  %v5406_v4 = vpop.f32.mrf.mxu1 }
 0x47c   : > { %v2173_v23 = vsel %vm1187_vm2, %v5406_v4, -inf }
 0x47d   : > { %v5408_v25 = vpop.f32.mrf.mxu1 }
 0x47e   : > { %v2167_v50 = vsel %vm1187_vm2, %v5408_v25, -inf }
 0x47f   : > { %2165 = vmax.xlane.f32.xlu0 %v2164_v22  ;;  %2168 = vmax.xlane.f32.xlu1 %v2167_v50  ;;  %v5414_v43 = vpop.f32.mrf.mxu1 }
 0x480   : > { %v2176_v0 = vsel %vm1187_vm2, %v5414_v43, -inf }
 0x481   : > { %v5416_v20 = vpop.f32.mrf.mxu1 }
 0x482   : > { %v2170_v52 = vsel %vm1187_vm2, %v5416_v20, -inf }
 0x483   : > { %2174 = vmax.xlane.f32.xlu1 %v2173_v23  ;;  %2171 = vmax.xlane.f32.xlu0 %v2170_v52 }
 0x487   : > { %2177 = vmax.xlane.f32.xlu0 %v2176_v0 }
 0x500   : > { %v2157_v22 = vpop.xlane.xlu0 %2156 }
 0x501   : > { %v5427_v50 = vmax.f32 %v5424_v17, %v2157_v22 }
 0x503   : > { %6362 = vst [vmem:[#allocation47_spill] sm:$0xff] %v5427_v50  ;;  %2498 = vst.msk [vmem:[#allocation3 + $0x80] sm:$0xff] %vm738_vm3, %v5427_v50  ;;  %2213 = vperm.xlu1 %4144, %v5427_v50  }
 0x504   : > { %v2160_v23 = vpop.xlane.xlu1 %2159  ;;  %v2163_v0 = vpop.xlane.xlu0 %2162 }
 0x505   : > { %v5439_v52 = vmax.f32 %v5429_v33, %v2160_v23  ;;  %v5442_v22 = vmax.f32 %v5431_v61, %v2163_v0  ;;  %v5464_v33 = vld [vmem:[#allocation3 + $0xb0] sm:$0xff] }
 0x507   : > { %6364 = vst [vmem:[#allocation49_spill] sm:$0xff] %v5439_v52  ;;  %6365 = vst [vmem:[#allocation50_spill] sm:$0xff] %v5442_v22  ;;  %2218 = vperm.xlu0 %4145, %v5439_v52   ;;  %2223 = vperm.xlu1 %4144, %v5442_v22  }
 0x508   : > { %2499 = vst.msk [vmem:[#allocation3 + $0x88] sm:$0xff] %vm738_vm3, %v5439_v52  ;;  %2500 = vst.msk [vmem:[#allocation3 + $0x90] sm:$0xff] %vm738_vm3, %v5442_v22  ;;  %v2169_v23 = vpop.xlane.xlu1 %2168  ;;  %v2166_v0 = vpop.xlane.xlu0 %2165  ;;  %v1313_v52 = vld [vmem:[#allocation4 + $0x28] sm:$0xff] }
 0x509   : > { %v5459_v17 = vmax.f32 %v5444_v49, %v2169_v23  ;;  %v5462_v16 = vmax.f32 %v5446_v1, %v2166_v0  ;;  %v5485_v49 = vld [vmem:[#allocation3 + $0xb8] sm:$0xff] }
 0x50b   : > { %2502 = vst.msk [vmem:[#allocation3 + $0xa0] sm:$0xff] %vm738_vm3, %v5459_v17  ;;  %2501 = vst.msk [vmem:[#allocation3 + $0x98] sm:$0xff] %vm738_vm3, %v5462_v16  ;;  %2399 = vrot.lane.b32.xlu0 %v4779_v9, %s4476_s12  ;;  %2228 = vperm.xlu1 %4144, %v5462_v16  }
 0x50c   : > { %v2175_v23 = vpop.xlane.xlu1 %2174  ;;  %v2172_v0 = vpop.xlane.xlu0 %2171 }
 0x50d   : > { %v5480_v22 = vmax.f32 %v5464_v33, %v2175_v23  ;;  %v5483_v50 = vmax.f32 %v5466_v13, %v2172_v0 }
 0x50f   : > { %2504 = vst.msk [vmem:[#allocation3 + $0xb0] sm:$0xff] %vm738_vm3, %v5480_v22  ;;  %2503 = vst.msk [vmem:[#allocation3 + $0xa8] sm:$0xff] %vm738_vm3, %v5483_v50  ;;  %2395 = vrot.lane.b32.xlu0 %v4800_v12, %s4476_s12  ;;  %2397 = vrot.lane.b32.xlu1 %v4789_v11, %s4476_s12 }
 0x510   : > { %v2178_v23 = vpop.xlane.xlu0 %2177 }
 0x511   : > { %v5500_v0 = vmax.f32 %v5485_v49, %v2178_v23 }
 0x513   : > { %2505 = vst.msk [vmem:[#allocation3 + $0xb8] sm:$0xff] %vm738_vm3, %v5500_v0  ;;  %2243 = vperm.xlu0 %4145, %v5480_v22   ;;  %2393 = vrot.lane.b32.xlu1 %v4810_v14, %s4476_s12 }
 0x517   : > { %2233 = vperm.xlu0 %4145, %v5459_v17   ;;  %2238 = vperm.xlu1 %4144, %v5483_v50  }
 0x51b   : > { %2541 = vrot.lane.b32.xlu0 %v4775_v6, %s4477_s25  ;;  %2248 = vperm.xlu1 %4144, %v5500_v0  }
 0x51f   : > { %2537 = vrot.lane.b32.xlu0 %v4740_v46, %s4477_s25  ;;  %2539 = vrot.lane.b32.xlu1 %v4777_v8, %s4477_s25  ;;  %v1327_v46 = vsel %vm1187_vm2, %v5274_v53, 0.0 }
 0x523   : > { %707 = vrot.lane.b32.xlu0 %v4744_v47, %s4477_s25  ;;  %705 = vrot.lane.b32.xlu1 %v4734_v2, %s4477_s25  ;;  %v1330_v2 = vsel %vm1187_vm2, %v5276_v29, 0.0  ;;  %v1336_v47 = vsel %vm1187_vm2, %v5290_v44, 0.0 }
 0x527   : > { %711 = vrot.lane.b32.xlu0 %v4738_v42, %s4477_s25  ;;  %709 = vrot.lane.b32.xlu1 %v4730_v36, %s4477_s25  ;;  %v1324_v36 = vsel %vm1187_vm2, %v5266_v63, 0.0  ;;  %v1333_v42 = vsel %vm1187_vm2, %v5268_v21, 0.0 }
 0x52b   : > { %713 = vrot.lane.b32.xlu0 %v4754_v55, %s4477_s25  ;;  %2535 = vrot.lane.b32.xlu1 %v4771_v3, %s4477_s25 }
 0x52f   : > { %717 = vrot.lane.b32.xlu0 %v4750_v51, %s4477_s25  ;;  %715 = vrot.lane.b32.xlu1 %v4764_v62, %s4477_s25 }
 0x533   : > { %2885 = vrot.lane.b32.xlu0 %v4779_v9, %s4477_s25  ;;  %719 = vrot.lane.b32.xlu1 %v4760_v59, %s4477_s25 }
 0x537   : > { %2881 = vrot.lane.b32.xlu0 %v4800_v12, %s4477_s25  ;;  %2883 = vrot.lane.b32.xlu1 %v4789_v11, %s4477_s25 }
 0x53b   : > { %2879 = vrot.lane.b32.xlu1 %v4810_v14, %s4477_s25 }
 0x556   : > { %1325 = vadd.xlane.f32.xlu0 %v1324_v36 }
 0x55a   : > { %1331 = vadd.xlane.f32.xlu0 %v1330_v2 }
 0x55e   : > { %1334 = vadd.xlane.f32.xlu0 %v1333_v42 }
 0x55f   : > { %1328 = vadd.xlane.f32.xlu1 %v1327_v46 }
 0x563   : > { %1337 = vadd.xlane.f32.xlu1 %v1336_v47 }
 0x57e   : > { %v2214_v51 = vpop.permute.xlu1 %2213 }
 0x57f   : > { %v2251_v55 = vsub.f32 %v5394_v18, %v2214_v51 }
 0x581   : > { %v2259_v3 = vmul.f32 1.442695, %v2251_v55 }
 0x582   : > { %v2224_v59 = vpop.permute.xlu1 %2223  ;;  %v2219_v62 = vpop.permute.xlu0 %2218 }
 0x583   : > { %v2253_v6 = vsub.f32 %v5392_v57, %v2224_v59  ;;  %v2252_v8 = vsub.f32 %v5400_v7, %v2219_v62  ;;  %4234 = vpow2.f32 %v2259_v3 }
 0x585   : > { %v2261_v9 = vmul.f32 1.442695, %v2252_v8  ;;  %v2263_v11 = vmul.f32 1.442695, %v2253_v6 }
 0x586   : > { %v2229_v12 = vpop.permute.xlu1 %2228  ;;  %v2400_v14 = vpop.permute.xlu0 %2399 }
 0x587   : > { %v2254_v63 = vsub.f32 %v5398_v32, %v2229_v12  ;;  %3993 = vmatprep.subr.bf16.mxu0 %v2400_v14  ;;  %4236 = vpow2.f32 %v2261_v9 }
 0x588   : > { %3994 = vmatpush3.bf16.msra.mxu0 %v2400_v14  ;;  %4238 = vpow2.f32 %v2263_v11 }
 0x589   : > { %v2265_v21 = vmul.f32 1.442695, %v2254_v63 }
 0x58a   : > { %v2398_v53 = vpop.permute.xlu1 %2397  ;;  %v2396_v29 = vpop.permute.xlu0 %2395 }
 0x58b   : > { %4240 = vpow2.f32 %v2265_v21  ;;  %3995 = vmatprep.subr.bf16.mxu0 %v2398_v53 }
 0x58c   : > { %3996 = vmatpush3.bf16.msra.mxu0 %v2398_v53 }
 0x58d   : > { %3997 = vmatprep.subr.bf16.mxu0 %v2396_v29 }
 0x58e   : > { %v2394_v44 = vpop.permute.xlu1 %2393  ;;  %v2244_v57 = vpop.permute.xlu0 %2243 }
 0x58f   : > { %v2257_v18 = vsub.f32 %v5406_v4, %v2244_v57 }
 0x590   : > { %3998 = vmatpush3.bf16.msra.mxu0 %v2396_v29  ;;  %v5561_v2 = vpop.eup %4234 }
 0x591   : > { %3999 = vmatprep.subr.bf16.mxu0 %v2394_v44  ;;  %v2271_v51 = vmul.f32 1.442695, %v2257_v18 }
 0x592   : > { %v2239_v7 = vpop.permute.xlu1 %2238  ;;  %v2234_v23 = vpop.permute.xlu0 %2233 }
 0x593   : > { %v2256_v32 = vsub.f32 %v5416_v20, %v2239_v7  ;;  %v2255_v36 = vsub.f32 %v5408_v25, %v2234_v23 }
 0x594   : > { %4000 = vmatpush3.bf16.msra.mxu0 %v2394_v44  ;;  %v5563_v42 = vpop.eup %4236 }
 0x595   : > { %v2269_v46 = vmul.f32 1.442695, %v2256_v32  ;;  %v2267_v47 = vmul.f32 1.442695, %v2255_v36  ;;  %v2389_v62 = vpack.c.bf16 %v5563_v42, %v5561_v2  ;;  %v5567_v4 = vpop.eup %4238 }
 0x596   : > { %v2249_v55 = vpop.permute.xlu1 %2248  ;;  %v2542_v59 = vpop.permute.xlu0 %2541 }
 0x597   : > { %4242 = vpow2.f32 %v2269_v46  ;;  %v2258_v20 = vsub.f32 %v5414_v43, %v2249_v55  ;;  %4077 = vmatprep.subr.msk.bf16.mxu0 %vm803_vm1, %v2542_v59  ;;  %4001 = vmatprep.mubr.msk.bf16.mxu0 %vm1187_vm2, %v2389_v62  ;;  %v2565_v11 = vsel %vm803_vm1, %v2542_v59, 0 }
 0x598   : > { %v5571_v25 = vpop.eup %4240  ;;  %4244 = vpow2.f32 %v2267_v47 }
 0x599   : > { %v2390_v3 = vpack.c.bf16 %v5571_v25, %v5567_v4  ;;  %v2273_v6 = vmul.f32 1.442695, %v2258_v20  ;;  %4246 = vpow2.f32 %v2271_v51 }
 0x59a   : > { %v2540_v8 = vpop.permute.xlu1 %2539  ;;  %v2538_v9 = vpop.permute.xlu0 %2537 }
 0x59b   : > { %4248 = vpow2.f32 %v2273_v6  ;;  %4002 = vmatmul.mubr.msk.bf16.vlgmr.msra.gmra.mxu0 %vm1187_vm2, %v2390_v3  ;;  %v2562_v21 = vsel %vm803_vm1, %v2540_v8, 0  ;;  %v2559_v51 = vsel %vm803_vm1, %v2538_v9, 0 }
 0x59c   : > { %4010 = vmatpush3.bf16.xpose.msra.mxu0 %v2565_v11 }
 0x59d   : > { %4078 = vmatprep.subr.msk.bf16.mxu0 %vm803_vm1, %v2540_v8 }
 0x59e   : > { %v706_v43 = vpop.permute.xlu1 %705  ;;  %v708_v12 = vpop.permute.xlu0 %707 }
 0x59f   : > { %730 = vst.msk [vmem:[#allocation2 + $0x60] sm:$0xf] %vm630_vm0, %v706_v43  ;;  %731 = vst.msk [vmem:[#allocation2 + $0x64] sm:$0xf] %vm630_vm0, %v708_v12  ;;  %v6368_v43 = vsub.f32 %v5081_v31, %v5090_v35  ;;  %v6372_v31 = vsub.f32 %v5119_v56, %v5128_v5  ;;  %v1311_v56 = vld [vmem:[#allocation4 + $0x18] sm:$0xff] }
 0x5a1   : > { %v1228_v12 = vmul.f32 1.442695, %v6368_v43  ;;  %v1236_v35 = vmul.f32 1.442695, %v6372_v31 }
 0x5a2   : > { %v710_v14 = vpop.permute.xlu1 %709  ;;  %v712_v63 = vpop.permute.xlu0 %711 }
 0x5a3   : > { %732 = vst.msk [vmem:[#allocation2 + $0x68] sm:$0xf] %vm630_vm0, %v710_v14  ;;  %733 = vst.msk [vmem:[#allocation2 + $0x6c] sm:$0xf] %vm630_vm0, %v712_v63  ;;  %v6369_v14 = vsub.f32 %v5076_v27, %v5079_v30  ;;  %4250 = vpow2.f32 %v1228_v12  ;;  %v1308_v27 = vld [vmem:[#allocation4] sm:$0xff] }
 0x5a4   : > { %v5584_v53 = vpop.eup %4242  ;;  %4012 = vmatpush3.bf16.xpose.msra.mxu0 %v2562_v21  ;;  %v6370_v21 = vsub.f32 %v5092_v37, %v5109_v48  ;;  %v1310_v48 = vld [vmem:[#allocation4 + $0x10] sm:$0xff] }
 0x5a5   : > { %v5586_v29 = vpop.eup %4244  ;;  %4079 = vmatprep.subr.msk.bf16.mxu0 %vm803_vm1, %v2538_v9  ;;  %v1232_v63 = vmul.f32 1.442695, %v6369_v14 }
 0x5a6   : > { %v2536_v44 = vpop.permute.xlu1 %2535  ;;  %v714_v57 = vpop.permute.xlu0 %713  ;;  %v2391_v18 = vpack.c.bf16 %v5584_v53, %v5586_v29  ;;  %v4190_v47 = vld [vmem:[#allocation2 + $0x60] sm:$0xff]  }
 0x5a7   : > { %v5591_v7 = vpop.eup %4246  ;;  %734 = vst.msk [vmem:[#allocation2 + $0x70] sm:$0xf] %vm630_vm0, %v714_v57  ;;  %v2556_v20 = vsel %vm803_vm1, %v2536_v44, 0  ;;  %4252 = vpow2.f32 %v1232_v63  ;;  %v6371_v57 = vsub.f32 %v5087_v34, %v5099_v39 }
 0x5a8   : > { %v5594_v23 = vpop.eup %4248  ;;  %4005 = vmatprep.mubr.msk.bf16.mxu0 %vm1187_vm2, %v2391_v18 }
 0x5a9   : > { %v2392_v32 = vpack.c.bf16 %v5594_v23, %v5591_v7  ;;  %v1230_v18 = vmul.f32 1.442695, %v6371_v57 }
 0x5aa   : > { %v716_v36 = vpop.permute.xlu1 %715  ;;  %v718_v46 = vpop.permute.xlu0 %717  ;;  %v4191_v8 = vld [vmem:[#allocation2 + $0x68] sm:$0xff]  }
 0x5ab   : > { %735 = vst.msk [vmem:[#allocation2 + $0x74] sm:$0xf] %vm630_vm0, %v716_v36  ;;  %736 = vst.msk [vmem:[#allocation2 + $0x78] sm:$0xf] %vm630_vm0, %v718_v46  ;;  %4006 = vmatmul.mubr.msk.bf16.gmra.mxu0 %vm1187_vm2, %v2392_v32 }
 0x5ac   : > { %4014 = vmatpush3.bf16.xpose.msra.mxu0 %v2559_v51  ;;  %4017 = vmatprep.mubr.msk.bf16.mxu0 %vm803_vm1, %v4190_v47 }
 0x5ad   : > { %4080 = vmatprep.subr.msk.bf16.mxu0 %vm803_vm1, %v2536_v44  ;;  %v1234_v44 = vmul.f32 1.442695, %v6370_v21 }
 0x5ae   : > { %v720_v55 = vpop.permute.xlu1 %719  ;;  %v2886_v59 = vpop.permute.xlu0 %2885 }
 0x5af   : > { %737 = vst.msk [vmem:[#allocation2 + $0x7c] sm:$0xf] %vm630_vm0, %v720_v55  ;;  %4025 = vmatprep.subr.bf16.mxu1 %v2886_v59  ;;  %4254 = vpow2.f32 %v1234_v44  ;;  %v1309_v55 = vld [vmem:[#allocation4 + $0x8] sm:$0xff] }
 0x5b0   : > { %4026 = vmatpush3.bf16.msra.mxu1 %v2886_v59  ;;  %4256 = vpow2.f32 %v1230_v18  ;;  %v5625_v32 = vpop.eup %4250 }
 0x5b1   : > { %4258 = vpow2.f32 %v1236_v35  ;;  %v1316_v30 = vmul.f32 %v5625_v32, %v1308_v27 }
 0x5b2   : > { %v2884_v62 = vpop.permute.xlu1 %2883  ;;  %v2882_v3 = vpop.permute.xlu0 %2881  ;;  %v4192_v9 = vld [vmem:[#allocation2 + $0x70] sm:$0xff]  }
 0x5b3   : > { %4027 = vmatprep.subr.bf16.mxu1 %v2884_v62 }
 0x5b4   : > { %4016 = vmatpush3.bf16.xpose.msra.mxu0 %v2556_v20  ;;  %4028 = vmatpush3.bf16.msra.mxu1 %v2884_v62  ;;  %v5628_v36 = vpop.eup %4252 }
 0x5b5   : > { %4029 = vmatprep.subr.bf16.mxu1 %v2882_v3  ;;  %v1318_v34 = vmul.f32 %v5628_v36, %v1310_v48 }
 0x5b6   : > { %v2880_v6 = vpop.permute.xlu1 %2879  ;;  %v4193_v11 = vld [vmem:[#allocation2 + $0x78] sm:$0xff]  }
 0x5b8   : > { %4030 = vmatpush3.bf16.msra.mxu1 %v2882_v3 }
 0x5b9   : > { %4031 = vmatprep.subr.bf16.mxu1 %v2880_v6 }
 0x5bb   : > { %4018 = vmatmul.mubr.msk.bf16.vlgmr.msra.gmra.mxu0 %vm803_vm1, %v4191_v8 }
 0x5bc   : > { %4021 = vmatprep.mubr.msk.bf16.mxu0 %vm803_vm1, %v4192_v9  ;;  %4032 = vmatpush3.bf16.msra.mxu1 %v2880_v6  ;;  %v5632_v39 = vpop.eup %4254  ;;  %v1312_v9 = vld [vmem:[#allocation4 + $0x20] sm:$0xff] }
 0x5bd   : > { %v5634_v5 = vpop.eup %4256  ;;  %v1319_v59 = vmul.f32 %v5632_v39, %v1311_v56 }
 0x5be   : > { %v1317_v20 = vmul.f32 %v5634_v5, %v1309_v55  ;;  %v5639_v3 = vpop.eup %4258 }
 0x5bf   : > { %v1320_v43 = vmul.f32 %v5639_v3, %v1312_v9 }
 0x5c3   : > { %4022 = vmatmul.mubr.msk.bf16.gmra.mxu0 %vm803_vm1, %v4193_v11 }
 0x5df   : > { %v1326_v37 = vpop.xlane.xlu0 %1325 }
 0x5e0   : > { %v1348_v46 = vadd.f32 %v1326_v37, %v1316_v30 }
 0x5e2   : > { %1357 = vst.msk [vmem:[#allocation4] sm:$0xff] %vm738_vm3, %v1348_v46 }
 0x5e3   : > { %v1332_v47 = vpop.xlane.xlu0 %1331 }
 0x5e4   : > { %v1350_v51 = vadd.f32 %v1332_v47, %v1318_v34 }
 0x5e6   : > { %1359 = vst.msk [vmem:[#allocation4 + $0x10] sm:$0xff] %vm738_vm3, %v1350_v51 }
 0x5e7   : > { %v1335_v62 = vpop.xlane.xlu0 %1334 }
 0x5e8   : > { %v1351_v6 = vadd.f32 %v1335_v62, %v1319_v59  ;;  %v1329_v8 = vpop.xlane.xlu1 %1328 }
 0x5e9   : > { %v1349_v11 = vadd.f32 %v1329_v8, %v1317_v20 }
 0x5ea   : > { %1360 = vst.msk [vmem:[#allocation4 + $0x18] sm:$0xff] %vm738_vm3, %v1351_v6 }
 0x5eb   : > { %1358 = vst.msk [vmem:[#allocation4 + $0x8] sm:$0xff] %vm738_vm3, %v1349_v11 }
 0x5ec   : > { %v1338_v12 = vpop.xlane.xlu1 %1337 }
 0x5ed   : > { %v1352_v14 = vadd.f32 %v1338_v12, %v1320_v43  ;;  %v1342_v43 = vsel %vm1187_vm2, %v5296_v45, 0.0  ;;  %v1339_v12 = vsel %vm1187_vm2, %v5294_v41, 0.0  ;;  %v1802_v45 = vsel %vm1187_vm2, %v5310_v10, 0.0 }
 0x5ee   : > { %v2298_v41 = vsel %vm1187_vm2, %v5567_v4, 0.0  ;;  %v1820_v10 = vsel %vm1187_vm2, %v5343_v58, 0.0  ;;  %v2295_v4 = vsel %vm1187_vm2, %v5563_v42, 0.0  ;;  %v6380_v58 = vsub.f32 %v5102_v40, %v5116_v54  ;;  %v6386_v40 = vld [vmem:[#allocation11_spill] sm:$0xff]  ;;  %v6387_v54 = vld [vmem:[#allocation12_spill] sm:$0xff] }
 0x5ef   : > { %1361 = vst.msk [vmem:[#allocation4 + $0x20] sm:$0xff] %vm738_vm3, %v1352_v14  ;;  %v1805_v14 = vsel %vm1187_vm2, %v5313_v19, 0.0  ;;  %v1808_v19 = vsel %vm1187_vm2, %v5318_v28, 0.0  ;;  %v2304_v28 = vsel %vm1187_vm2, %v5586_v29, 0.0 }
 0x65b   : > { %v5645_v63 = vpop.f32.mrf.mxu0 }
 0x65c   : > { %6373 = vst [vmem:[#allocation53_spill] sm:$0xff] %v5645_v63 }
 0x65d   : > { %v5647_v21 = vpop.f32.mrf.mxu0 }
 0x65e   : > { %6374 = vst [vmem:[#allocation54_spill] sm:$0xff] %v5647_v21 }
 0x65f   : > { %v5649_v44 = vpop.f32.mrf.mxu0 }
 0x660   : > { %6375 = vst [vmem:[#allocation55_spill] sm:$0xff] %v5649_v44 }
 0x661   : > { %v5651_v57 = vpop.f32.mrf.mxu0 }
 0x66b   : > { %v5653_v18 = vpop.f32.mrf.mxu0 }
 0x66c   : > { %6376 = vst [vmem:[#allocation56_spill] sm:$0xff] %v5653_v18 }
 0x66d   : > { %v5655_v31 = vpop.f32.mrf.mxu0 }
 0x66e   : > { %6377 = vst [vmem:[#allocation57_spill] sm:$0xff] %v5655_v31 }
 0x66f   : > { %v5657_v35 = vpop.f32.mrf.mxu0 }
 0x670   : > { %6378 = vst [vmem:[#allocation58_spill] sm:$0xff] %v5657_v35  ;;  %v1315_v35 = vld [vmem:[#allocation4 + $0x38] sm:$0xff] }
 0x671   : > { %v5659_v27 = vpop.f32.mrf.mxu0 }
 0x672   : > { %6379 = vst [vmem:[#allocation59_spill] sm:$0xff] %v5659_v27 }
 0x67b   : > { %v5661_v30 = vpop.f32.mrf.mxu0 }
 0x67c   : > { %v2647_v37 = vsel %vm1187_vm2, %v5661_v30, -inf }
 0x67d   : > { %2648 = vmax.xlane.f32.xlu0 %v2647_v37  ;;  %v5665_v48 = vpop.f32.mrf.mxu0  ;;  %v1345_v37 = vsel %vm1187_vm2, %v5292_v38, 0.0  ;;  %v1814_v38 = vsel %vm1187_vm2, %v5333_v26, 0.0  ;;  %v2301_v26 = vsel %vm1187_vm2, %v5571_v25, 0.0 }
 0x67e   : > { %v2641_v34 = vsel %vm1187_vm2, %v5665_v48, -inf }
 0x67f   : > { %v5667_v46 = vpop.f32.mrf.mxu0 }
 0x680   : > { %v2650_v55 = vsel %vm1187_vm2, %v5667_v46, -inf }
 0x681   : > { %2642 = vmax.xlane.f32.xlu0 %v2641_v34  ;;  %v5671_v47 = vpop.f32.mrf.mxu0  ;;  %v2292_v34 = vsel %vm1187_vm2, %v5561_v2, 0.0  ;;  %v1811_v2 = vsel %vm1187_vm2, %v5323_v24, 0.0  ;;  %v1817_v24 = vsel %vm1187_vm2, %v5338_v15, 0.0  ;;  %v5737_v15 = vld [vmem:[#allocation3 + $0xc0] sm:$0xff] }
 0x682   : > { %v2644_v56 = vsel %vm1187_vm2, %v5671_v47, -inf }
 0x683   : > { %2645 = vmax.xlane.f32.xlu1 %v2644_v56  ;;  %v5675_v51 = vpop.f32.mrf.mxu0  ;;  %v1240_v56 = vmul.f32 1.442695, %v6380_v58 }
 0x684   : > { %v2659_v62 = vsel %vm1187_vm2, %v5675_v51, -inf }
 0x685   : > { %2651 = vmax.xlane.f32.xlu0 %v2650_v55  ;;  %v5679_v59 = vpop.f32.mrf.mxu0  ;;  %v6381_v55 = vld [vmem:[#allocation10_spill] sm:$0xff]  ;;  %4260 = vpow2.f32 %v1240_v56 }
 0x686   : > { %v2653_v9 = vsel %vm1187_vm2, %v5679_v59, -inf  ;;  %v6382_v42 = vsub.f32 %v5121_v60, %v6381_v55  ;;  %v6411_v60 = vld [vmem:[#allocation21_spill] sm:$0xff] }
 0x687   : > { %2660 = vmax.xlane.f32.xlu1 %v2659_v62  ;;  %v5683_v20 = vpop.f32.mrf.mxu0 }
 0x688   : > { %v2662_v6 = vsel %vm1187_vm2, %v5683_v20, -inf  ;;  %v1238_v62 = vmul.f32 1.442695, %v6382_v42 }
 0x689   : > { %2663 = vmax.xlane.f32.xlu0 %v2662_v6  ;;  %v5687_v8 = vpop.f32.mrf.mxu0  ;;  %v5729_v6 = vld [vmem:[#allocation3 + $0xd0] sm:$0xff] }
 0x68a   : > { %v2656_v11 = vsel %vm1187_vm2, %v5687_v8, -inf  ;;  %4262 = vpow2.f32 %v1238_v62 }
 0x68b   : > { %2654 = vmax.xlane.f32.xlu1 %v2653_v9  ;;  %v6383_v9 = vld [vmem:[#allocation16_spill] sm:$0xff] }
 0x68d   : > { %2657 = vmax.xlane.f32.xlu0 %v2656_v11  ;;  %v6384_v11 = vld [vmem:[#allocation19_spill] sm:$0xff] }
 0x68e   : > { %v6385_v25 = vsub.f32 %v6383_v9, %v6384_v11  ;;  %v6396_v9 = vld [vmem:[#allocation50_spill] sm:$0xff] }
 0x68f   : > { %1343 = vadd.xlane.f32.xlu1 %v1342_v43  ;;  %v6397_v11 = vsub.f32 %v5431_v61, %v6396_v9  ;;  %v1787_v61 = vld [vmem:[#allocation4 + $0x48] sm:$0xff] }
 0x690   : > { %v1707_v43 = vmul.f32 1.442695, %v6385_v25 }
 0x691   : > { %1340 = vadd.xlane.f32.xlu0 %v1339_v12  ;;  %v2199_v25 = vmul.f32 1.442695, %v6397_v11 }
 0x692   : > { %4264 = vpow2.f32 %v1707_v43 }
 0x693   : > { %1806 = vadd.xlane.f32.xlu1 %v1805_v14  ;;  %v6388_v14 = vsub.f32 %v6386_v40, %v6387_v54 }
 0x695   : > { %1346 = vadd.xlane.f32.xlu0 %v1345_v37  ;;  %v1242_v37 = vmul.f32 1.442695, %v6388_v14  ;;  %v5780_v14 = vld [vmem:[#allocation3 + $0xf8] sm:$0xff] }
 0x696   : > { %6398 = vst [vmem:[#allocation16_spill] sm:$0xff] %v5780_v14 }
 0x697   : > { %2293 = vadd.xlane.f32.xlu1 %v2292_v34  ;;  %4266 = vpow2.f32 %v1242_v37  ;;  %v6399_v37 = vld [vmem:[#allocation13_spill] sm:$0xff] }
 0x699   : > { %1803 = vadd.xlane.f32.xlu0 %v1802_v45  ;;  %v5746_v45 = vld [vmem:[#allocation3 + $0xc8] sm:$0xff] }
 0x69b   : > { %2299 = vadd.xlane.f32.xlu1 %v2298_v41  ;;  %v6389_v41 = vld [vmem:[#allocation46_spill] sm:$0xff] }
 0x69d   : > { %1809 = vadd.xlane.f32.xlu0 %v1808_v19  ;;  %v6390_v19 = vld [vmem:[#allocation47_spill] sm:$0xff] }
 0x69f   : > { %1815 = vadd.xlane.f32.xlu1 %v1814_v38  ;;  %v6391_v38 = vsub.f32 %v6389_v41, %v6390_v19 }
 0x6a1   : > { %1812 = vadd.xlane.f32.xlu0 %v1811_v2  ;;  %v2195_v2 = vmul.f32 1.442695, %v6391_v38 }
 0x6a3   : > { %1821 = vadd.xlane.f32.xlu1 %v1820_v10  ;;  %4268 = vpow2.f32 %v2195_v2 }
 0x6a5   : > { %2296 = vadd.xlane.f32.xlu0 %v2295_v4 }
 0x6a7   : > { %2305 = vadd.xlane.f32.xlu1 %v2304_v28  ;;  %v5754_v28 = vld [vmem:[#allocation3 + $0xd8] sm:$0xff] }
 0x6a9   : > { %2302 = vadd.xlane.f32.xlu0 %v2301_v26  ;;  %v6392_v26 = vld [vmem:[#allocation15_spill] sm:$0xff] }
 0x6ad   : > { %1818 = vadd.xlane.f32.xlu0 %v1817_v24  ;;  %v6393_v24 = vld [vmem:[#allocation17_spill] sm:$0xff] }
 0x6ae   : > { %v6394_v58 = vsub.f32 %v6392_v26, %v6393_v24  ;;  %v5795_v26 = vpop.eup %4260  ;;  %v6403_v24 = vld [vmem:[#allocation22_spill] sm:$0xff] }
 0x6b0   : > { %v1705_v56 = vmul.f32 1.442695, %v6394_v58  ;;  %v6404_v58 = vld [vmem:[#allocation25_spill] sm:$0xff] }
 0x6b2   : > { %4270 = vpow2.f32 %v1705_v56 }
 0x6b3   : > { %4272 = vpow2.f32 %v2199_v25  ;;  %v6408_v25 = vld [vmem:[#allocation23_spill] sm:$0xff] }
 0x706   : > { %v2649_v29 = vpop.xlane.xlu0 %2648 }
 0x707   : > { %v5735_v12 = vmax.f32 %v5729_v6, %v2649_v29  ;;  %v5767_v29 = vld [vmem:[#allocation3 + $0xf0] sm:$0xff] }
 0x708   : > { %6395 = vst [vmem:[#allocation10_spill] sm:$0xff] %v5767_v29 }
 0x709   : > { %2986 = vst.msk [vmem:[#allocation3 + $0xd0] sm:$0xff] %vm738_vm3, %v5735_v12 }
 0x70a   : > { %v2643_v34 = vpop.xlane.xlu0 %2642 }
 0x70b   : > { %v5752_v10 = vmax.f32 %v5737_v15, %v2643_v34  ;;  %v6400_v34 = vld [vmem:[#allocation14_spill] sm:$0xff] }
 0x70c   : > { %v2646_v4 = vpop.xlane.xlu1 %2645  ;;  %v6401_v41 = vsub.f32 %v6399_v37, %v6400_v34  ;;  %v5808_v34 = vld [vmem:[#allocation3 + $0xe8] sm:$0xff] }
 0x70d   : > { %2984 = vst.msk [vmem:[#allocation3 + $0xc0] sm:$0xff] %vm738_vm3, %v5752_v10  ;;  %v5764_v42 = vmax.f32 %v5746_v45, %v2646_v4  ;;  %2699 = vperm.xlu1 %4144, %v5752_v10   ;;  %v5793_v4 = vld [vmem:[#allocation3 + $0xe0] sm:$0xff] }
 0x70e   : > { %v2652_v62 = vpop.xlane.xlu0 %2651  ;;  %v1709_v19 = vmul.f32 1.442695, %v6401_v41  ;;  %v5810_v41 = vpop.eup %4262 }
 0x70f   : > { %2985 = vst.msk [vmem:[#allocation3 + $0xc8] sm:$0xff] %vm738_vm3, %v5764_v42  ;;  %v5777_v40 = vmax.f32 %v5754_v28, %v2652_v62  ;;  %2704 = vperm.xlu0 %4145, %v5764_v42   ;;  %v6405_v62 = vsub.f32 %v6403_v24, %v6404_v58  ;;  %v6407_v24 = vld [vmem:[#allocation20_spill] sm:$0xff] }
 0x710   : > { %v2661_v54 = vpop.xlane.xlu1 %2660  ;;  %4274 = vpow2.f32 %v1709_v19  ;;  %v6409_v58 = vsub.f32 %v6407_v24, %v6408_v25  ;;  %v6410_v19 = vld [vmem:[#allocation18_spill] sm:$0xff] }
 0x711   : > { %2987 = vst.msk [vmem:[#allocation3 + $0xd8] sm:$0xff] %vm738_vm3, %v5777_v40  ;;  %v5790_v38 = vmax.f32 %v5767_v29, %v2661_v54  ;;  %2709 = vperm.xlu1 %4144, %v5735_v12   ;;  %v1713_v56 = vmul.f32 1.442695, %v6405_v62  ;;  %v1314_v54 = vld [vmem:[#allocation4 + $0x30] sm:$0xff]  ;;  %v6412_v43 = vsub.f32 %v6410_v19, %v6411_v60 }
 0x712   : > { %v2664_v2 = vpop.xlane.xlu0 %2663  ;;  %v1711_v62 = vmul.f32 1.442695, %v6409_v58  ;;  %v1322_v55 = vmul.f32 %v5795_v26, %v1314_v54  ;;  %v5835_v58 = vpop.eup %4264  ;;  %v1321_v54 = vmul.f32 %v5810_v41, %v1313_v52  ;;  %v6413_v60 = vld [vmem:[#allocation48_spill] sm:$0xff]  ;;  %v6417_v52 = vld [vmem:[#allocation51_spill] sm:$0xff] }
 0x713   : > { %6402 = vst [vmem:[#allocation19_spill] sm:$0xff] %v5790_v38  ;;  %2990 = vst.msk [vmem:[#allocation3 + $0xf0] sm:$0xff] %vm738_vm3, %v5790_v38  ;;  %v5805_v11 = vmax.f32 %v5780_v14, %v2664_v2  ;;  %2729 = vperm.xlu0 %4145, %v5790_v38   ;;  %v1717_v24 = vmul.f32 1.442695, %v6412_v43  ;;  %4276 = vpow2.f32 %v1713_v56  ;;  %v6414_v43 = vld [vmem:[#allocation49_spill] sm:$0xff]  ;;  %v5846_v18 = vpop.eup %4266 }
 0x714   : > { %v2655_v37 = vpop.xlane.xlu1 %2654  ;;  %4278 = vpow2.f32 %v1711_v62  ;;  %v6415_v56 = vsub.f32 %v6413_v60, %v6414_v43  ;;  %6416 = vst [vmem:[#allocation12_spill] sm:$0xff] %v5846_v18  ;;  %v6418_v62 = vsub.f32 %v6417_v52, %v5459_v17  ;;  %v1795_v43 = vmul.f32 %v5835_v58, %v1787_v61  ;;  %v1786_v61 = vld [vmem:[#allocation4 + $0x40] sm:$0xff] }
 0x715   : > { %6406 = vst [vmem:[#allocation11_spill] sm:$0xff] %v5805_v11  ;;  %2991 = vst.msk [vmem:[#allocation3 + $0xf8] sm:$0xff] %vm738_vm3, %v5805_v11  ;;  %v5820_v2 = vmax.f32 %v5793_v4, %v2655_v37  ;;  %2714 = vperm.xlu1 %4144, %v5777_v40   ;;  %4280 = vpow2.f32 %v1717_v24  ;;  %v1323_v17 = vmul.f32 %v5846_v18, %v1315_v35 }
 0x716   : > { %v2658_v1 = vpop.xlane.xlu0 %2657  ;;  %v2197_v19 = vmul.f32 1.442695, %v6415_v56  ;;  %v2203_v27 = vmul.f32 1.442695, %v6418_v62  ;;  %v5853_v56 = vpop.eup %4268  ;;  %v6421_v62 = vld [vmem:[#allocation24_spill] sm:$0xff] }
 0x717   : > { %2988 = vst.msk [vmem:[#allocation3 + $0xe0] sm:$0xff] %vm738_vm3, %v5820_v2  ;;  %v5832_v37 = vmax.f32 %v5808_v34, %v2658_v1  ;;  %2719 = vperm.xlu0 %4145, %v5820_v2  }
 0x718   : > { %v1344_v9 = vpop.xlane.xlu1 %1343  ;;  %4282 = vpow2.f32 %v2197_v19 }
 0x719   : > { %2989 = vst.msk [vmem:[#allocation3 + $0xe8] sm:$0xff] %vm738_vm3, %v5832_v37  ;;  %v1354_v1 = vadd.f32 %v1344_v9, %v1322_v55  ;;  %2734 = vperm.xlu1 %4144, %v5805_v11   ;;  %v2276_v55 = vld [vmem:[#allocation4 + $0x80] sm:$0xff]  ;;  %v6419_v9 = vld [vmem:[#allocation52_spill] sm:$0xff]  ;;  %4284 = vpow2.f32 %v2203_v27 }
 0x71a   : > { %v1341_v31 = vpop.xlane.xlu0 %1340  ;;  %v6420_v38 = vsub.f32 %v6419_v9, %v5462_v16  ;;  %v2284_v19 = vmul.f32 %v5853_v56, %v2276_v55 }
 0x71b   : > { %1363 = vst.msk [vmem:[#allocation4 + $0x30] sm:$0xff] %vm738_vm3, %v1354_v1  ;;  %v1353_v60 = vadd.f32 %v1341_v31, %v1321_v54  ;;  %v5861_v1 = vpop.eup %4270 }
 0x71c   : > { %v1807_v25 = vpop.xlane.xlu1 %1806  ;;  %v2201_v29 = vmul.f32 1.442695, %v6420_v38  ;;  %v5865_v52 = vpop.eup %4272  ;;  %v2278_v38 = vld [vmem:[#allocation4 + $0x90] sm:$0xff]  ;;  %v1794_v9 = vmul.f32 %v5861_v1, %v1786_v61 }
 0x71d   : > { %1362 = vst.msk [vmem:[#allocation4 + $0x28] sm:$0xff] %vm738_vm3, %v1353_v60  ;;  %v1827_v24 = vadd.f32 %v1807_v25, %v1795_v43  ;;  %2724 = vperm.xlu1 %4144, %v5832_v37   ;;  %v6422_v25 = vld [vmem:[#allocation26_spill] sm:$0xff]  ;;  %v5872_v27 = vpop.eup %4274 }
 0x71e   : > { %v1347_v31 = vpop.xlane.xlu0 %1346  ;;  %v6423_v60 = vsub.f32 %v6421_v62, %v6422_v25  ;;  %4286 = vpow2.f32 %v2201_v29  ;;  %v1790_v62 = vld [vmem:[#allocation4 + $0x60] sm:$0xff] }
 0x71f   : > { %1835 = vst.msk [vmem:[#allocation4 + $0x48] sm:$0xff] %vm738_vm3, %v1827_v24  ;;  %v1355_v54 = vadd.f32 %v1347_v31, %v1323_v17  ;;  %v1788_v17 = vld [vmem:[#allocation4 + $0x50] sm:$0xff]  ;;  %v2286_v31 = vmul.f32 %v5865_v52, %v2278_v38 }
 0x720   : > { %v2294_v16 = vpop.xlane.xlu1 %2293  ;;  %v1715_v43 = vmul.f32 1.442695, %v6423_v60  ;;  %v5876_v18 = vpop.eup %4276 }
 0x721   : > { %1364 = vst.msk [vmem:[#allocation4 + $0x38] sm:$0xff] %vm738_vm3, %v1355_v54  ;;  %v2316_v35 = vadd.f32 %v2294_v16, %v2284_v19  ;;  %v1796_v54 = vmul.f32 %v5872_v27, %v1788_v17  ;;  %v5880_v61 = vpop.eup %4278  ;;  %v1789_v16 = vld [vmem:[#allocation4 + $0x58] sm:$0xff]  ;;  %v1798_v60 = vmul.f32 %v5876_v18, %v1790_v62 }
 0x722   : > { %v1804_v24 = vpop.xlane.xlu0 %1803  ;;  %4288 = vpow2.f32 %v1715_v43  ;;  %v5884_v38 = vpop.eup %4280 }
 0x723   : > { %2324 = vst.msk [vmem:[#allocation4 + $0x80] sm:$0xff] %vm738_vm3, %v2316_v35  ;;  %v1826_v55 = vadd.f32 %v1804_v24, %v1794_v9  ;;  %v1792_v9 = vld [vmem:[#allocation4 + $0x70] sm:$0xff] }
 0x724   : > { %v2300_v11 = vpop.xlane.xlu1 %2299 }
 0x725   : > { %1834 = vst.msk [vmem:[#allocation4 + $0x40] sm:$0xff] %vm738_vm3, %v1826_v55  ;;  %v2318_v29 = vadd.f32 %v2300_v11, %v2286_v31  ;;  %v1797_v11 = vmul.f32 %v5880_v61, %v1789_v16  ;;  %v5888_v24 = vpop.eup %4282  ;;  %v2277_v55 = vld [vmem:[#allocation4 + $0x88] sm:$0xff] }
 0x726   : > { %v1810_v19 = vpop.xlane.xlu0 %1809 }
 0x727   : > { %2326 = vst.msk [vmem:[#allocation4 + $0x90] sm:$0xff] %vm738_vm3, %v2318_v29  ;;  %v1828_v25 = vadd.f32 %v1810_v19, %v1796_v54  ;;  %v1800_v29 = vmul.f32 %v5884_v38, %v1792_v9  ;;  %v5892_v54 = vpop.eup %4284  ;;  %v2280_v19 = vld [vmem:[#allocation4 + $0xa0] sm:$0xff] }
 0x728   : > { %v1816_v35 = vpop.xlane.xlu1 %1815 }
 0x729   : > { %1836 = vst.msk [vmem:[#allocation4 + $0x50] sm:$0xff] %vm738_vm3, %v1828_v25  ;;  %v1830_v43 = vadd.f32 %v1816_v35, %v1798_v60  ;;  %v2285_v25 = vmul.f32 %v5888_v24, %v2277_v55  ;;  %v2279_v35 = vld [vmem:[#allocation4 + $0x98] sm:$0xff] }
 0x72a   : > { %v1813_v17 = vpop.xlane.xlu0 %1812 }
 0x72b   : > { %1838 = vst.msk [vmem:[#allocation4 + $0x60] sm:$0xff] %vm738_vm3, %v1830_v43  ;;  %v1829_v31 = vadd.f32 %v1813_v17, %v1797_v11  ;;  %v4287_v60 = vpop.eup %4286  ;;  %v2288_v43 = vmul.f32 %v5892_v54, %v2280_v19 }
 0x72c   : > { %v1822_v62 = vpop.xlane.xlu1 %1821  ;;  %v2287_v17 = vmul.f32 %v4287_v60, %v2279_v35  ;;  %v3080_v35 = vld [vmem:[#allocation4 + $0x48] sm:$0xff] }
 0x72d   : > { %1837 = vst.msk [vmem:[#allocation4 + $0x58] sm:$0xff] %vm738_vm3, %v1829_v31  ;;  %v1832_v14 = vadd.f32 %v1822_v62, %v1800_v29  ;;  %v1791_v31 = vld [vmem:[#allocation4 + $0x68] sm:$0xff]  ;;  %v6424_v29 = vld [vmem:[#allocation29_spill] sm:$0xff] }
 0x72e   : > { %v2297_v16 = vpop.xlane.xlu0 %2296 }
 0x72f   : > { %1840 = vst.msk [vmem:[#allocation4 + $0x70] sm:$0xff] %vm738_vm3, %v1832_v14  ;;  %v2317_v63 = vadd.f32 %v2297_v16, %v2285_v25  ;;  %v5899_v21 = vpop.eup %4288  ;;  %v1823_v14 = vsel %vm1187_vm2, %v6424_v29, 0.0  ;;  %v2313_v16 = vsel %vm1187_vm2, %v5594_v23, 0.0 }
 0x730   : > { %v2306_v11 = vpop.xlane.xlu1 %2305  ;;  %v1799_v62 = vmul.f32 %v5899_v21, %v1791_v31 }
 0x731   : > { %2325 = vst.msk [vmem:[#allocation4 + $0x88] sm:$0xff] %vm738_vm3, %v2317_v63  ;;  %v2320_v9 = vadd.f32 %v2306_v11, %v2288_v43  ;;  %v2307_v63 = vsel %vm1187_vm2, %v5584_v53, 0.0  ;;  %v3079_v53 = vld [vmem:[#allocation4 + $0x40] sm:$0xff] }
 0x732   : > { %v2303_v44 = vpop.xlane.xlu0 %2302 }
 0x733   : > { %2328 = vst.msk [vmem:[#allocation4 + $0xa0] sm:$0xff] %vm738_vm3, %v2320_v9  ;;  %v2319_v55 = vadd.f32 %v2303_v44, %v2287_v17  ;;  %v2310_v44 = vsel %vm1187_vm2, %v5591_v7, 0.0 }
 0x734   : > { %v3082_v23 = vld [vmem:[#allocation4 + $0x58] sm:$0xff] }
 0x735   : > { %2327 = vst.msk [vmem:[#allocation4 + $0x98] sm:$0xff] %vm738_vm3, %v2319_v55 }
 0x736   : > { %1824 = vadd.xlane.f32.xlu0 %v1823_v14  ;;  %v1819_v19 = vpop.xlane.xlu0 %1818 }
 0x737   : > { %v1831_v25 = vadd.f32 %v1819_v19, %v1799_v62 }
 0x738   : > { %v3156_v7 = vld [vmem:[#allocation4 + $0x88] sm:$0xff] }
 0x739   : > { %1839 = vst.msk [vmem:[#allocation4 + $0x68] sm:$0xff] %vm738_vm3, %v1831_v25 }
 0x73a   : > { %2308 = vadd.xlane.f32.xlu0 %v2307_v63 }
 0x73e   : > { %2314 = vadd.xlane.f32.xlu0 %v2313_v16 }
 0x741   : > { %2311 = vadd.xlane.f32.xlu1 %v2310_v44 }
 0x752   : > { %1375 = vperm.xlu1 %4144, %v5625_v32   ;;  %v3081_v32 = vld [vmem:[#allocation4 + $0x50] sm:$0xff] }
 0x754   : > { %1380 = vperm.xlu0 %4145, %v5634_v5  }
 0x756   : > { %1385 = vperm.xlu1 %4144, %v5628_v36   ;;  %v6425_v36 = vsub.f32 %v5754_v28, %v5777_v40  ;;  %v6427_v28 = vsub.f32 %v5729_v6, %v5735_v12  ;;  %v3083_v6 = vld [vmem:[#allocation4 + $0x60] sm:$0xff] }
 0x758   : > { %1395 = vperm.xlu0 %4145, %v5639_v3   ;;  %v2687_v5 = vmul.f32 1.442695, %v6425_v36  ;;  %v3155_v3 = vld [vmem:[#allocation4 + $0x80] sm:$0xff]  ;;  %v2685_v40 = vmul.f32 1.442695, %v6427_v28 }
 0x75a   : > { %1390 = vperm.xlu1 %4144, %v5632_v39   ;;  %v3158_v39 = vld [vmem:[#allocation4 + $0x98] sm:$0xff]  ;;  %4290 = vpow2.f32 %v2687_v5 }
 0x75c   : > { %3089 = vperm.xlu0 %4145, %v3079_v53  }
 0x75e   : > { %1400 = vperm.xlu1 %4144, %v5810_v41   ;;  %v6426_v41 = vsub.f32 %v5746_v45, %v5764_v42  ;;  %v6428_v42 = vsub.f32 %v5737_v15, %v5752_v10 }
 0x760   : > { %3104 = vperm.xlu0 %4145, %v3082_v23   ;;  %v2683_v43 = vmul.f32 1.442695, %v6426_v41 }
 0x762   : > { %1405 = vperm.xlu1 %4144, %v5795_v26   ;;  %4292 = vpow2.f32 %v2683_v43  ;;  %v3157_v26 = vld [vmem:[#allocation4 + $0x90] sm:$0xff] }
 0x763   : > { %4294 = vpow2.f32 %v2685_v40 }
 0x764   : > { %3170 = vperm.xlu0 %4145, %v3156_v7  }
 0x766   : > { %3094 = vperm.xlu1 %4144, %v3080_v35  }
 0x767   : > { %v5934_v45 = vpop.eup %4290 }
 0x768   : > { %1858 = vperm.xlu0 %4145, %v5835_v58   ;;  %v2681_v58 = vmul.f32 1.442695, %v6428_v42 }
 0x76a   : > { %3099 = vperm.xlu1 %4144, %v3081_v32   ;;  %4296 = vpow2.f32 %v2681_v58  ;;  %v6432_v58 = vsub.f32 %v5466_v13, %v5483_v50 }
 0x76c   : > { %3180 = vperm.xlu0 %4145, %v3158_v39   ;;  %v6429_v39 = vld [vmem:[#allocation27_spill] sm:$0xff] }
 0x76e   : > { %3165 = vperm.xlu1 %4144, %v3155_v3   ;;  %v6430_v3 = vld [vmem:[#allocation28_spill] sm:$0xff] }
 0x76f   : > { %v6431_v41 = vsub.f32 %v6429_v39, %v6430_v3  ;;  %v1369_v3 = vld [vmem:[#allocation5 + $0x20] sm:$0xff] }
 0x770   : > { %1868 = vperm.xlu0 %4145, %v5880_v61  }
 0x771   : > { %v1719_v43 = vmul.f32 1.442695, %v6431_v41  ;;  %v6436_v41 = vld [vmem:[#allocation33_spill] sm:$0xff] }
 0x772   : > { %1853 = vperm.xlu1 %4144, %v5861_v1   ;;  %v5941_v1 = vpop.eup %4292 }
 0x774   : > { %2348 = vperm.xlu0 %4145, %v5888_v24  }
 0x776   : > { %3175 = vperm.xlu1 %4144, %v3157_v26  }
 0x778   : > { %2358 = vperm.xlu0 %4145, %v4287_v60  }
 0x77a   : > { %1863 = vperm.xlu1 %4144, %v5872_v27   ;;  %v5945_v27 = vpop.eup %4294 }
 0x77b   : > { %v5950_v60 = vpop.eup %4296 }
 0x77c   : > { %2844 = vperm.xlu0 %4145, %v5934_v45  }
 0x77e   : > { %2343 = vperm.xlu1 %4144, %v5853_v56  }
 0x780   : > { %2834 = vperm.xlu0 %4145, %v5941_v1  }
 0x782   : > { %2353 = vperm.xlu1 %4144, %v5865_v52  }
 0x786   : > { %3109 = vperm.xlu1 %4144, %v3083_v6   ;;  %v2205_v6 = vmul.f32 1.442695, %v6432_v58  ;;  %v6437_v58 = vsub.f32 %v5808_v34, %v5832_v37  ;;  %v1370_v34 = vld [vmem:[#allocation5 + $0x28] sm:$0xff]  ;;  %v6440_v37 = vsub.f32 %v5793_v4, %v5820_v2 }
 0x788   : > { %v2700_v12 = vpop.permute.xlu1 %2699 }
 0x789   : > { %v2737_v61 = vsub.f32 %v5665_v48, %v2700_v12 }
 0x78a   : > { %2839 = vperm.xlu1 %4144, %v5945_v27   ;;  %v2705_v15 = vpop.permute.xlu0 %2704 }
 0x78b   : > { %v2745_v10 = vmul.f32 1.442695, %v2737_v61  ;;  %v2738_v56 = vsub.f32 %v5671_v47, %v2705_v15  ;;  %v6433_v15 = vsub.f32 %v5485_v49, %v5500_v0 }
 0x78c   : > { %v2710_v24 = vpop.permute.xlu1 %2709 }
 0x78d   : > { %v2747_v11 = vmul.f32 1.442695, %v2738_v56  ;;  %v2739_v9 = vsub.f32 %v5661_v30, %v2710_v24  ;;  %4298 = vpow2.f32 %v2745_v10  ;;  %v2209_v10 = vmul.f32 1.442695, %v6433_v15  ;;  %v6438_v15 = vld [vmem:[#allocation30_spill] sm:$0xff] }
 0x78e   : > { %2829 = vperm.xlu1 %4144, %v5950_v60   ;;  %v2730_v52 = vpop.permute.xlu0 %2729  ;;  %v6434_v56 = vsub.f32 %v5464_v33, %v5480_v22  ;;  %v2281_v22 = vld [vmem:[#allocation4 + $0xa8] sm:$0xff] }
 0x78f   : > { %4300 = vpow2.f32 %v2747_v11  ;;  %v2749_v17 = vmul.f32 1.442695, %v2739_v9  ;;  %v2743_v30 = vsub.f32 %v5675_v51, %v2730_v52  ;;  %v1793_v9 = vld [vmem:[#allocation4 + $0x78] sm:$0xff] }
 0x790   : > { %v2715_v31 = vpop.permute.xlu1 %2714  ;;  %v2207_v24 = vmul.f32 1.442695, %v6434_v56 }
 0x791   : > { %v2740_v48 = vsub.f32 %v5667_v46, %v2715_v31  ;;  %4302 = vpow2.f32 %v2749_v17  ;;  %v2757_v44 = vmul.f32 1.442695, %v2743_v30 }
 0x792   : > { %v2720_v55 = vpop.permute.xlu0 %2719 }
 0x793   : > { %v2751_v29 = vmul.f32 1.442695, %v2740_v48  ;;  %v2741_v47 = vsub.f32 %v5679_v59, %v2720_v55 }
 0x794   : > { %v2735_v14 = vpop.permute.xlu1 %2734 }
 0x795   : > { %4304 = vpow2.f32 %v2751_v29  ;;  %v2744_v62 = vsub.f32 %v5683_v20, %v2735_v14  ;;  %v2753_v25 = vmul.f32 1.442695, %v2741_v47  ;;  %v2283_v29 = vld [vmem:[#allocation4 + $0xb8] sm:$0xff]  ;;  %v3084_v14 = vld [vmem:[#allocation4 + $0x68] sm:$0xff] }
 0x797   : > { %v2759_v19 = vmul.f32 1.442695, %v2744_v62 }
 0x798   : > { %v2725_v63 = vpop.permute.xlu1 %2724 }
 0x799   : > { %v2742_v16 = vsub.f32 %v5687_v8, %v2725_v63  ;;  %4306 = vpow2.f32 %v2759_v19  ;;  %v2282_v19 = vld [vmem:[#allocation4 + $0xb0] sm:$0xff] }
 0x79a   : > { %v4299_v53 = vpop.eup %4298  ;;  %4308 = vpow2.f32 %v2753_v25 }
 0x79b   : > { %v2755_v46 = vmul.f32 1.442695, %v2742_v16  ;;  %v2778_v13 = vsel %vm1187_vm2, %v4299_v53, 0.0 }
 0x79c   : > { %v4301_v23 = vpop.eup %4300 }
 0x79d   : > { %4310 = vpow2.f32 %v2755_v46  ;;  %v2875_v7 = vpack.c.bf16 %v4301_v23, %v4299_v53  ;;  %v2781_v8 = vsel %vm1187_vm2, %v4301_v23, 0.0  ;;  %v1365_v23 = vld [vmem:[#allocation5] sm:$0xff] }
 0x79e   : > { %4312 = vpow2.f32 %v2757_v44  ;;  %v4303_v59 = vpop.eup %4302 }
 0x79f   : > { %4033 = vmatprep.mubr.msk.bf16.mxu1 %vm1187_vm2, %v2875_v7  ;;  %4314 = vpow2.f32 %v1719_v43  ;;  %v2784_v61 = vsel %vm1187_vm2, %v4303_v59, 0.0 }
 0x7a0   : > { %4316 = vpow2.f32 %v2205_v6  ;;  %v2691_v6 = vmul.f32 1.442695, %v6437_v58  ;;  %v6447_v58 = vld [vmem:[#allocation55_spill] sm:$0xff] }
 0x7a1   : > { %4318 = vpow2.f32 %v2209_v10 }
 0x7a2   : > { %v4305_v20 = vpop.eup %4304  ;;  %4320 = vpow2.f32 %v2207_v24  ;;  %v6439_v24 = vld [vmem:[#allocation35_spill] sm:$0xff] }
 0x7a3   : > { %v2876_v35 = vpack.c.bf16 %v4305_v20, %v4303_v59  ;;  %v2787_v51 = vsel %vm1187_vm2, %v4305_v20, 0.0  ;;  %v1366_v59 = vld [vmem:[#allocation5 + $0x8] sm:$0xff]  ;;  %4322 = vpow2.f32 %v2691_v6 }
 0x7a4   : > { %2788 = vadd.xlane.f32.xlu0 %v2787_v51 }
 0x7a5   : > { %4034 = vmatmul.mubr.msk.bf16.vlgmr.msra.gmra.mxu1 %vm1187_vm2, %v2876_v35  ;;  %v3085_v35 = vld [vmem:[#allocation4 + $0x70] sm:$0xff] }
 0x7a6   : > { %v4307_v32 = vpop.eup %4306 }
 0x7a7   : > { %v4309_v36 = vpop.eup %4308  ;;  %v2799_v28 = vsel %vm1187_vm2, %v4307_v32, 0.0 }
 0x7a8   : > { %2782 = vadd.xlane.f32.xlu0 %v2781_v8  ;;  %v2790_v52 = vsel %vm1187_vm2, %v4309_v36, 0.0 }
 0x7aa   : > { %v4311_v5 = vpop.eup %4310 }
 0x7ab   : > { %v4313_v26 = vpop.eup %4312  ;;  %v2877_v40 = vpack.c.bf16 %v4311_v5, %v4309_v36  ;;  %v2793_v12 = vsel %vm1187_vm2, %v4311_v5, 0.0  ;;  %v1367_v36 = vld [vmem:[#allocation5 + $0x10] sm:$0xff]  ;;  %v6435_v5 = vld [vmem:[#allocation31_spill] sm:$0xff] }
 0x7ac   : > { %2800 = vadd.xlane.f32.xlu0 %v2799_v28  ;;  %v2878_v42 = vpack.c.bf16 %v4307_v32, %v4313_v26  ;;  %v2796_v50 = vsel %vm1187_vm2, %v4313_v26, 0.0  ;;  %v5982_v11 = vpop.eup %4314  ;;  %v3159_v28 = vld [vmem:[#allocation4 + $0xa0] sm:$0xff] }
 0x7ad   : > { %4037 = vmatprep.mubr.msk.bf16.mxu1 %vm1187_vm2, %v2877_v40  ;;  %v1801_v49 = vmul.f32 %v5982_v11, %v1793_v9  ;;  %v5986_v0 = vpop.eup %4316 }
 0x7ae   : > { %4038 = vmatmul.mubr.msk.bf16.gmra.mxu1 %vm1187_vm2, %v2878_v42  ;;  %v2289_v31 = vmul.f32 %v5986_v0, %v2281_v22  ;;  %v5990_v48 = vpop.eup %4318 }
 0x7af   : > { %v5992_v62 = vpop.eup %4320  ;;  %v2291_v30 = vmul.f32 %v5990_v48, %v2283_v29  ;;  %v6442_v29 = vld [vmem:[#allocation37_spill] sm:$0xff] }
 0x7b0   : > { %2794 = vadd.xlane.f32.xlu0 %v2793_v12  ;;  %v2290_v16 = vmul.f32 %v5992_v62, %v2282_v19  ;;  %v1844_v19 = vld [vmem:[#allocation5 + $0x48] sm:$0xff] }
 0x7b2   : > { %2785 = vadd.xlane.f32.xlu1 %v2784_v61  ;;  %v1368_v61 = vld [vmem:[#allocation5 + $0x18] sm:$0xff] }
 0x7b6   : > { %2779 = vadd.xlane.f32.xlu1 %v2778_v13 }
 0x7ba   : > { %2797 = vadd.xlane.f32.xlu1 %v2796_v50 }
 0x7be   : > { %2791 = vadd.xlane.f32.xlu1 %v2790_v52  ;;  %v2689_v52 = vmul.f32 1.442695, %v6440_v37 }
 0x7bf   : > { %v1825_v33 = vpop.xlane.xlu0 %1824 }
 0x7c0   : > { %v1833_v17 = vadd.f32 %v1825_v33, %v1801_v49  ;;  %v6441_v49 = vld [vmem:[#allocation32_spill] sm:$0xff]  ;;  %4324 = vpow2.f32 %v2689_v52 }
 0x7c1   : > { %v2335_v52 = vld [vmem:[#allocation5 + $0x90] sm:$0xff] }
 0x7c2   : > { %1841 = vst.msk [vmem:[#allocation4 + $0x78] sm:$0xff] %vm738_vm3, %v1833_v17 }
 0x7c3   : > { %v2309_v55 = vpop.xlane.xlu0 %2308 }
 0x7c4   : > { %v2321_v47 = vadd.f32 %v2309_v55, %v2289_v31  ;;  %v1371_v55 = vld [vmem:[#allocation5 + $0x30] sm:$0xff] }
 0x7c6   : > { %2329 = vst.msk [vmem:[#allocation4 + $0xa8] sm:$0xff] %vm738_vm3, %v2321_v47  ;;  %3114 = vperm.xlu0 %4145, %v3084_v14  }
 0x7c7   : > { %v2315_v25 = vpop.xlane.xlu0 %2314 }
 0x7c8   : > { %v2323_v63 = vadd.f32 %v2315_v25, %v2291_v30 }
 0x7c9   : > { %v3086_v44 = vld [vmem:[#allocation4 + $0x78] sm:$0xff] }
 0x7ca   : > { %2331 = vst.msk [vmem:[#allocation4 + $0xb8] sm:$0xff] %vm738_vm3, %v2323_v63  ;;  %v2312_v53 = vpop.xlane.xlu1 %2311  ;;  %3124 = vperm.xlu0 %4145, %v3086_v44   ;;  %v6026_v44 = vpop.eup %4322 }
 0x7cb   : > { %v2322_v46 = vadd.f32 %v2312_v53, %v2290_v16 }
 0x7cd   : > { %2330 = vst.msk [vmem:[#allocation4 + $0xb0] sm:$0xff] %vm738_vm3, %v2322_v46  ;;  %v3160_v7 = vld [vmem:[#allocation4 + $0xa8] sm:$0xff] }
 0x7ce   : > { %v1376_v20 = vpop.permute.xlu1 %1375  ;;  %3190 = vperm.xlu0 %4145, %v3160_v7  }
 0x7cf   : > { %v1413_v51 = vmul.f32 %v1376_v20, %v1365_v23  ;;  %3119 = vperm.xlu1 %4144, %v3085_v35   ;;  %v1381_v8 = vpop.permute.xlu0 %1380  ;;  %v1846_v23 = vld [vmem:[#allocation5 + $0x58] sm:$0xff]  ;;  %v1843_v20 = vld [vmem:[#allocation5 + $0x40] sm:$0xff]  ;;  %v2334_v35 = vld [vmem:[#allocation5 + $0x88] sm:$0xff] }
 0x7d0   : > { %v1414_v32 = vmul.f32 %v1381_v8, %v1366_v59 }
 0x7d1   : > { %v1502_v39 = vadd.f32 %v6435_v5, %v1413_v51  ;;  %v3162_v56 = vld [vmem:[#allocation4 + $0xb8] sm:$0xff]  ;;  %v6445_v51 = vld [vmem:[#allocation40_spill] sm:$0xff] }
 0x7d2   : > { %v1503_v43 = vadd.f32 %v6436_v41, %v1414_v32  ;;  %v1386_v26 = vpop.permute.xlu1 %1385  ;;  %1878 = vperm.xlu0 %4145, %v5899_v21   ;;  %v2336_v41 = vld [vmem:[#allocation5 + $0x98] sm:$0xff] }
 0x7d3   : > { %1510 = vst.msk [vmem:[#allocation5] sm:$0xff] %vm803_vm1, %v1502_v39  ;;  %v1415_v40 = vmul.f32 %v1386_v26, %v1367_v36  ;;  %3185 = vperm.xlu1 %4144, %v3159_v28   ;;  %v1396_v42 = vpop.permute.xlu0 %1395  ;;  %v6446_v39 = vld [vmem:[#allocation39_spill] sm:$0xff] }
 0x7d4   : > { %1511 = vst.msk [vmem:[#allocation5 + $0x8] sm:$0xff] %vm803_vm1, %v1503_v43  ;;  %v1417_v12 = vmul.f32 %v1396_v42, %v1369_v3  ;;  %v3161_v17 = vld [vmem:[#allocation4 + $0xb0] sm:$0xff] }
 0x7d5   : > { %v1504_v10 = vadd.f32 %v6438_v15, %v1415_v40  ;;  %v1845_v42 = vld [vmem:[#allocation5 + $0x50] sm:$0xff] }
 0x7d6   : > { %v1506_v13 = vadd.f32 %v6439_v24, %v1417_v12  ;;  %v1391_v21 = vpop.permute.xlu1 %1390  ;;  %3200 = vperm.xlu0 %4145, %v3162_v56   ;;  %v6448_v56 = vld [vmem:[#allocation38_spill] sm:$0xff] }
 0x7d7   : > { %1512 = vst.msk [vmem:[#allocation5 + $0x10] sm:$0xff] %vm803_vm1, %v1504_v10  ;;  %v1416_v50 = vmul.f32 %v1391_v21, %v1368_v61  ;;  %1873 = vperm.xlu1 %4144, %v5876_v18   ;;  %v3090_v9 = vpop.permute.xlu0 %3089  ;;  %v2333_v10 = vld [vmem:[#allocation5 + $0x80] sm:$0xff] }
 0x7d8   : > { %1514 = vst.msk [vmem:[#allocation5 + $0x20] sm:$0xff] %vm803_vm1, %v1506_v13 }
 0x7d9   : > { %v1505_v33 = vadd.f32 %v6441_v49, %v1416_v50  ;;  %v6449_v49 = vld [vmem:[#allocation54_spill] sm:$0xff] }
 0x7da   : > { %v1401_v22 = vpop.permute.xlu1 %1400  ;;  %1888 = vperm.xlu0 %4145, %v5982_v11   ;;  %v6443_v11 = vld [vmem:[#allocation34_spill] sm:$0xff] }
 0x7db   : > { %1513 = vst.msk [vmem:[#allocation5 + $0x18] sm:$0xff] %vm803_vm1, %v1505_v33  ;;  %v1418_v31 = vmul.f32 %v1401_v22, %v1370_v34  ;;  %3195 = vperm.xlu1 %4144, %v3161_v17   ;;  %v3105_v18 = vpop.permute.xlu0 %3104 }
 0x7dd   : > { %v1507_v47 = vadd.f32 %v6442_v29, %v1418_v31  ;;  %v6450_v29 = vld [vmem:[#allocation53_spill] sm:$0xff] }
 0x7de   : > { %v1406_v14 = vpop.permute.xlu1 %1405  ;;  %2368 = vperm.xlu0 %4145, %v5986_v0   ;;  %v6444_v0 = vld [vmem:[#allocation41_spill] sm:$0xff] }
 0x7df   : > { %1515 = vst.msk [vmem:[#allocation5 + $0x28] sm:$0xff] %vm803_vm1, %v1507_v47  ;;  %v1419_v4 = vmul.f32 %v1406_v14, %v1371_v55  ;;  %1883 = vperm.xlu1 %4144, %v5884_v38   ;;  %v3171_v2 = vpop.permute.xlu0 %3170 }
 0x7e1   : > { %v1508_v30 = vadd.f32 %v6443_v11, %v1419_v4 }
 0x7e2   : > { %v3095_v25 = vpop.permute.xlu1 %3094  ;;  %2378 = vperm.xlu0 %4145, %v5990_v48   ;;  %v6032_v48 = vpop.eup %4324 }
 0x7e3   : > { %1516 = vst.msk [vmem:[#allocation5 + $0x30] sm:$0xff] %vm803_vm1, %v1508_v30  ;;  %2363 = vperm.xlu1 %4144, %v5892_v54   ;;  %v1859_v63 = vpop.permute.xlu0 %1858  ;;  %4326 = vrcp.f32 %v3095_v25 }
 0x7e4   : > { %v1892_v16 = vmul.f32 %v1859_v63, %v1844_v19  ;;  %4328 = vrcp.f32 %v3090_v9 }
 0x7e5   : > { %4330 = vrcp.f32 %v3105_v18 }
 0x7e6   : > { %v1997_v53 = vadd.f32 %v6444_v0, %v1892_v16  ;;  %v3100_v46 = vpop.permute.xlu1 %3099  ;;  %2854 = vperm.xlu0 %4145, %v6026_v44  }
 0x7e7   : > { %2373 = vperm.xlu1 %4144, %v5992_v62   ;;  %v3181_v38 = vpop.permute.xlu0 %3180  ;;  %4332 = vrcp.f32 %v3100_v46 }
 0x7e8   : > { %2005 = vst.msk [vmem:[#allocation5 + $0x48] sm:$0xff] %vm803_vm1, %v1997_v53  ;;  %4334 = vrcp.f32 %v3171_v2 }
 0x7ea   : > { %v3166_v7 = vpop.permute.xlu1 %3165 }
 0x7eb   : > { %2849 = vperm.xlu1 %4144, %v6032_v48   ;;  %v1869_v54 = vpop.permute.xlu0 %1868  ;;  %4336 = vrcp.f32 %v3166_v7 }
 0x7ec   : > { %v1894_v59 = vmul.f32 %v1869_v54, %v1846_v23  ;;  %4338 = vrcp.f32 %v3181_v38 }
 0x7ee   : > { %v1999_v8 = vadd.f32 %v6445_v51, %v1894_v59  ;;  %v1854_v32 = vpop.permute.xlu1 %1853  ;;  %v6451_v51 = vld [vmem:[#allocation16_spill] sm:$0xff] }
 0x7ef   : > { %v1891_v36 = vmul.f32 %v1854_v32, %v1843_v20  ;;  %v2349_v62 = vpop.permute.xlu0 %2348 }
 0x7f0   : > { %2007 = vst.msk [vmem:[#allocation5 + $0x58] sm:$0xff] %vm803_vm1, %v1999_v8  ;;  %v2382_v5 = vmul.f32 %v2349_v62, %v2334_v35  ;;  %v4327_v15 = vpop.eup %4326  ;;  %v6452_v8 = vld [vmem:[#allocation11_spill] sm:$0xff] }
 0x7f1   : > { %v1996_v3 = vadd.f32 %v6446_v39, %v1891_v36  ;;  %v4329_v13 = vpop.eup %4328  ;;  %v6453_v32 = vsub.f32 %v6451_v51, %v6452_v8  ;;  %v2765_v39 = vld [vmem:[#allocation4 + $0xd8] sm:$0xff] }
 0x7f2   : > { %v2483_v43 = vadd.f32 %v5651_v57, %v2382_v5  ;;  %v3176_v26 = vpop.permute.xlu1 %3175  ;;  %v3072_v57 = vld [vmem:[#allocation5 + $0x48] sm:$0xff]  ;;  %v4331_v55 = vpop.eup %4330 }
 0x7f3   : > { %2004 = vst.msk [vmem:[#allocation5 + $0x40] sm:$0xff] %vm803_vm1, %v1996_v3  ;;  %v2359_v28 = vpop.permute.xlu0 %2358  ;;  %v6047_v37 = vmul.f32 %v4327_v15, %v3072_v57  ;;  %4340 = vrcp.f32 %v3176_v26  ;;  %v2695_v36 = vmul.f32 1.442695, %v6453_v32  ;;  %v2763_v26 = vld [vmem:[#allocation4 + $0xc8] sm:$0xff]  ;;  %v2769_v57 = vld [vmem:[#allocation4 + $0xf8] sm:$0xff] }
 0x7f4   : > { %2491 = vst.msk [vmem:[#allocation5 + $0x88] sm:$0xff] %vm803_vm1, %v2483_v43  ;;  %v2384_v40 = vmul.f32 %v2359_v28, %v2336_v41  ;;  %v4333_v14 = vpop.eup %4332  ;;  %v2773_v41 = vmul.f32 %v5934_v45, %v2765_v39  ;;  %v6454_v28 = vld [vmem:[#allocation10_spill] sm:$0xff] }
 0x7f5   : > { %v4335_v19 = vpop.eup %4334  ;;  %4342 = vpow2.f32 %v2695_v36 }
 0x7f6   : > { %v2485_v6 = vadd.f32 %v6447_v58, %v2384_v40  ;;  %v1864_v12 = vpop.permute.xlu1 %1863  ;;  %v6455_v40 = vld [vmem:[#allocation19_spill] sm:$0xff] }
 0x7f7   : > { %v1893_v61 = vmul.f32 %v1864_v12, %v1845_v42  ;;  %v3074_v18 = vld [vmem:[#allocation5 + $0x58] sm:$0xff]  ;;  %v6076_v62 = vpop.permute.xlu0 %2844  ;;  %v6456_v42 = vsub.f32 %v6454_v28, %v6455_v40  ;;  %v2771_v12 = vmul.f32 %v5941_v1, %v2763_v26  ;;  %v1848_v26 = vld [vmem:[#allocation5 + $0x68] sm:$0xff] }
 0x7f8   : > { %2493 = vst.msk [vmem:[#allocation5 + $0x98] sm:$0xff] %vm803_vm1, %v2485_v6  ;;  %v6057_v11 = vmul.f32 %v4331_v55, %v3074_v18  ;;  %v4337_v63 = vpop.eup %4336  ;;  %v2762_v55 = vld [vmem:[#allocation4 + $0xc0] sm:$0xff] }
 0x7f9   : > { %v1998_v24 = vadd.f32 %v6448_v56, %v1893_v61  ;;  %v4339_v38 = vpop.eup %4338  ;;  %v2693_v58 = vmul.f32 1.442695, %v6456_v42 }
 0x7fa   : > { %v2344_v21 = vpop.permute.xlu1 %2343  ;;  %v3071_v50 = vld [vmem:[#allocation5 + $0x40] sm:$0xff] }
 0x7fb   : > { %2006 = vst.msk [vmem:[#allocation5 + $0x50] sm:$0xff] %vm803_vm1, %v1998_v24  ;;  %v2381_v9 = vmul.f32 %v2344_v21, %v2333_v10  ;;  %v6045_v34 = vmul.f32 %v4329_v13, %v3071_v50  ;;  %v3148_v30 = vld [vmem:[#allocation5 + $0x88] sm:$0xff]  ;;  %v6078_v5 = vpop.permute.xlu0 %2834  ;;  %4344 = vpow2.f32 %v2693_v58 }
 0x7fc   : > { %v6063_v53 = vmul.f32 %v4335_v19, %v3148_v30  ;;  %v2767_v13 = vld [vmem:[#allocation4 + $0xe8] sm:$0xff]  ;;  %v2768_v19 = vld [vmem:[#allocation4 + $0xf0] sm:$0xff] }
 0x7fd   : > { %v2482_v33 = vadd.f32 %v6449_v49, %v2381_v9  ;;  %v3143_v22 = vpack.c.bf16 %v6047_v37, %v6045_v34  ;;  %v2775_v1 = vmul.f32 %v6026_v44, %v2767_v13  ;;  %v6462_v34 = vld [vmem:[#allocation58_spill] sm:$0xff] }
 0x7fe   : > { %v2354_v17 = vpop.permute.xlu1 %2353 }
 0x7ff   : > { %2490 = vst.msk [vmem:[#allocation5 + $0x80] sm:$0xff] %vm803_vm1, %v2482_v33  ;;  %v2383_v31 = vmul.f32 %v2354_v17, %v2335_v52  ;;  %v3150_v46 = vld [vmem:[#allocation5 + $0x98] sm:$0xff]  ;;  %v2764_v52 = vld [vmem:[#allocation4 + $0xd0] sm:$0xff] }
 0x800   : > { %v4341_v7 = vpop.eup %4340  ;;  %v6069_v20 = vmul.f32 %v4339_v38, %v3150_v46  ;;  %v2772_v17 = vmul.f32 %v5945_v27, %v2764_v52  ;;  %v2766_v38 = vld [vmem:[#allocation4 + $0xe0] sm:$0xff] }
 0x801   : > { %v2484_v47 = vadd.f32 %v6450_v29, %v2383_v31 }
 0x802   : > { %v3073_v4 = vld [vmem:[#allocation5 + $0x50] sm:$0xff]  ;;  %v6080_v3 = vpop.permute.xlu1 %3109  ;;  %v4343_v61 = vpop.eup %4342 }
 0x803   : > { %2492 = vst.msk [vmem:[#allocation5 + $0x90] sm:$0xff] %vm803_vm1, %v2484_v47  ;;  %v6055_v2 = vmul.f32 %v4333_v14, %v3073_v4  ;;  %v2777_v45 = vmul.f32 %v4343_v61, %v2769_v57  ;;  %v2770_v47 = vmul.f32 %v5950_v60, %v2762_v55  ;;  %v2774_v60 = vmul.f32 %v6032_v48, %v2766_v38  ;;  %v1847_v57 = vld [vmem:[#allocation5 + $0x60] sm:$0xff] }
 0x804   : > { %4346 = vrcp.f32 %v6080_v3  ;;  %v2338_v3 = vld [vmem:[#allocation5 + $0xa8] sm:$0xff]  ;;  %v3003_v55 = vld [vmem:[#allocation4] sm:$0xff] }
 0x805   : > { %v3144_v25 = vpack.c.bf16 %v6057_v11, %v6055_v2 }
 0x806   : > { %v3147_v16 = vld [vmem:[#allocation5 + $0x80] sm:$0xff]  ;;  %v6088_v15 = vpop.permute.xlu1 %2839 }
 0x807   : > { %v6061_v0 = vmul.f32 %v4337_v63, %v3147_v16 }
 0x808   : > { %v4345_v14 = vpop.eup %4344 }
 0x809   : > { %v3219_v23 = vpack.c.bf16 %v6063_v53, %v6061_v0  ;;  %v2776_v27 = vmul.f32 %v4345_v14, %v2768_v19  ;;  %v6460_v19 = vld [vmem:[#allocation59_spill] sm:$0xff]  ;;  %v2822_v53 = vld [vmem:[#allocation5 + $0xd8] sm:$0xff] }
 0x80a   : > { %v3149_v54 = vld [vmem:[#allocation5 + $0x90] sm:$0xff]  ;;  %v6091_v50 = vpop.permute.xlu1 %2829 }
 0x80b   : > { %v6067_v59 = vmul.f32 %v4341_v7, %v3149_v54 }
 0x80d   : > { %v3220_v35 = vpack.c.bf16 %v6069_v20, %v6067_v59  ;;  %v4195_v59 = vld [vmem:[%s6286_s6 + $0x30] sm:$0xff]   ;;  %v4196_v20 = vld [vmem:[%s6286_s6 + $0x28] sm:$0xff]  }
 0x811   : > { %v4347_v38 = vpop.eup %4346 }
 0x82d   : > { %v2789_v43 = vpop.xlane.xlu0 %2788 }
 0x82e   : > { %v2805_v6 = vadd.f32 %v2789_v43, %v2773_v41  ;;  %v3004_v43 = vld [vmem:[#allocation4 + $0x8] sm:$0xff] }
 0x830   : > { %2813 = vst.msk [vmem:[#allocation4 + $0xd8] sm:$0xff] %vm738_vm3, %v2805_v6  ;;  %v3006_v6 = vld [vmem:[#allocation4 + $0x18] sm:$0xff] }
 0x831   : > { %v2783_v10 = vpop.xlane.xlu0 %2782 }
 0x832   : > { %v2803_v56 = vadd.f32 %v2783_v10, %v2771_v12  ;;  %v6457_v12 = vld [vmem:[#allocation45_spill] sm:$0xff] }
 0x834   : > { %2811 = vst.msk [vmem:[#allocation4 + $0xc8] sm:$0xff] %vm738_vm3, %v2803_v56 }
 0x835   : > { %v2801_v24 = vpop.xlane.xlu0 %2800 }
 0x836   : > { %v2809_v21 = vadd.f32 %v2801_v24, %v2777_v45  ;;  %v3008_v45 = vld [vmem:[#allocation4 + $0x28] sm:$0xff]  ;;  %v1850_v24 = vld [vmem:[#allocation5 + $0x78] sm:$0xff] }
 0x837   : > { %v3234_v9 = vld [vmem:[#allocation4 + $0xd8] sm:$0xff] }
 0x838   : > { %2817 = vst.msk [vmem:[#allocation4 + $0xf8] sm:$0xff] %vm738_vm3, %v2809_v21  ;;  %3256 = vperm.xlu0 %4145, %v3234_v9   ;;  %v6458_v9 = vld [vmem:[#allocation43_spill] sm:$0xff] }
 0x839   : > { %v2795_v49 = vpop.xlane.xlu0 %2794 }
 0x83a   : > { %v2807_v33 = vadd.f32 %v2795_v49, %v2775_v1 }
 0x83b   : > { %v2786_v31 = vpop.xlane.xlu1 %2785  ;;  %v3232_v18 = vld [vmem:[#allocation4 + $0xc8] sm:$0xff] }
 0x83c   : > { %2815 = vst.msk [vmem:[#allocation4 + $0xe8] sm:$0xff] %vm738_vm3, %v2807_v33  ;;  %v2804_v29 = vadd.f32 %v2786_v31, %v2772_v17  ;;  %3246 = vperm.xlu0 %4145, %v3232_v18   ;;  %v3010_v33 = vld [vmem:[#allocation4 + $0x38] sm:$0xff]  ;;  %v6459_v17 = vld [vmem:[#allocation44_spill] sm:$0xff] }
 0x83e   : > { %2812 = vst.msk [vmem:[#allocation4 + $0xd0] sm:$0xff] %vm738_vm3, %v2804_v29  ;;  %v1849_v29 = vld [vmem:[#allocation5 + $0x70] sm:$0xff] }
 0x83f   : > { %v2780_v4 = vpop.xlane.xlu1 %2779  ;;  %v3238_v30 = vld [vmem:[#allocation4 + $0xf8] sm:$0xff] }
 0x840   : > { %v2802_v44 = vadd.f32 %v2780_v4, %v2770_v47  ;;  %3276 = vperm.xlu0 %4145, %v3238_v30   ;;  %v2340_v30 = vld [vmem:[#allocation5 + $0xb8] sm:$0xff] }
 0x841   : > { %v3115_v63 = vpop.permute.xlu0 %3114 }
 0x842   : > { %2810 = vst.msk [vmem:[#allocation4 + $0xc0] sm:$0xff] %vm738_vm3, %v2802_v44  ;;  %4348 = vrcp.f32 %v3115_v63 }
 0x843   : > { %v2798_v16 = vpop.xlane.xlu1 %2797  ;;  %v3236_v46 = vld [vmem:[#allocation4 + $0xe8] sm:$0xff] }
 0x844   : > { %v2808_v7 = vadd.f32 %v2798_v16, %v2776_v27  ;;  %3266 = vperm.xlu0 %4145, %v3236_v46   ;;  %v3005_v27 = vld [vmem:[#allocation4 + $0x10] sm:$0xff]  ;;  %v2337_v16 = vld [vmem:[#allocation5 + $0xa0] sm:$0xff] }
 0x845   : > { %v6100_v54 = vpop.permute.xlu0 %3124  ;;  %v3233_v51 = vld [vmem:[#allocation4 + $0xd0] sm:$0xff] }
 0x846   : > { %2816 = vst.msk [vmem:[#allocation4 + $0xf0] sm:$0xff] %vm738_vm3, %v2808_v7  ;;  %3251 = vperm.xlu1 %4144, %v3233_v51   ;;  %v6461_v7 = vld [vmem:[#allocation42_spill] sm:$0xff] }
 0x847   : > { %v2792_v8 = vpop.xlane.xlu1 %2791 }
 0x848   : > { %v2806_v32 = vadd.f32 %v2792_v8, %v2774_v60  ;;  %2864 = vperm.xlu0 %4145, %v4343_v61  }
 0x849   : > { %v3191_v36 = vpop.permute.xlu0 %3190  ;;  %v3231_v39 = vld [vmem:[#allocation4 + $0xc0] sm:$0xff] }
 0x84a   : > { %2814 = vst.msk [vmem:[#allocation4 + $0xe0] sm:$0xff] %vm738_vm3, %v2806_v32  ;;  %3241 = vperm.xlu1 %4144, %v3231_v39   ;;  %4350 = vrcp.f32 %v3191_v36 }
 0x84b   : > { %v3120_v41 = vpop.permute.xlu1 %3119 }
 0x84c   : > { %3018 = vperm.xlu0 %4145, %v3004_v43  }
 0x84d   : > { %v1879_v28 = vpop.permute.xlu0 %1878  ;;  %v3237_v40 = vld [vmem:[#allocation4 + $0xf0] sm:$0xff] }
 0x84e   : > { %v1896_v42 = vmul.f32 %v1879_v28, %v1848_v26  ;;  %3271 = vperm.xlu1 %4144, %v3237_v40   ;;  %v2821_v26 = vld [vmem:[#allocation5 + $0xd0] sm:$0xff]  ;;  %v3007_v28 = vld [vmem:[#allocation4 + $0x20] sm:$0xff] }
 0x84f   : > { %v3186_v58 = vpop.permute.xlu1 %3185  ;;  %v4349_v8 = vpop.eup %4348  ;;  %v2339_v40 = vld [vmem:[#allocation5 + $0xb0] sm:$0xff] }
 0x850   : > { %v2001_v48 = vadd.f32 %v6457_v12, %v1896_v42  ;;  %3028 = vperm.xlu0 %4145, %v3006_v6   ;;  %4352 = vrcp.f32 %v3186_v58  ;;  %v2819_v6 = vld [vmem:[#allocation5 + $0xc0] sm:$0xff] }
 0x851   : > { %v3201_v61 = vpop.permute.xlu0 %3200  ;;  %v3235_v10 = vld [vmem:[#allocation4 + $0xe0] sm:$0xff]  ;;  %4354 = vrcp.f32 %v3120_v41  ;;  %v6463_v41 = vld [vmem:[#allocation57_spill] sm:$0xff] }
 0x852   : > { %2009 = vst.msk [vmem:[#allocation5 + $0x68] sm:$0xff] %vm803_vm1, %v2001_v48  ;;  %3261 = vperm.xlu1 %4144, %v3235_v10   ;;  %4356 = vrcp.f32 %v3201_v61  ;;  %v2869_v48 = vmul.f32 %v6088_v15, %v2821_v26  ;;  %v3009_v61 = vld [vmem:[#allocation4 + $0x30] sm:$0xff]  ;;  %v2867_v10 = vmul.f32 %v6091_v50, %v2819_v6  ;;  %v2870_v15 = vmul.f32 %v6076_v62, %v2822_v53  ;;  %v2823_v62 = vld [vmem:[#allocation5 + $0xe0] sm:$0xff]  ;;  %v4198_v26 = vld [vmem:[%s6286_s6 + $0x18] sm:$0xff]  }
 0x853   : > { %v1874_v56 = vpop.permute.xlu1 %1873 }
 0x854   : > { %v1895_v13 = vmul.f32 %v1874_v56, %v1847_v57  ;;  %3038 = vperm.xlu0 %4145, %v3008_v45   ;;  %v6464_v57 = vld [vmem:[#allocation56_spill] sm:$0xff] }
 0x855   : > { %v1889_v21 = vpop.permute.xlu0 %1888 }
 0x856   : > { %v2000_v52 = vadd.f32 %v6458_v9, %v1895_v13  ;;  %v1898_v1 = vmul.f32 %v1889_v21, %v1850_v24  ;;  %2859 = vperm.xlu1 %4144, %v4345_v14   ;;  %v2820_v24 = vld [vmem:[#allocation5 + $0xc8] sm:$0xff] }
 0x857   : > { %v3196_v49 = vpop.permute.xlu1 %3195 }
 0x858   : > { %2008 = vst.msk [vmem:[#allocation5 + $0x60] sm:$0xff] %vm803_vm1, %v2000_v52  ;;  %v2003_v31 = vadd.f32 %v6459_v17, %v1898_v1  ;;  %3048 = vperm.xlu0 %4145, %v3010_v33   ;;  %4358 = vrcp.f32 %v3196_v49  ;;  %v4351_v52 = vpop.eup %4350  ;;  %v2868_v1 = vmul.f32 %v6078_v5, %v2820_v24  ;;  %v6465_v49 = vld [vmem:[#allocation12_spill] sm:$0xff] }
 0x859   : > { %v2369_v18 = vpop.permute.xlu0 %2368  ;;  %v3076_v46 = vld [vmem:[#allocation5 + $0x68] sm:$0xff]  ;;  %4360 = vrcp.f32 %v6100_v54 }
 0x85a   : > { %2011 = vst.msk [vmem:[#allocation5 + $0x78] sm:$0xff] %vm803_vm1, %v2003_v31  ;;  %v2386_v47 = vmul.f32 %v2369_v18, %v2338_v3  ;;  %3013 = vperm.xlu1 %4144, %v3003_v55   ;;  %v3138_v43 = vmul.f32 %v4349_v8, %v3076_v46  ;;  %v2824_v46 = vld [vmem:[#allocation5 + $0xe8] sm:$0xff] }
 0x85b   : > { %v1884_v4 = vpop.permute.xlu1 %1883 }
 0x85c   : > { %v2487_v44 = vadd.f32 %v6460_v19, %v2386_v47  ;;  %v1897_v14 = vmul.f32 %v1884_v4, %v1849_v29  ;;  %3303 = vrot.lane.b32.xlu0 %v3143_v22, %s4477_s25 }
 0x85d   : > { %v2379_v63 = vpop.permute.xlu0 %2378  ;;  %v4353_v33 = vpop.eup %4352 }
 0x85e   : > { %2495 = vst.msk [vmem:[#allocation5 + $0xa8] sm:$0xff] %vm803_vm1, %v2487_v44  ;;  %v2002_v51 = vadd.f32 %v6461_v7, %v1897_v14  ;;  %v2388_v60 = vmul.f32 %v2379_v63, %v2340_v30  ;;  %3023 = vperm.xlu1 %4144, %v3005_v27   ;;  %v4355_v31 = vpop.eup %4354 }
 0x85f   : > { %v2364_v32 = vpop.permute.xlu1 %2363  ;;  %v3075_v39 = vld [vmem:[#allocation5 + $0x60] sm:$0xff]  ;;  %v4357_v30 = vpop.eup %4356 }
 0x860   : > { %2010 = vst.msk [vmem:[#allocation5 + $0x70] sm:$0xff] %vm803_vm1, %v2002_v51  ;;  %v2489_v37 = vadd.f32 %v6462_v34, %v2388_v60  ;;  %v2385_v22 = vmul.f32 %v2364_v32, %v2337_v16  ;;  %3315 = vrot.lane.b32.xlu0 %v3219_v23, %s4476_s12  ;;  %v3136_v36 = vmul.f32 %v4347_v38, %v3075_v39 }
 0x861   : > { %v3078_v27 = vld [vmem:[#allocation5 + $0x78] sm:$0xff]  ;;  %v2855_v38 = vpop.permute.xlu0 %2854 }
 0x862   : > { %2497 = vst.msk [vmem:[#allocation5 + $0xb8] sm:$0xff] %vm803_vm1, %v2489_v37  ;;  %v2486_v42 = vadd.f32 %v6463_v41, %v2385_v22  ;;  %3033 = vperm.xlu1 %4144, %v3007_v28   ;;  %v3145_v58 = vpack.c.bf16 %v3138_v43, %v3136_v36  ;;  %v4194_v43 = vld [vmem:[%s6286_s6 + $0x38] sm:$0xff]   ;;  %v4199_v28 = vld [vmem:[%s6286_s6 + $0x10] sm:$0xff]  }
 0x863   : > { %v2374_v12 = vpop.permute.xlu1 %2373  ;;  %4041 = vmatprep.subr.bf16.mxu1 %v4194_v43 }
 0x864   : > { %2494 = vst.msk [vmem:[#allocation5 + $0xa0] sm:$0xff] %vm803_vm1, %v2486_v42  ;;  %v2387_v0 = vmul.f32 %v2374_v12, %v2339_v40  ;;  %3307 = vrot.lane.b32.xlu0 %v3145_v58, %s4477_s25  ;;  %4042 = vmatpush3.bf16.msra.mxu1 %v4194_v43  ;;  %v4200_v40 = vld [vmem:[%s6286_s6 + $0x8] sm:$0xff]  }
 0x865   : > { %v4035_v23 = vpop.f32.mrf.mxu1  ;;  %v3152_v9 = vld [vmem:[#allocation5 + $0xa8] sm:$0xff]  ;;  %v4359_v14 = vpop.eup %4358  ;;  %4043 = vmatprep.subr.bf16.mxu1 %v4195_v59 }
 0x866   : > { %v2488_v56 = vadd.f32 %v6464_v57, %v2387_v0  ;;  %v2970_v45 = vadd.f32 %v4035_v23, %v2869_v48  ;;  %3043 = vperm.xlu1 %4144, %v3009_v61   ;;  %v6142_v47 = vmul.f32 %v4351_v52, %v3152_v9  ;;  %v4361_v32 = vpop.eup %4360  ;;  %v2826_v48 = vld [vmem:[#allocation5 + $0xf8] sm:$0xff] }
 0x867   : > { %v2937_v13 = vpop.f32.mrf.mxu1  ;;  %v2850_v18 = vpop.permute.xlu1 %2849  ;;  %v3077_v4 = vld [vmem:[#allocation5 + $0x70] sm:$0xff]  ;;  %v3142_v2 = vmul.f32 %v4361_v32, %v3078_v27 }
 0x868   : > { %2496 = vst.msk [vmem:[#allocation5 + $0xb0] sm:$0xff] %vm803_vm1, %v2488_v56  ;;  %2978 = vst.msk [vmem:[#allocation5 + $0xd0] sm:$0xff] %vm803_vm1, %v2970_v45  ;;  %v2968_v54 = vadd.f32 %v2937_v13, %v2867_v10  ;;  %v2871_v63 = vmul.f32 %v2850_v18, %v2823_v62  ;;  %v3140_v51 = vmul.f32 %v4355_v31, %v3077_v4  ;;  %4044 = vmatpush3.bf16.msra.mxu1 %v4195_v59  ;;  %v4201_v10 = vld [vmem:[%s6286_s6] sm:$0xff]   ;;  %v2825_v13 = vld [vmem:[#allocation5 + $0xf0] sm:$0xff] }
 0x869   : > { %v4036_v21 = vpop.f32.mrf.mxu1  ;;  %v3154_v5 = vld [vmem:[#allocation5 + $0xb8] sm:$0xff]  ;;  %4045 = vmatprep.subr.bf16.mxu1 %v4196_v20 }
 0x86a   : > { %2976 = vst.msk [vmem:[#allocation5 + $0xc0] sm:$0xff] %vm803_vm1, %v2968_v54  ;;  %v2971_v50 = vadd.f32 %v4036_v21, %v2870_v15  ;;  %1410 = vperm.xlu1 %4144, %v6465_v49   ;;  %v6155_v8 = vmul.f32 %v4357_v30, %v3154_v5  ;;  %v3146_v22 = vpack.c.bf16 %v3142_v2, %v3140_v51 }
 0x86b   : > { %v2940_v3 = vpop.f32.mrf.mxu1  ;;  %v3151_v17 = vld [vmem:[#allocation5 + $0xa0] sm:$0xff] }
 0x86c   : > { %2979 = vst.msk [vmem:[#allocation5 + $0xd8] sm:$0xff] %vm803_vm1, %v2971_v50  ;;  %v2969_v55 = vadd.f32 %v2940_v3, %v2868_v1  ;;  %v6140_v29 = vmul.f32 %v4353_v33, %v3151_v17  ;;  %4046 = vmatpush3.bf16.msra.mxu1 %v4196_v20 }
 0x86e   : > { %2977 = vst.msk [vmem:[#allocation5 + $0xc8] sm:$0xff] %vm803_vm1, %v2969_v55  ;;  %v6145_v19 = vpop.f32.mrf.mxu1  ;;  %3305 = vrot.lane.b32.xlu1 %v3144_v25, %s4477_s25  ;;  %v3221_v44 = vpack.c.bf16 %v6142_v47, %v6140_v29  ;;  %v2872_v25 = vmul.f32 %v2855_v38, %v2824_v46 }
 0x86f   : > { %v3153_v16 = vld [vmem:[#allocation5 + $0xb0] sm:$0xff] }
 0x870   : > { %v2953_v7 = vpop.f32.mrf.mxu1  ;;  %v6153_v60 = vmul.f32 %v4359_v14, %v3153_v16  ;;  %v3225_v15 = vld [vmem:[#allocation5 + $0xd0] sm:$0xff] }
 0x871   : > { %v2972_v39 = vadd.f32 %v2953_v7, %v2871_v63  ;;  %v3223_v3 = vld [vmem:[#allocation5 + $0xc0] sm:$0xff] }
 0x872   : > { %v4040_v34 = vpop.f32.mrf.mxu1  ;;  %3317 = vrot.lane.b32.xlu1 %v3220_v35, %s4476_s12  ;;  %v3222_v11 = vpack.c.bf16 %v6155_v8, %v6153_v60  ;;  %v4197_v35 = vld [vmem:[%s6286_s6 + $0x20] sm:$0xff]  }
 0x873   : > { %2980 = vst.msk [vmem:[#allocation5 + $0xe0] sm:$0xff] %vm803_vm1, %v2972_v39  ;;  %4047 = vmatprep.subr.bf16.mxu1 %v4197_v35  ;;  %v3226_v54 = vld [vmem:[#allocation5 + $0xd8] sm:$0xff] }
 0x874   : > { %v2956_v37 = vpop.f32.mrf.mxu1  ;;  %4048 = vmatpush3.bf16.msra.mxu1 %v4197_v35 }
 0x875   : > { %v2973_v36 = vadd.f32 %v2956_v37, %v2872_v25  ;;  %4049 = vmatprep.subr.bf16.mxu1 %v4198_v26  ;;  %v3224_v17 = vld [vmem:[#allocation5 + $0xc8] sm:$0xff] }
 0x876   : > { %3309 = vrot.lane.b32.xlu1 %v3146_v22, %s4477_s25  ;;  %v6466_v22 = vld [vmem:[#allocation36_spill] sm:$0xff] }
 0x877   : > { %2981 = vst.msk [vmem:[#allocation5 + $0xe8] sm:$0xff] %vm803_vm1, %v2973_v36 }
 0x878   : > { %4050 = vmatpush3.bf16.msra.mxu1 %v4198_v26 }
 0x879   : > { %4051 = vmatprep.subr.bf16.mxu1 %v4199_v28 }
 0x87a   : > { %v3227_v63 = vld [vmem:[#allocation5 + $0xe0] sm:$0xff] }
 0x87c   : > { %4052 = vmatpush3.bf16.msra.mxu1 %v4199_v28 }
 0x87d   : > { %4053 = vmatprep.subr.bf16.mxu1 %v4200_v40 }
 0x880   : > { %4054 = vmatpush3.bf16.msra.mxu1 %v4200_v40  ;;  %v2995_v40 = vld [vmem:[#allocation5] sm:$0xff] }
 0x881   : > { %4055 = vmatprep.subr.bf16.mxu1 %v4201_v10 }
 0x884   : > { %4056 = vmatpush3.bf16.msra.mxu1 %v4201_v10 }
 0x8b3   : > { %v3257_v41 = vpop.permute.xlu0 %3256 }
 0x8b4   : > { %4362 = vrcp.f32 %v3257_v41 }
 0x8b7   : > { %v3247_v42 = vpop.permute.xlu0 %3246 }
 0x8bb   : > { %v3277_v58 = vpop.permute.xlu0 %3276 }
 0x8bf   : > { %v3267_v6 = vpop.permute.xlu0 %3266 }
 0x8c1   : > { %v3252_v12 = vpop.permute.xlu1 %3251  ;;  %v4363_v56 = vpop.eup %4362 }
 0x8c2   : > { %4364 = vrcp.f32 %v3252_v12  ;;  %v3286_v9 = vmul.f32 %v4363_v56, %v3226_v54  ;;  %v2996_v12 = vld [vmem:[#allocation5 + $0x8] sm:$0xff]  ;;  %v2999_v54 = vld [vmem:[#allocation5 + $0x20] sm:$0xff] }
 0x8c3   : > { %v2865_v0 = vpop.permute.xlu0 %2864  ;;  %4366 = vrcp.f32 %v3247_v42 }
 0x8c4   : > { %v2874_v53 = vmul.f32 %v2865_v0, %v2826_v48 }
 0x8c5   : > { %v3242_v23 = vpop.permute.xlu1 %3241 }
 0x8c6   : > { %v2975_v61 = vadd.f32 %v4040_v34, %v2874_v53  ;;  %4368 = vrcp.f32 %v3242_v23  ;;  %v2998_v23 = vld [vmem:[#allocation5 + $0x18] sm:$0xff] }
 0x8c7   : > { %4370 = vrcp.f32 %v3267_v6  ;;  %v3019_v47 = vpop.permute.xlu0 %3018 }
 0x8c8   : > { %2983 = vst.msk [vmem:[#allocation5 + $0xf8] sm:$0xff] %vm803_vm1, %v2975_v61 }
 0x8c9   : > { %v3272_v57 = vpop.permute.xlu1 %3271 }
 0x8cd   : > { %v3262_v45 = vpop.permute.xlu1 %3261 }
 0x8ce   : > { %4372 = vrcp.f32 %v3262_v45 }
 0x8cf   : > { %v4365_v24 = vpop.eup %4364  ;;  %4374 = vrcp.f32 %v3277_v58  ;;  %v3230_v27 = vld [vmem:[#allocation5 + $0xf8] sm:$0xff]  ;;  %v2997_v58 = vld [vmem:[#allocation5 + $0x10] sm:$0xff] }
 0x8d0   : > { %4376 = vrcp.f32 %v3272_v57  ;;  %v3284_v21 = vmul.f32 %v4365_v24, %v3225_v15  ;;  %v4367_v52 = vpop.eup %4366 }
 0x8d1   : > { %v2860_v1 = vpop.permute.xlu1 %2859  ;;  %v3282_v18 = vmul.f32 %v4367_v52, %v3224_v17 }
 0x8d2   : > { %v2873_v50 = vmul.f32 %v2860_v1, %v2825_v13  ;;  %v3296_v49 = vpack.c.bf16 %v3286_v9, %v3284_v21 }
 0x8d3   : > { %v4369_v33 = vpop.eup %4368 }
 0x8d4   : > { %v2974_v31 = vadd.f32 %v6145_v19, %v2873_v50  ;;  %3329 = vrot.lane.b32.xlu1 %v3296_v49, %s4473_s14  ;;  %v3280_v62 = vmul.f32 %v4369_v33, %v3223_v3  ;;  %v4371_v5 = vpop.eup %4370  ;;  %v3228_v19 = vld [vmem:[#allocation5 + $0xe8] sm:$0xff] }
 0x8d5   : > { %v3014_v55 = vpop.permute.xlu1 %3013  ;;  %v3290_v38 = vmul.f32 %v4371_v5, %v3228_v19  ;;  %v3000_v3 = vld [vmem:[#allocation5 + $0x28] sm:$0xff] }
 0x8d6   : > { %2982 = vst.msk [vmem:[#allocation5 + $0xf0] sm:$0xff] %vm803_vm1, %v2974_v31  ;;  %v3295_v4 = vpack.c.bf16 %v3282_v18, %v3280_v62  ;;  %4378 = vrcp.f32 %v3014_v55 }
 0x8d8   : > { %3321 = vrot.lane.b32.xlu1 %v3222_v11, %s4476_s12  ;;  %3327 = vrot.lane.b32.xlu0 %v3295_v4, %s4473_s14  ;;  %v1372_v11 = vld [vmem:[#allocation5 + $0x38] sm:$0xff]  ;;  %v3001_v4 = vld [vmem:[#allocation5 + $0x30] sm:$0xff] }
 0x8d9   : > { %v3024_v30 = vpop.permute.xlu1 %3023 }
 0x8da   : > { %4380 = vrcp.f32 %v3024_v30 }
 0x8db   : > { %v4373_v14 = vpop.eup %4372  ;;  %4382 = vrcp.f32 %v3019_v47 }
 0x8dc   : > { %v4375_v16 = vpop.eup %4374  ;;  %3319 = vrot.lane.b32.xlu0 %v3221_v44, %s4476_s12  ;;  %v3288_v46 = vmul.f32 %v4373_v14, %v3227_v63  ;;  %v3029_v44 = vpop.permute.xlu0 %3028 }
 0x8dd   : > { %v4377_v7 = vpop.eup %4376  ;;  %v3034_v51 = vpop.permute.xlu1 %3033  ;;  %v3229_v60 = vld [vmem:[#allocation5 + $0xf0] sm:$0xff]  ;;  %v3294_v39 = vmul.f32 %v4375_v16, %v3230_v27  ;;  %4384 = vrcp.f32 %v3029_v44 }
 0x8de   : > { %v3297_v8 = vpack.c.bf16 %v3290_v38, %v3288_v46  ;;  %v3292_v32 = vmul.f32 %v4377_v7, %v3229_v60  ;;  %4386 = vrcp.f32 %v3034_v51 }
 0x8e0   : > { %3331 = vrot.lane.b32.xlu0 %v3297_v8, %s4473_s14  ;;  %v3298_v34 = vpack.c.bf16 %v3294_v39, %v3292_v32  ;;  %v3039_v36 = vpop.permute.xlu0 %3038  ;;  %v3736_v39 = vld [vmem:[%s6287_s7] ss:$0 sm:$0xff] }
 0x8e1   : > { %v3044_v2 = vpop.permute.xlu1 %3043  ;;  %4388 = vrcp.f32 %v3039_v36 }
 0x8e2   : > { %3333 = vrot.lane.b32.xlu1 %v3298_v34, %s4473_s14  ;;  %s376_s14 = sand.u32 1, %s4454_s28  }
 0x8e3   : > { %v4379_v35 = vpop.eup %4378  ;;  %s3651_s12 = sshll.u32 %s376_s14, 6  ;;  %s6235_s30 = scalar_lea.sflag [#allocation7], %s376_s14 }
 0x8e4   : > { %v3049_v43 = vpop.permute.xlu0 %3048  ;;  %v3052_v42 = vmul.f32 %v4379_v35, %v2995_v40  ;;  %s378_s26 = scalar_lea.vmem [#allocation6], %s3651_s12  ;;  %s4400_s12 = scalar_lea.vmem %s4399_s22, 2048 }
 0x8e5   : > { %v1411_v25 = vpop.permute.xlu1 %1410  ;;  %4390 = vrcp.f32 %v3049_v43  ;;  %s3528_s16 = sshll.u32 %s378_s26, 4  ;;  %s6231_s16 = int_to_ptr.vmem [resolvable:$true] %s3528_s16 }
 0x8e6   : > { %v1420_v37 = vmul.f32 %v1411_v25, %v1372_v11  ;;  %4392 = vrcp.f32 %v3044_v2  ;;  %s4394_s20 = scalar_lea.vmem %s6231_s16, 1024  ;;  %p4401_p1 = scmp.lt.s32.totalorder %s6231_s16, %s4399_s22 }
 0x8e7   : > { %v4381_v26 = vpop.eup %4380  ;;  %p4395_p12 = scmp.ne.s32.totalorder %s6231_s16, %s4394_s20  ;;  %p4402_p2 = scmp.lt.s32.totalorder %s4400_s12, %s4394_s20 }
 0x8e8   : > { %v1509_v29 = vadd.f32 %v6466_v22, %v1420_v37  ;;  %v3304_v20 = vpop.permute.xlu0 %3303  ;;  %v4383_v28 = vpop.eup %4382  ;;  %v3056_v0 = vmul.f32 %v4381_v26, %v2997_v58 }
 0x8e9   : > { %v3306_v59 = vpop.permute.xlu1 %3305  ;;  %v3054_v53 = vmul.f32 %v4383_v28, %v2996_v12  ;;  %p4396_p13 = pnand %p4395_p12, %p4566_p4  ;;  %p4403_p3 = por %p4402_p2, %p4401_p1 }
 0x8ea   : > { %1517 = vst.msk [vmem:[#allocation5 + $0x38] sm:$0xff] %vm803_vm1, %v1509_v29  ;;  %v4385_v41 = vpop.eup %4384 }
 0x8eb   : > { %v3058_v61 = vmul.f32 %v4385_v41, %v2998_v23  ;;  %v3067_v10 = vpack.c.bf16 %v3054_v53, %v3052_v42  ;;  %v4387_v45 = vpop.eup %4386  ;;  %p4397_p0 = pneg %p4396_p13 }
 0x8ec   : > { %v3316_v48 = vpop.permute.xlu0 %3315  ;;  %v3060_v1 = vmul.f32 %v4387_v45, %v2999_v54 }
 0x8ed   : > { %v3318_v6 = vpop.permute.xlu1 %3317  ;;  %v3068_v57 = vpack.c.bf16 %v3058_v61, %v3056_v0  ;;  %v3337_v13 = vsel %vm803_vm1, %v3067_v10, %v3304_v20  ;;  %p4404_p5 = pnand %p4403_p3, %p4397_p0 }
 0x8ee   : > { %v4389_v15 = vpop.eup %4388  ;;  %v3348_v33 = vsel %vm1187_vm2, %v3337_v13, %v3316_v48 }
 0x8ef   : > { %v3340_v21 = vsel %vm803_vm1, %v3068_v57, %v3306_v59  ;;  %v3062_v31 = vmul.f32 %v4389_v15, %v3000_v3 }
 0x8f0   : > { %v3308_v24 = vpop.permute.xlu0 %3307  ;;  %v3350_v62 = vsel %vm1187_vm2, %v3340_v21, %v3318_v6 }
 0x8f1   : > { %v3310_v56 = vpop.permute.xlu1 %3309  ;;  %v3002_v9 = vld [vmem:[#allocation5 + $0x38] sm:$0xff]  ;;  %v3069_v30 = vpack.c.bf16 %v3062_v31, %v3060_v1 }
 0x8f2   : > { %v4391_v52 = vpop.eup %4390 }
 0x8f3   : > { %v4393_v49 = vpop.eup %4392  ;;  %v3066_v18 = vmul.f32 %v4391_v52, %v3002_v9  ;;  %v3343_v16 = vsel %vm803_vm1, %v3069_v30, %v3308_v24 }
 0x8f4   : > { %v3064_v14 = vmul.f32 %v4393_v49, %v3001_v4 }
 0x8f6   : > { %v3070_v19 = vpack.c.bf16 %v3066_v18, %v3064_v14 }
 0x8f8   : > { %v3346_v7 = vsel %vm803_vm1, %v3070_v19, %v3310_v56 }
 0x946   : > { %v3330_v50 = vpop.permute.xlu1 %3329 }
 0x947   : > { %v3360_v5 = vsel %vm3355_vm4, %v3350_v62, %v3330_v50 }
 0x94a   : > { %v3328_v17 = vpop.permute.xlu0 %3327  ;;  %v3322_v27 = vpop.permute.xlu1 %3321 }
 0x94b   : > { %v3357_v55 = vsel %vm3355_vm4, %v3348_v33, %v3328_v17  ;;  %v3354_v60 = vsel %vm1187_vm2, %v3346_v7, %v3322_v27 }
 0x94c   : > { %4057 = vmatprep.mubr.bf16.mxu1 %v3357_v55 }
 0x94d   : > { %4058 = vmatmul.mubr.bf16.vlgmr.msra.gmra.mxu1 %v3360_v5 }
 0x94e   : > { %v3320_v63 = vpop.permute.xlu0 %3319 }
 0x94f   : > { %v3352_v46 = vsel %vm1187_vm2, %v3343_v16, %v3320_v63 }
 0x952   : > { %v3332_v38 = vpop.permute.xlu0 %3331 }
 0x953   : > { %v3363_v51 = vsel %vm3355_vm4, %v3352_v46, %v3332_v38 }
 0x954   : > { %v3334_v8 = vpop.permute.xlu1 %3333  ;;  %4061 = vmatprep.mubr.bf16.mxu1 %v3363_v51 }
 0x955   : > { %v3366_v32 = vsel %vm3355_vm4, %v3354_v60, %v3334_v8 }
 0x956   : > { %4062 = vmatmul.mubr.bf16.gmra.mxu1 %v3366_v32 }
 0xa0d   : > { %v4059_v34 = vpop.f32.mrf.mxu1 }
 0xa0e   : > { %v3482_v2 = vadd.f32 %v4059_v34, %v3736_v39 }
 0xa0f   : > { %v3473_v11 = vpop.f32.mrf.mxu1 }
 0xa10   : > { %3506 = vst [vmem:[%s378_s26 + $0x10] sm:$0xff] %v3482_v2  ;;  %v3474_v25 = vadd.f32 %v3736_v39, %v3473_v11 }
 0xa11   : > { %v4060_v37 = vpop.f32.mrf.mxu1 }
 0xa12   : > { %3504 = vst [vmem:[%s378_s26] sm:$0xff] %v3474_v25  ;;  %v3485_v22 = vadd.f32 %v4060_v37, %v3736_v39 }
 0xa13   : > { %v3476_v29 = vpop.f32.mrf.mxu1 }
 0xa14   : > { %3507 = vst [vmem:[%s378_s26 + $0x18] sm:$0xff] %v3485_v22  ;;  %v3477_v47 = vadd.f32 %v3736_v39, %v3476_v29 }
 0xa16   : > { %3505 = vst [vmem:[%s378_s26 + $0x8] sm:$0xff] %v3477_v47  ;;  %v4063_v44 = vpop.f32.mrf.mxu1 }
 0xa17   : > { %v3498_v36 = vadd.f32 %v4063_v44, %v3736_v39 }
 0xa18   : > { %v3489_v43 = vpop.f32.mrf.mxu1 }
 0xa19   : > { %3510 = vst [vmem:[%s378_s26 + $0x30] sm:$0xff] %v3498_v36  ;;  %v3490_v59 = vadd.f32 %v3736_v39, %v3489_v43 }
 0xa1a   : > { %v4064_v20 = vpop.f32.mrf.mxu1 }
 0xa1b   : > { %3508 = vst [vmem:[%s378_s26 + $0x20] sm:$0xff] %v3490_v59  ;;  %v3501_v35 = vadd.f32 %v4064_v20, %v3736_v39 }
 0xa1c   : > { %v3492_v26 = vpop.f32.mrf.mxu1 }
 0xa1d   : > { %3511 = vst [vmem:[%s378_s26 + $0x38] sm:$0xff] %v3501_v35  ;;  %v3493_v28 = vadd.f32 %v3736_v39, %v3492_v26 }
 0xa1f   : > { %3509 = vst [vmem:[%s378_s26 + $0x28] sm:$0xff] %v3493_v28 }
 0xa20   : > { %4407 = shalt.err (!%p4404_p5)
}
 0xa21   : > { %s4408_s14 = scalar_lea.hbm %s6229_s11, 1024  ;;  %s4412_s26 = scalar_lea.hbm %s6288_s8, 2048 }
 0xa22   : > { %p4409_p6 = scmp.ne.s32.totalorder %s6229_s11, %s4408_s14  ;;  %p4413_p10 = scmp.lt.s32.totalorder %s6229_s11, %s6288_s8 }
 0xa23   : > { %p4414_p11 = scmp.lt.s32.totalorder %s4412_s26, %s4408_s14 }
 0xa24   : > { %p4410_p7 = pnand %p4409_p6, %p4566_p4 }
 0xa25   : > { %p4415_p12 = por %p4414_p11, %p4413_p10 }
 0xa26   : > { %p4411_p9 = pneg %p4410_p7 }
 0xa28   : > { %p4416_p13 = pnand %p4415_p12, %p4411_p9 }
 0xa2a   : > { %4419 = shalt.err (!%p4416_p13)
}
 0xa2b   : > { %s4479_s19 = smov 128   ;;  %s4480_s20 = smov 8  }
 0xa2c   : > { %4081 = dma.vmem_to_hbm [thread:$0]  (%p4566_p4), %s6231_s16, 1024, %s6229_s11, %s6235_s30, %s4479_s19, %s4479_s19, %s4480_s20  }
 0xa2d PF: > { %p4087_p0 = scmp.ge.s32.totalorder %s4470_s10, 2  ;;  %s3543_s21 = sand.u32 1, %s4450_s27  }
 0xa2e   : > { %s3544_s22 = scalar_lea.sflag [#allocation7], %s3543_s21 }
 0xa2f   : > { %p4084_p1 = pnand %p4087_p0, %p4573_p8 }
 0xa31   : > { %p4085_p2 = pneg %p4084_p1 }
 0xa33   : > { %4445 = dma.done.wait (%p4085_p2), %s3544_s22, 1024  }
 0xa34   : > { %4447 = vsyncadd (%p4085_p2), %s3544_s22, 4294966272  ;;  %s21_s10 = sadd.s32 1, %s4470_s10   ;;  %s6467_s15 = sld [smem:[#allocation9_spill]] }
 0xa35   : > { %p18_p3 = scmp.ge.s32.totalorder %s21_s10, 4   ;;  %s6468_s27 = smov %s4454_s28 }
 0xa36   : > { %s6469_s28 = smov %s4458_s29  ;;  %s6470_s29 = smov %s4579_s18 }
 0xa37   : > { %s6471_s30 = smov %s4466_s9  ;;  %20 = sbr.rel (!%p18_p3) target bundleno = 4 (0x4), region = 119 }
 0xa3a   : > { %s6472_s9 = smov %s6467_s15 }
 0xa3c   :  { %3549 = vsyncpa [#allocation7], 1 }
 0xa3d   :  { %3551 = vsyncpa [#allocation7 + $0x1], 1 }

</bundles_post_ra>
